<compile_context>
chip_gen: v7x
topology: tpu7x:2x2x1
jax: 0.10.0
libtpu: 0.0.40
codegen_flags: <defaults>
</compile_context>

<pallas_src>
import jax
import jax.numpy as jnp
from jax import lax
from jax.experimental import pallas as pl
from jax.experimental.pallas import tpu as pltpu

D_IN, H1, H2, D_OUT = 32 * 32 * 3, 1024, 512, 10
D_OUT_PAD = 128          # pad final layer to a full 128-lane tile
TK = 1536                # K-block for the first (3072 -> 1024) matmul: grid of 2
EPS = 1e-5


def _bn_relu(h, bn):
    """Training-mode BatchNorm1d folded into one scale+shift, then ReLU (f32).

    bn is a packed (2, H) array: row 0 = gamma, row 1 = beta.
    """
    gamma = bn[0:1, :]
    beta = bn[1:2, :]
    mean = jnp.mean(h, axis=0, keepdims=True)
    var = jnp.mean((h - mean) * (h - mean), axis=0, keepdims=True)
    scale = gamma * lax.rsqrt(var + EPS)          # rsqrt -> EUP slot
    shift = beta - mean * scale
    return jnp.maximum(h * scale + shift, 0.0)


def mlp_kernel(x_ref,
               w1_ref, bn1_ref,
               w2_ref, bn2_ref,
               w3_ref, b3_ref,
               out_ref, acc_ref):
    k = pl.program_id(0)

    @pl.when(k == 0)
    def _():
        acc_ref[...] = jnp.zeros_like(acc_ref)

    # Layer-1 partial contraction over this K chunk (bf16 MXU, f32 accumulate).
    # x is fully resident; slice the current K chunk out of VMEM.
    start = pl.multiple_of(k * TK, 128)
    xk = x_ref[:, pl.ds(start, TK)]                              # (B, TK) bf16
    acc_ref[...] += jnp.dot(xk, w1_ref[...],
                            preferred_element_type=jnp.float32)

    @pl.when(k == pl.num_programs(0) - 1)
    def _():
        # Linear-1 bias omitted: BN(h + b) == BN(h) in training mode.
        h = _bn_relu(acc_ref[...], bn1_ref[...])                 # (B, 1024)

        # Linear 2 (bias cancelled by BN) + BN + ReLU
        h = jnp.dot(h.astype(jnp.bfloat16), w2_ref[...],
                    preferred_element_type=jnp.float32)          # (B, 512)
        h = _bn_relu(h, bn2_ref[...])

        # Linear 3 (logits, padded to 128 lanes)
        logits = jnp.dot(h.astype(jnp.bfloat16), w3_ref[...],
                         preferred_element_type=jnp.float32)
        out_ref[...] = (logits + b3_ref[...]).astype(out_ref.dtype)


def _prepare_params(params):
    """bf16 weights, packed BN params, last layer padded to 128 output lanes."""
    (w1, b1, g1, bt1, w2, b2, g2, bt2, w3, b3) = params
    del b1, b2  # exactly cancelled by the following training-mode BatchNorm1d
    w1b = w1.astype(jnp.bfloat16)
    w2b = w2.astype(jnp.bfloat16)
    bn1 = jnp.concatenate([g1, bt1], axis=0)                     # (2, H1)
    bn2 = jnp.concatenate([g2, bt2], axis=0)                     # (2, H2)
    w3p = jnp.zeros((H2, D_OUT_PAD), jnp.bfloat16)
    w3p = w3p.at[:, :D_OUT].set(w3.astype(jnp.bfloat16))
    b3p = jnp.zeros((1, D_OUT_PAD), jnp.float32).at[:, :D_OUT].set(b3)
    return (w1b, bn1, w2b, bn2, w3p, b3p)


def neural_network_forward(x_nchw, params):
    B = x_nchw.shape[0]
    x_flat = x_nchw.reshape(B, -1).astype(jnp.bfloat16)          # nn.Flatten
    (w1, bn1, w2, bn2, w3p, b3p) = _prepare_params(params)

    kt = D_IN // TK
    resident = lambda shape: pl.BlockSpec(shape, lambda k: (0,) * len(shape))

    # Memory-bound hint for XLA's scheduler.
    bytes_accessed = int(
        x_flat.size * 2 + w1.size * 2 + w2.size * 2 + w3p.size * 2
        + (bn1.size + bn2.size + b3p.size) * 4 + B * D_OUT_PAD * 4)
    flops = int(2 * B * (D_IN * H1 + H1 * H2 + H2 * D_OUT_PAD))

    out_padded = pl.pallas_call(
        mlp_kernel,
        out_shape=jax.ShapeDtypeStruct((B, D_OUT_PAD), jnp.float32),
        grid_spec=pltpu.PrefetchScalarGridSpec(
            num_scalar_prefetch=0,
            grid=(kt,),
            in_specs=[
                resident((B, D_IN)),                       # x fully resident (48 KB)
                pl.BlockSpec((TK, H1), lambda k: (k, 0)),  # W1 streamed over K
                resident((2, H1)),                         # packed gamma/beta BN1
                resident((H1, H2)),                        # W2
                resident((2, H2)),                         # packed gamma/beta BN2
                resident((H2, D_OUT_PAD)),                 # W3 (padded)
                resident((1, D_OUT_PAD)),                  # b3 (padded)
            ],
            out_specs=resident((B, D_OUT_PAD)),
            scratch_shapes=[pltpu.VMEM((B, H1), jnp.float32)],
        ),
        compiler_params=pltpu.CompilerParams(
            dimension_semantics=("arbitrary",),        # K is a reduction axis
            vmem_limit_bytes=48 * 1024 * 1024,         # < 64 MiB (v7x physical)
        ),
        cost_estimate=pl.CostEstimate(
            flops=flops,
            transcendentals=H1 + H2,                   # the two BN rsqrt sweeps
            bytes_accessed=bytes_accessed,
        ),
    )(x_flat, w1, bn1, w2, bn2, w3p, b3p)

    return out_padded[:, :D_OUT]


def init_params(key):
    """Deterministic init mimicking PyTorch defaults (uniform in +-1/sqrt(fan_in))."""
    ks = jax.random.split(key, 6)

    def linear(kw, kb, fan_in, fan_out):
        bound = 1.0 / jnp.sqrt(fan_in)
        w = jax.random.uniform(kw, (fan_in, fan_out), jnp.float32, -bound, bound)
        b = jax.random.uniform(kb, (1, fan_out), jnp.float32, -bound, bound)
        return w, b

    w1, b1 = linear(ks[0], ks[1], D_IN, H1)
    w2, b2 = linear(ks[2], ks[3], H1, H2)
    w3, b3 = linear(ks[4], ks[5], H2, D_OUT)

    # BatchNorm1d default init: gamma = 1, beta = 0
    g1, bt1 = jnp.ones((1, H1), jnp.float32), jnp.zeros((1, H1), jnp.float32)
    g2, bt2 = jnp.ones((1, H2), jnp.float32), jnp.zeros((1, H2), jnp.float32)

    return (w1, b1, g1, bt1, w2, b2, g2, bt2, w3, b3)


def reference_forward(x_nchw, params):
    """Pure-JAX reference with the full PyTorch math (biases included) and the
    same bf16 matmul-input quantization as the kernel."""
    (w1, b1, g1, bt1, w2, b2, g2, bt2, w3, b3) = params
    x = x_nchw.reshape(x_nchw.shape[0], -1).astype(jnp.bfloat16)

    def bn_relu(h, g, bt):
        mean = jnp.mean(h, axis=0, keepdims=True)
        var = jnp.mean((h - mean) * (h - mean), axis=0, keepdims=True)
        return jnp.maximum((h - mean) * (g * lax.rsqrt(var + EPS)) + bt, 0.0)

    h = jnp.dot(x, w1.astype(jnp.bfloat16),
                preferred_element_type=jnp.float32) + b1
    h = bn_relu(h, g1, bt1)
    h = jnp.dot(h.astype(jnp.bfloat16), w2.astype(jnp.bfloat16),
                preferred_element_type=jnp.float32) + b2
    h = bn_relu(h, g2, bt2)
    logits = jnp.dot(h.astype(jnp.bfloat16), w3.astype(jnp.bfloat16),
                     preferred_element_type=jnp.float32) + b3
    return logits


if __name__ == "__main__":
    key = jax.random.PRNGKey(0)
    k_x, k_p = jax.random.split(key)

    B = 8
    x = jax.random.normal(k_x, (B, 3, 32, 32), jnp.float32)   # NCHW, CIFAR-like
    params = init_params(k_p)

    logits = neural_network_forward(x, params)
    logits = jax.block_until_ready(logits)

    ref = reference_forward(x, params)
    assert logits.shape == (B, D_OUT)
    err = jnp.max(jnp.abs(logits - ref))
    assert jnp.allclose(logits, ref, atol=2e-3, rtol=2e-3), f"max abs err {err}"

    print("KERNEL_OK")
</pallas_src>

<mosaic_0001>
module attributes {stable_mosaic.version = 11 : i64} {
  func.func @mlp_kernel(%arg0: i32, %arg1: memref<8x3072xbf16, #tpu.memory_space<vmem>>, %arg2: memref<1536x1024xbf16, #tpu.memory_space<vmem>>, %arg3: memref<2x1024xf32, #tpu.memory_space<vmem>>, %arg4: memref<1024x512xbf16, #tpu.memory_space<vmem>>, %arg5: memref<2x512xf32, #tpu.memory_space<vmem>>, %arg6: memref<512x128xbf16, #tpu.memory_space<vmem>>, %arg7: memref<1x128xf32, #tpu.memory_space<vmem>>, %arg8: memref<8x128xf32, #tpu.memory_space<vmem>>, %arg9: memref<8x1024xf32, #tpu.memory_space<vmem>>) attributes {dimension_semantics = [#tpu.dimension_semantics<arbitrary>], iteration_bounds = array<i64: 2>, scalar_prefetch = 0 : i64, scratch_operands = 1 : i64, tpu.core_type = #tpu.core_type<tc>, window_params = [{pipeline_mode = #tpu.pipeline_mode<synchronous>, transform_indices = @transform_0, window_bounds = array<i64: 8, 3072>}, {transform_indices = @transform_1, window_bounds = array<i64: 1536, 1024>}, {pipeline_mode = #tpu.pipeline_mode<synchronous>, transform_indices = @transform_2, window_bounds = array<i64: 2, 1024>}, {pipeline_mode = #tpu.pipeline_mode<synchronous>, transform_indices = @transform_3, window_bounds = array<i64: 1024, 512>}, {pipeline_mode = #tpu.pipeline_mode<synchronous>, transform_indices = @transform_4, window_bounds = array<i64: 2, 512>}, {pipeline_mode = #tpu.pipeline_mode<synchronous>, transform_indices = @transform_5, window_bounds = array<i64: 512, 128>}, {pipeline_mode = #tpu.pipeline_mode<synchronous>, transform_indices = @transform_6, window_bounds = array<i64: 1, 128>}, {pipeline_mode = #tpu.pipeline_mode<synchronous>, transform_indices = @transform_7, window_bounds = array<i64: 8, 128>}]} {
    %c0_i32 = arith.constant 0 : i32
    %0 = arith.cmpi eq, %arg0, %c0_i32 : i32
    %1 = arith.extui %0 : i1 to i32
    %c0_i32_0 = arith.constant 0 : i32
    %2 = arith.cmpi ne, %1, %c0_i32_0 : i32
    scf.if %2 {
      %cst_8 = arith.constant 0.000000e+00 : f32
      %15 = vector.broadcast %cst_8 : f32 to vector<8x1024xf32>
      %c0_9 = arith.constant 0 : index
      %c0_10 = arith.constant 0 : index
      %16 = vector.load %arg9[%c0_9, %c0_10] : memref<8x1024xf32, #tpu.memory_space<vmem>>, vector<8x1024xf32>
      tpu.vector_store %arg9[%c0_9, %c0_10], %15 {strides = array<i32>} : memref<8x1024xf32, #tpu.memory_space<vmem>>, vector<8x1024xf32>,
    } else {
    }
    %c1536_i32 = arith.constant 1536 : i32
    %3 = arith.muli %arg0, %c1536_i32 : i32
    %4 = tpu.assume_multiple %3, 128 : i32
    %c0 = arith.constant 0 : index
    %5 = arith.index_cast %4 : i32 to index
    %6 = vector.load %arg1[%c0, %5] : memref<8x3072xbf16, #tpu.memory_space<vmem>>, vector<8x1536xbf16>
    %c0_1 = arith.constant 0 : index
    %c0_2 = arith.constant 0 : index
    %7 = vector.load %arg9[%c0_1, %c0_2] : memref<8x1024xf32, #tpu.memory_space<vmem>>, vector<8x1024xf32>
    %c0_3 = arith.constant 0 : index
    %c0_4 = arith.constant 0 : index
    %8 = vector.load %arg2[%c0_3, %c0_4] : memref<1536x1024xbf16, #tpu.memory_space<vmem>>, vector<1536x1024xbf16>
    %cst = arith.constant dense<0.000000e+00> : vector<8x1024xf32>
    %9 = tpu.matmul %6, %8, %cst {dimension_numbers = #tpu.dot_dimension_numbers<[1], [0], [0], [1], [0, 0, 1, 1], [], []>} : vector<8x1536xbf16>, vector<1536x1024xbf16>, vector<8x1024xf32> -> vector<8x1024xf32>
    %10 = arith.addf %7, %9 : vector<8x1024xf32>
    %c0_5 = arith.constant 0 : index
    %c0_6 = arith.constant 0 : index
    %11 = vector.load %arg9[%c0_5, %c0_6] : memref<8x1024xf32, #tpu.memory_space<vmem>>, vector<8x1024xf32>
    tpu.vector_store %arg9[%c0_5, %c0_6], %10 {strides = array<i32>} : memref<8x1024xf32, #tpu.memory_space<vmem>>, vector<8x1024xf32>,
    %c1_i32 = arith.constant 1 : i32
    %12 = arith.cmpi eq, %arg0, %c1_i32 : i32
    %13 = arith.extui %12 : i1 to i32
    %c0_i32_7 = arith.constant 0 : i32
    %14 = arith.cmpi ne, %13, %c0_i32_7 : i32
    scf.if %14 {
      %c0_8 = arith.constant 0 : index
      %c0_9 = arith.constant 0 : index
      %15 = vector.load %arg9[%c0_8, %c0_9] : memref<8x1024xf32, #tpu.memory_space<vmem>>, vector<8x1024xf32>
      %c0_10 = arith.constant 0 : index
      %c0_11 = arith.constant 0 : index
      %16 = vector.load %arg3[%c0_10, %c0_11] : memref<2x1024xf32, #tpu.memory_space<vmem>>, vector<2x1024xf32>
      %17 = vector.extract_strided_slice %16 {offsets = [0, 0], sizes = [1, 1024], strides = [1, 1]} : vector<2x1024xf32> to vector<1x1024xf32>
      %18 = vector.extract_strided_slice %16 {offsets = [1, 0], sizes = [1, 1024], strides = [1, 1]} : vector<2x1024xf32> to vector<1x1024xf32>
      %cst_12 = arith.constant dense<0.000000e+00> : vector<1024xf32>
      %19 = vector.multi_reduction <add>, %15, %cst_12 [0] : vector<8x1024xf32> to vector<1024xf32>
      %20 = vector.shape_cast %19 : vector<1024xf32> to vector<1x1024xf32>
      %cst_13 = arith.constant 8.000000e+00 : f32
      %21 = vector.broadcast %cst_13 : f32 to vector<1x1024xf32>
      %22 = arith.divf %20, %21 : vector<1x1024xf32>
      %23 = vector.broadcast %22 : vector<1x1024xf32> to vector<8x1024xf32>
      %24 = arith.subf %15, %23 : vector<8x1024xf32>
      %25 = vector.broadcast %22 : vector<1x1024xf32> to vector<8x1024xf32>
      %26 = arith.subf %15, %25 : vector<8x1024xf32>
      %27 = arith.mulf %24, %26 : vector<8x1024xf32>
      %cst_14 = arith.constant dense<0.000000e+00> : vector<1024xf32>
      %28 = vector.multi_reduction <add>, %27, %cst_14 [0] : vector<8x1024xf32> to vector<1024xf32>
      %29 = vector.shape_cast %28 : vector<1024xf32> to vector<1x1024xf32>
      %cst_15 = arith.constant 8.000000e+00 : f32
      %30 = vector.broadcast %cst_15 : f32 to vector<1x1024xf32>
      %31 = arith.divf %29, %30 : vector<1x1024xf32>
      %cst_16 = arith.constant 9.99999974E-6 : f32
      %32 = vector.broadcast %cst_16 : f32 to vector<1x1024xf32>
      %33 = arith.addf %31, %32 : vector<1x1024xf32>
      %34 = math.rsqrt %33 : vector<1x1024xf32>
      %35 = arith.mulf %17, %34 : vector<1x1024xf32>
      %36 = arith.mulf %22, %35 : vector<1x1024xf32>
      %37 = arith.subf %18, %36 : vector<1x1024xf32>
      %38 = vector.broadcast %35 : vector<1x1024xf32> to vector<8x1024xf32>
      %39 = arith.mulf %15, %38 : vector<8x1024xf32>
      %40 = vector.broadcast %37 : vector<1x1024xf32> to vector<8x1024xf32>
      %41 = arith.addf %39, %40 : vector<8x1024xf32>
      %cst_17 = arith.constant 0.000000e+00 : f32
      %42 = vector.broadcast %cst_17 : f32 to vector<8x1024xf32>
      %43 = arith.maximumf %41, %42 : vector<8x1024xf32>
      %44 = arith.truncf %43 : vector<8x1024xf32> to vector<8x1024xbf16>
      %c0_18 = arith.constant 0 : index
      %c0_19 = arith.constant 0 : index
      %45 = vector.load %arg4[%c0_18, %c0_19] : memref<1024x512xbf16, #tpu.memory_space<vmem>>, vector<1024x512xbf16>
      %cst_20 = arith.constant dense<0.000000e+00> : vector<8x512xf32>
      %46 = tpu.matmul %44, %45, %cst_20 {dimension_numbers = #tpu.dot_dimension_numbers<[1], [0], [0], [1], [0, 0, 1, 1], [], []>} : vector<8x1024xbf16>, vector<1024x512xbf16>, vector<8x512xf32> -> vector<8x512xf32>
      %c0_21 = arith.constant 0 : index
      %c0_22 = arith.constant 0 : index
      %47 = vector.load %arg5[%c0_21, %c0_22] : memref<2x512xf32, #tpu.memory_space<vmem>>, vector<2x512xf32>
      %48 = vector.extract_strided_slice %47 {offsets = [0, 0], sizes = [1, 512], strides = [1, 1]} : vector<2x512xf32> to vector<1x512xf32>
      %49 = vector.extract_strided_slice %47 {offsets = [1, 0], sizes = [1, 512], strides = [1, 1]} : vector<2x512xf32> to vector<1x512xf32>
      %cst_23 = arith.constant dense<0.000000e+00> : vector<512xf32>
      %50 = vector.multi_reduction <add>, %46, %cst_23 [0] : vector<8x512xf32> to vector<512xf32>
      %51 = vector.shape_cast %50 : vector<512xf32> to vector<1x512xf32>
      %cst_24 = arith.constant 8.000000e+00 : f32
      %52 = vector.broadcast %cst_24 : f32 to vector<1x512xf32>
      %53 = arith.divf %51, %52 : vector<1x512xf32>
      %54 = vector.broadcast %53 : vector<1x512xf32> to vector<8x512xf32>
      %55 = arith.subf %46, %54 : vector<8x512xf32>
      %56 = vector.broadcast %53 : vector<1x512xf32> to vector<8x512xf32>
      %57 = arith.subf %46, %56 : vector<8x512xf32>
      %58 = arith.mulf %55, %57 : vector<8x512xf32>
      %cst_25 = arith.constant dense<0.000000e+00> : vector<512xf32>
      %59 = vector.multi_reduction <add>, %58, %cst_25 [0] : vector<8x512xf32> to vector<512xf32>
      %60 = vector.shape_cast %59 : vector<512xf32> to vector<1x512xf32>
      %cst_26 = arith.constant 8.000000e+00 : f32
      %61 = vector.broadcast %cst_26 : f32 to vector<1x512xf32>
      %62 = arith.divf %60, %61 : vector<1x512xf32>
      %cst_27 = arith.constant 9.99999974E-6 : f32
      %63 = vector.broadcast %cst_27 : f32 to vector<1x512xf32>
      %64 = arith.addf %62, %63 : vector<1x512xf32>
      %65 = math.rsqrt %64 : vector<1x512xf32>
      %66 = arith.mulf %48, %65 : vector<1x512xf32>
      %67 = arith.mulf %53, %66 : vector<1x512xf32>
      %68 = arith.subf %49, %67 : vector<1x512xf32>
      %69 = vector.broadcast %66 : vector<1x512xf32> to vector<8x512xf32>
      %70 = arith.mulf %46, %69 : vector<8x512xf32>
      %71 = vector.broadcast %68 : vector<1x512xf32> to vector<8x512xf32>
      %72 = arith.addf %70, %71 : vector<8x512xf32>
      %cst_28 = arith.constant 0.000000e+00 : f32
      %73 = vector.broadcast %cst_28 : f32 to vector<8x512xf32>
      %74 = arith.maximumf %72, %73 : vector<8x512xf32>
      %75 = arith.truncf %74 : vector<8x512xf32> to vector<8x512xbf16>
      %c0_29 = arith.constant 0 : index
      %c0_30 = arith.constant 0 : index
      %76 = vector.load %arg6[%c0_29, %c0_30] : memref<512x128xbf16, #tpu.memory_space<vmem>>, vector<512x128xbf16>
      %cst_31 = arith.constant dense<0.000000e+00> : vector<8x128xf32>
      %77 = tpu.matmul %75, %76, %cst_31 {dimension_numbers = #tpu.dot_dimension_numbers<[1], [0], [0], [1], [0, 0, 1, 1], [], []>} : vector<8x512xbf16>, vector<512x128xbf16>, vector<8x128xf32> -> vector<8x128xf32>
      %c0_32 = arith.constant 0 : index
      %c0_33 = arith.constant 0 : index
      %78 = vector.load %arg7[%c0_32, %c0_33] : memref<1x128xf32, #tpu.memory_space<vmem>>, vector<1x128xf32>
      %79 = vector.broadcast %78 : vector<1x128xf32> to vector<8x128xf32>
      %80 = arith.addf %77, %79 : vector<8x128xf32>
      %c0_34 = arith.constant 0 : index
      %c0_35 = arith.constant 0 : index
      %81 = vector.load %arg8[%c0_34, %c0_35] : memref<8x128xf32, #tpu.memory_space<vmem>>, vector<8x128xf32>
      tpu.vector_store %arg8[%c0_34, %c0_35], %80 {strides = array<i32>} : memref<8x128xf32, #tpu.memory_space<vmem>>, vector<8x128xf32>,
    } else {
    }
    return
  }
  func.func @transform_0(%arg0: i32) -> (i32, i32) {
    %c0_i32 = arith.constant 0 : i32
    %c0_i32_0 = arith.constant 0 : i32
    %c0_i32_1 = arith.constant 0 : i32
    return %c0_i32, %c0_i32_0 : i32, i32
  }
  func.func @transform_1(%arg0: i32) -> (i32, i32) {
    %c0_i32 = arith.constant 0 : i32
    %c0_i32_0 = arith.constant 0 : i32
    return %arg0, %c0_i32 : i32, i32
  }
  func.func @transform_2(%arg0: i32) -> (i32, i32) {
    %c0_i32 = arith.constant 0 : i32
    %c0_i32_0 = arith.constant 0 : i32
    %c0_i32_1 = arith.constant 0 : i32
    return %c0_i32, %c0_i32_0 : i32, i32
  }
  func.func @transform_3(%arg0: i32) -> (i32, i32) {
    %c0_i32 = arith.constant 0 : i32
    %c0_i32_0 = arith.constant 0 : i32
    %c0_i32_1 = arith.constant 0 : i32
    return %c0_i32, %c0_i32_0 : i32, i32
  }
  func.func @transform_4(%arg0: i32) -> (i32, i32) {
    %c0_i32 = arith.constant 0 : i32
    %c0_i32_0 = arith.constant 0 : i32
    %c0_i32_1 = arith.constant 0 : i32
    return %c0_i32, %c0_i32_0 : i32, i32
  }
  func.func @transform_5(%arg0: i32) -> (i32, i32) {
    %c0_i32 = arith.constant 0 : i32
    %c0_i32_0 = arith.constant 0 : i32
    %c0_i32_1 = arith.constant 0 : i32
    return %c0_i32, %c0_i32_0 : i32, i32
  }
  func.func @transform_6(%arg0: i32) -> (i32, i32) {
    %c0_i32 = arith.constant 0 : i32
    %c0_i32_0 = arith.constant 0 : i32
    %c0_i32_1 = arith.constant 0 : i32
    return %c0_i32, %c0_i32_0 : i32, i32
  }
  func.func @transform_7(%arg0: i32) -> (i32, i32) {
    %c0_i32 = arith.constant 0 : i32
    %c0_i32_0 = arith.constant 0 : i32
    %c0_i32_1 = arith.constant 0 : i32
    return %c0_i32, %c0_i32_0 : i32, i32
  }
}

</mosaic_0001>

<bundles_post_ra>
// kernel: tpu_custom_call.1
= control target key start
LH: loop header
LB: loop body
LE: loop exit
PB: predicated region body
PF: predicated region fallthrough
CT: control target
= control target key end

     0   :  { %s12528_s0 = inlined_call_operand.hbm [shape: bf16[8,3072], index: 0, kind: input, shape index: {}]   ;;  %s12529_s1 = inlined_call_operand.hbm [shape: bf16[3072,1024], index: 1, kind: input, shape index: {}]   ;;  %s12530_s2 = inlined_call_operand.hbm [shape: f32[2,1024], index: 2, kind: input, shape index: {}]   ;;  %s12531_s3 = inlined_call_operand.hbm [shape: bf16[1024,512], index: 3, kind: input, shape index: {}]   ;;  %s12532_s4 = inlined_call_operand.hbm [shape: f32[2,512], index: 4, kind: input, shape index: {}]   ;;  %s12533_s5 = inlined_call_operand.hbm [shape: bf16[512,128], index: 5, kind: input, shape index: {}]   ;;  %s12534_s6 = inlined_call_operand.hbm [shape: f32[1,128], index: 6, kind: input, shape index: {}]   ;;  %s12535_s7 = inlined_call_operand.hbm [shape: f32[8,128], index: 7, kind: output, shape index: {}]  }
   0x1   :  { %12538 = sst [smem:[#allocation22_spill]] %s12530_s2 }
   0x2   :  { %12 = vsyncpa [#allocation4], 0 }
   0x3   :  { %13 = vsyncpa [#allocation7], 0 }
   0x4   :  { %15 = vsyncpa [#allocation7 + $0x1], 0 }
   0x5   :  { %16 = vsyncpa [#allocation10], 0 }
   0x6   :  { %17 = vsyncpa [#allocation13], 0 }
   0x7   :  { %18 = vsyncpa [#allocation5], 0  ;;  %s11099_s24 = smov 0   ;;  %s11101_s25 = smov 0  }
   0x8   :  { %s11103_s26 = smov 0   ;;  %s11105_s27 = smov 0  }
   0x9 LB: > { %s11043_s28 = smov [#allocation8]   ;;  %s11120_s30 = sadd.s32 4294967295, %s11041_s27   ;;  %s11041_s27 = sphi %s11105_s27, %s12559_s27   ;;  %s11037_s26 = sphi %s11103_s26, %s12558_s26   ;;  %s11033_s25 = sphi %s11101_s25, %s12557_s25   ;;  %s11029_s24 = sphi %s11099_s24, %s12556_s24  }
   0xa   : > { %s226_s29 = sshll.u32 %s11043_s28, 4  ;;  %p9030_p0 = scmp.ge.s32.totalorder %s11041_s27, 1  ;;  %s227_s29 = int_to_ptr.vmem [resolvable:$true] %s226_s29 }
   0xb   : > { %p12536_p1 = scmp.eq.s32.totalorder %s11120_s30, 0  ;;  %p202_p2 = scmp.lt.s32.totalorder %s11041_s27, 3 }
   0xc   : > { %s11044_s9 = smov [#allocation9]   ;;  %s11045_s12 = smov [#allocation12]  }
   0xd   : > { %p11126_p4 = pnand %p9030_p0, %p202_p2  ;;  %s236_s10 = sshll.u32 %s11044_s9, 4  ;;  %s11132_s10 = int_to_ptr.vmem [resolvable:$true] %s236_s10 }
   0xe   : > { %s260_s13 = sshll.u32 %s11045_s12, 4  ;;  %s12541_s2 = sld [smem:[#allocation22_spill]]  ;;  %s11140_s13 = int_to_ptr.vmem [resolvable:$true] %s260_s13 }
   0xf   : > { %s12539_s8 = scalar_select %p11126_p4, 1, 0 }
  0x10   : > { %p10226_p5 = pneg %p11126_p4 }
  0x12   : > { %p11136_p6 = pnand %p10226_p5, %p12536_p1 }
  0x14   : > { %s10763_s16 = scalar_lea.hbm %s12541_s2, 256  ;;  %p11150_p8 = pneg %p11136_p6 }
  0x15   : > { %p10764_p7 = scmp.ne.s32.totalorder %s12541_s2, %s10763_s16  ;;  %p10770_p11 = scmp.lt.u32.totalorder %s10763_s16, %s12541_s2 }
  0x17   : > { %p10766_p9 = pnand %p11150_p8, %p10764_p7 }
  0x19   : > { %p10767_p10 = pneg %p10766_p9 }
  0x1b   : > { %p10772_p12 = pnand %p10770_p11, %p10767_p10 }
  0x1d   : > { %10775 = shalt.err (!%p10772_p12)
}
  0x1e   : > { %s10776_s22 = scalar_lea.vmem %s227_s29, 256  ;;  %p10784_p5 = scmp.lt.s32.totalorder %s227_s29, %s227_s29 }
  0x1f   : > { %p10777_p13 = scmp.ne.s32.totalorder %s227_s29, %s10776_s22  ;;  %p10785_p3 = scmp.lt.s32.totalorder %s10776_s22, %s10776_s22 }
  0x21   : > { %p10779_p0 = pnand %p10777_p13, %p11150_p8  ;;  %p10786_p1 = por %p10785_p3, %p10784_p5 }
  0x23   : > { %p10780_p2 = pneg %p10779_p0 }
  0x25   : > { %p10787_p4 = pnand %p10786_p1, %p10780_p2 }
  0x27   : > { %10790 = shalt.err (!%p10787_p4)
}
  0x28   : > { %10232 = dma.hbm_to_vmem [thread:$0]  (!%p11136_p6), %s12541_s2, 256, %s227_s29, [#allocation7]  }
  0x29   : > { %s10791_s14 = scalar_lea.hbm %s12531_s3, 32768 }
  0x2a   : > { %p10792_p7 = scmp.ne.s32.totalorder %s12531_s3, %s10791_s14  ;;  %p10798_p1 = scmp.lt.u32.totalorder %s10791_s14, %s12531_s3 }
  0x2c   : > { %p10794_p9 = pnand %p10792_p7, %p11150_p8 }
  0x2e   : > { %p10795_p3 = pneg %p10794_p9 }
  0x30   : > { %p10800_p4 = pnand %p10798_p1, %p10795_p3 }
  0x32   : > { %10803 = shalt.err (!%p10800_p4)
}
  0x33   : > { %s10804_s29 = scalar_lea.vmem %s11132_s10, 32768  ;;  %p10812_p13 = scmp.lt.s32.totalorder %s11132_s10, %s11132_s10 }
  0x34   : > { %p10805_p10 = scmp.ne.s32.totalorder %s11132_s10, %s10804_s29  ;;  %p10813_p0 = scmp.lt.s32.totalorder %s10804_s29, %s10804_s29 }
  0x36   : > { %p10807_p11 = pnand %p10805_p10, %p11150_p8  ;;  %p10814_p2 = por %p10813_p0, %p10812_p13 }
  0x38   : > { %p10808_p12 = pneg %p10807_p11 }
  0x3a   : > { %p10815_p5 = pnand %p10814_p2, %p10808_p12 }
  0x3c   : > { %10818 = shalt.err (!%p10815_p5)
}
  0x3d   : > { %s11046_s20 = smov 256   ;;  %s11047_s21 = smov 16  }
  0x3e   : > { %10235 = dma.hbm_to_vmem [thread:$0]  (!%p11136_p6), %s12531_s3, 32768, %s11132_s10, [#allocation10], %s11046_s20, %s11046_s20, %s11047_s21  }
  0x3f   : > { %s10819_s12 = scalar_lea.hbm %s12533_s5, 4096 }
  0x40   : > { %p10820_p7 = scmp.ne.s32.totalorder %s12533_s5, %s10819_s12  ;;  %p10826_p1 = scmp.lt.u32.totalorder %s10819_s12, %s12533_s5 }
  0x42   : > { %p10822_p9 = pnand %p10820_p7, %p11150_p8 }
  0x44   : > { %p10823_p3 = pneg %p10822_p9 }
  0x46   : > { %p10828_p4 = pnand %p10826_p1, %p10823_p3 }
  0x48   : > { %10831 = shalt.err (!%p10828_p4)
}
  0x49   : > { %s10832_s10 = scalar_lea.vmem %s11140_s13, 4096  ;;  %p10840_p13 = scmp.lt.s32.totalorder %s11140_s13, %s11140_s13 }
  0x4a   : > { %p10833_p10 = scmp.ne.s32.totalorder %s11140_s13, %s10832_s10  ;;  %p10841_p0 = scmp.lt.s32.totalorder %s10832_s10, %s10832_s10 }
  0x4c   : > { %p10835_p11 = pnand %p10833_p10, %p11150_p8  ;;  %p10842_p2 = por %p10841_p0, %p10840_p13 }
  0x4e   : > { %p10836_p12 = pneg %p10835_p11 }
  0x50   : > { %p10843_p5 = pnand %p10842_p2, %p10836_p12 }
  0x52   : > { %10846 = shalt.err (!%p10843_p5)
}
  0x53   : > { %s11048_s18 = smov 64   ;;  %s11049_s29 = smov 4  }
  0x54   : > { %10241 = dma.hbm_to_vmem [thread:$0]  (!%p11136_p6), %s12533_s5, 4096, %s11140_s13, [#allocation13], %s11048_s18, %s11048_s18, %s11049_s29  }
  0x55   : > { %s11050_s22 = smov [#allocation3]   ;;  %s11051_s28 = smov [#allocation11]  }
  0x56   : > { %s215_s23 = sshll.u32 %s11050_s22, 4  ;;  %s250_s9 = sshll.u32 %s11051_s28, 4  ;;  %s216_s23 = int_to_ptr.vmem [resolvable:$true] %s215_s23  ;;  %s251_s9 = int_to_ptr.vmem [resolvable:$true] %s250_s9 }
  0x57   : > { %s10847_s15 = scalar_lea.hbm %s12528_s0, 1536 }
  0x58   : > { %p10848_p7 = scmp.ne.s32.totalorder %s12528_s0, %s10847_s15  ;;  %p10854_p1 = scmp.lt.u32.totalorder %s10847_s15, %s12528_s0 }
  0x5a   : > { %p10850_p9 = pnand %p10848_p7, %p11150_p8 }
  0x5c   : > { %p10851_p3 = pneg %p10850_p9 }
  0x5e   : > { %p10856_p4 = pnand %p10854_p1, %p10851_p3 }
  0x60   : > { %10859 = shalt.err (!%p10856_p4)
}
  0x61   : > { %s10860_s13 = scalar_lea.vmem %s216_s23, 1536  ;;  %p10868_p13 = scmp.lt.s32.totalorder %s216_s23, %s216_s23 }
  0x62   : > { %p10861_p10 = scmp.ne.s32.totalorder %s216_s23, %s10860_s13  ;;  %p10869_p0 = scmp.lt.s32.totalorder %s10860_s13, %s10860_s13 }
  0x64   : > { %p10863_p11 = pnand %p10861_p10, %p11150_p8  ;;  %p10870_p2 = por %p10869_p0, %p10868_p13 }
  0x66   : > { %p10864_p12 = pneg %p10863_p11 }
  0x68   : > { %p10871_p5 = pnand %p10870_p2, %p10864_p12 }
  0x6a   : > { %10874 = shalt.err (!%p10871_p5)
}
  0x6b   : > { %10229 = dma.hbm_to_vmem [thread:$0]  (!%p11136_p6), %s12528_s0, 1536, %s216_s23, [#allocation4]  }
  0x6c   : > { %s10875_s21 = scalar_lea.hbm %s12532_s4, 128 }
  0x6d   : > { %p10876_p7 = scmp.ne.s32.totalorder %s12532_s4, %s10875_s21  ;;  %p10882_p1 = scmp.lt.u32.totalorder %s10875_s21, %s12532_s4 }
  0x6f   : > { %p10878_p9 = pnand %p10876_p7, %p11150_p8 }
  0x71   : > { %p10879_p3 = pneg %p10878_p9 }
  0x73   : > { %p10884_p4 = pnand %p10882_p1, %p10879_p3 }
  0x75   : > { %10887 = shalt.err (!%p10884_p4)
}
  0x76   : > { %s10888_s15 = scalar_lea.vmem %s251_s9, 128  ;;  %p10896_p13 = scmp.lt.s32.totalorder %s251_s9, %s251_s9 }
  0x77   : > { %p10889_p10 = scmp.ne.s32.totalorder %s251_s9, %s10888_s15  ;;  %p10897_p0 = scmp.lt.s32.totalorder %s10888_s15, %s10888_s15 }
  0x79   : > { %p10891_p11 = pnand %p10889_p10, %p11150_p8  ;;  %p10898_p2 = por %p10897_p0, %p10896_p13 }
  0x7b   : > { %p10892_p12 = pneg %p10891_p11 }
  0x7d   : > { %p10899_p5 = pnand %p10898_p2, %p10892_p12 }
  0x7f   : > { %10902 = shalt.err (!%p10899_p5)
}
  0x80   : > { %10238 = dma.hbm_to_vmem [thread:$0]  (!%p11136_p6), %s12532_s4, 128, %s251_s9, [#allocation10]  }
  0x81   : > { %s11052_s17 = smov [#allocation14]   ;;  %s10903_s29 = scalar_lea.hbm %s12534_s6, 16 }
  0x82   : > { %s274_s10 = sshll.u32 %s11052_s17, 4  ;;  %p10904_p7 = scmp.ne.s32.totalorder %s12534_s6, %s10903_s29  ;;  %s275_s10 = int_to_ptr.vmem [resolvable:$true] %s274_s10 }
  0x83   : > { %p10910_p1 = scmp.lt.u32.totalorder %s10903_s29, %s12534_s6 }
  0x84   : > { %p10906_p9 = pnand %p10904_p7, %p11150_p8 }
  0x86   : > { %p10907_p3 = pneg %p10906_p9 }
  0x88   : > { %p10912_p4 = pnand %p10910_p1, %p10907_p3 }
  0x8a   : > { %10915 = shalt.err (!%p10912_p4)
}
  0x8b   : > { %s10916_s9 = scalar_lea.vmem %s275_s10, 16  ;;  %s10923_s28 = scalar_lea.vmem %s275_s10, 32 }
  0x8c   : > { %p10917_p10 = scmp.ne.s32.totalorder %s275_s10, %s10916_s9  ;;  %p10924_p13 = scmp.lt.s32.totalorder %s275_s10, %s275_s10 }
  0x8d   : > { %p10925_p0 = scmp.lt.s32.totalorder %s10923_s28, %s10916_s9 }
  0x8e   : > { %p10919_p11 = pnand %p10917_p10, %p11150_p8 }
  0x8f   : > { %p10926_p2 = por %p10925_p0, %p10924_p13 }
  0x90   : > { %p10920_p12 = pneg %p10919_p11 }
  0x92   : > { %p10927_p5 = pnand %p10926_p2, %p10920_p12 }
  0x94   : > { %10930 = shalt.err (!%p10927_p5)
}
  0x95   : > { %10244 = dma.hbm_to_vmem [thread:$0]  (!%p11136_p6), %s12534_s6, 16, %s275_s10, [#allocation13]  }
  0x96   : > { %s11267_s19 = sadd.s32 1, %s11041_s27   ;;  %s52_s11 = sadd.s32 1, %s11037_s26 }
  0x97   : > { %s49_s15 = ssub.s32 %s11041_s27, %s11267_s19  ;;  %p59_p8 = scmp.ne.s32.totalorder %s11037_s26, %s11033_s25 }
  0x98   : > { %p50_p7 = scmp.eq.s32.totalorder %s49_s15, 0  ;;  %p60_p9 = scmp.eq.s32.totalorder %s11041_s27, 0 }
  0x99   : > { %p65_p3 = scmp.ne.s32.totalorder %s11033_s25, %s11029_s24  ;;  %p10255_p1 = scmp.lt.s32.totalorder %s11041_s27, 2 }
  0x9a   : > { %s11279_s23 = scalar_select %p50_p7, %s11037_s26, %s52_s11  }
  0x9b   : > { %p61_p4 = por %p60_p9, %p59_p8  ;;  %p12543_p10 = scmp.eq.s32.totalorder %s11120_s30, 0 }
  0x9c   : > { %s285_s17 = sand.u32 1, %s11041_s27   ;;  %s287_s10 = sand.u32 1, %s11037_s26  }
  0x9d   : > { %p11283_p11 = por %p12543_p10, %p65_p3  ;;  %s10194_s13 = smul.u32 6144, %s287_s10 }
  0x9e   : > { %s10125_s18 = smul.u32 98304, %s11041_s27  ;;  %p11290_p6 = pnand %p10255_p1, %p61_p4 }
  0x9f   : > { %s289_s21 = scalar_lea.vmem [#allocation6], %s10194_s13  ;;  %s11301_s27 = scalar_lea.sflag [#allocation7], %s285_s17 }
  0xa0   : > { %s11297_s24 = scalar_lea.hbm %s12529_s1, %s10125_s18  ;;  %s297_s22 = sshll.u32 %s289_s21, 4  ;;  %s11299_s22 = int_to_ptr.vmem [resolvable:$true] %s297_s22 }
  0xa1   : > { %s10931_s9 = scalar_lea.hbm %s11297_s24, 98304  ;;  %p10933_p13 = pneg %p11290_p6 }
  0xa2   : > { %p10932_p12 = scmp.ne.s32.totalorder %s11297_s24, %s10931_s9  ;;  %s10936_s14 = scalar_lea.hbm %s12529_s1, 196608 }
  0xa3   : > { %p10937_p5 = scmp.lt.u32.totalorder %s11297_s24, %s12529_s1  ;;  %p10938_p8 = scmp.lt.u32.totalorder %s10936_s14, %s10931_s9 }
  0xa4   : > { %p10934_p0 = pnand %p10933_p13, %p10932_p12  ;;  %p10940_p9 = scmp.lt.u32.totalorder %s10931_s9, %s11297_s24 }
  0xa5   : > { %p10939_p7 = por %p10938_p8, %p10937_p5 }
  0xa6   : > { %p10935_p2 = pneg %p10934_p0 }
  0xa7   : > { %p10941_p3 = por %p10940_p9, %p10939_p7 }
  0xa9   : > { %p10942_p1 = pnand %p10941_p3, %p10935_p2 }
  0xab   : > { %10945 = shalt.err (!%p10942_p1)
}
  0xac   : > { %s10946_s17 = scalar_lea.vmem %s11299_s22, 98304  ;;  %s11053_s10 = smov [#allocation6]  }
  0xad   : > { %p10947_p4 = scmp.ne.s32.totalorder %s11299_s22, %s10946_s17  ;;  %s10951_s13 = sshll.u32 %s11053_s10, 4  ;;  %s10952_s13 = int_to_ptr.vmem [resolvable:$false] %s10951_s13 }
  0xae   : > { %s10953_s18 = scalar_lea.vmem %s10952_s13, 196608  ;;  %p10954_p0 = scmp.lt.s32.totalorder %s11299_s22, %s10952_s13 }
  0xaf   : > { %p10949_p10 = pnand %p10947_p4, %p10933_p13  ;;  %p10955_p5 = scmp.lt.s32.totalorder %s10953_s18, %s10946_s17 }
  0xb1   : > { %p10950_p12 = pneg %p10949_p10  ;;  %p10956_p8 = por %p10955_p5, %p10954_p0 }
  0xb3   : > { %p10957_p7 = pnand %p10956_p8, %p10950_p12 }
  0xb5   : > { %10960 = shalt.err (!%p10957_p7)
}
  0xb6   : > { %s11054_s2 = smov 512   ;;  %s11055_s20 = smov 32  }
  0xb7   : > { %10248 = dma.hbm_to_vmem [thread:$0]  (!%p11290_p6), %s11297_s24, 98304, %s11299_s22, %s11301_s27, %s11054_s2, %s11054_s2, %s11055_s20  }
  0xb8   : > { %p12546_p13 = scmp.ne.s32.totalorder %s12539_s8, 0 }
  0xb9   : > { %p12547_p2 = scmp.eq.s32.totalorder (!%p12546_p13), %s11120_s30, 0 }
  0xba   : > { %309 = sbr.rel (%p12546_p13) target bundleno = 2019 (0x7e3), region = 48 }
  0xc1   : > { %11004 = dma.done.wait (%p12547_p2), [#allocation4], 1536   ;;  %p12548_p9 = pmov %p12547_p2 }
  0xc2   : > { %s315_s21 = sand.u32 1, %s11120_s30   ;;  %s317_s9 = sand.u32 1, %s11033_s25  }
  0xc3   : > { %11006 = vsyncadd (%p12548_p9), [#allocation4], 4294965760  ;;  %s10195_s28 = smul.u32 6144, %s317_s9  ;;  %s316_s12 = scalar_lea.sflag [#allocation7], %s315_s21 }
  0xc5   : > { %s11337_s14 = scalar_lea.vmem [#allocation6], %s10195_s28 }
  0xc6   : > { %11008 = dma.done.wait (%p11283_p11), %s316_s12, 98304  }
  0xc7   : > { %11010 = vsyncadd (%p11283_p11), %s316_s12, 4294868992  ;;  %p12549_p6 = pmov %p12547_p2 }
  0xc8   : > { %p12550_p3 = pmov %p12547_p2 }
  0xc9   : > { %11012 = dma.done.wait (%p12549_p6), [#allocation7], 256  }
  0xca   : > { %11014 = vsyncadd (%p12550_p3), [#allocation7], 4294967040  ;;  %p12551_p1 = pmov %p12547_p2 }
  0xcc   : > { %11016 = dma.done.wait (%p12551_p1), [#allocation10], 32896   ;;  %p12552_p4 = pmov %p12551_p1 }
  0xcd   : > { %p12553_p10 = pmov %p12551_p1 }
  0xce   : > { %11018 = vsyncadd (%p12552_p4), [#allocation10], 4294934400 }
  0xcf   : > { %11020 = dma.done.wait (%p12553_p10), [#allocation13], 4112   ;;  %p12554_p12 = pmov %p12551_p1 }
  0xd0   : > { %p12555_p11 = scmp.ne.s32.totalorder %s11120_s30, 0 }
  0xd1   : > { %11022 = vsyncadd (%p12554_p12), [#allocation13], 4294963184  ;;  %v11056_v0 = vmov (!%p12555_p11), 0.0  }
  0xd2   : > { %370 = sbr.rel (%p12555_p11) target bundleno = 217 (0xd9), region = 80  ;;  %371 = vst [vmem:[#allocation2] sm:$0xff] (!%p12555_p11), %v11056_v0  ;;  %372 = vst [vmem:[#allocation2 + $0x8] sm:$0xff] (!%p12555_p11), %v11056_v0 }
  0xd3   : > { %373 = vst [vmem:[#allocation2 + $0x10] sm:$0xff] (!%p12555_p11), %v11056_v0  ;;  %374 = vst [vmem:[#allocation2 + $0x18] sm:$0xff] (!%p12555_p11), %v11056_v0 }
  0xd4   : > { %375 = vst [vmem:[#allocation2 + $0x20] sm:$0xff] (!%p12555_p11), %v11056_v0  ;;  %376 = vst [vmem:[#allocation2 + $0x28] sm:$0xff] (!%p12555_p11), %v11056_v0 }
  0xd5   : > { %377 = vst [vmem:[#allocation2 + $0x30] sm:$0xff] (!%p12555_p11), %v11056_v0  ;;  %378 = vst [vmem:[#allocation2 + $0x38] sm:$0xff] (!%p12555_p11), %v11056_v0 }
  0xd9 PF: > { %v398_v1 = vld [vmem:[%s11337_s14] sm:$0xff]  ;;  %s379_s8 = smul.u32 1536, %s11120_s30  ;;  %p9829_p0 = scmp.ne.s32.totalorder %s11120_s30, 1 }
  0xda   : > { %v402_v2 = vld [vmem:[%s11337_s14 + $0x20] sm:$0xff] }
  0xdb   : > { %v526_v3 = vld [vmem:[%s11337_s14 + $0x400] sm:$0xff]  ;;  %v9062_v4 = vcombine.high %v398_v1, %v402_v2  ;;  %v9061_v6 = vcombine.low %v398_v1, %v402_v2  ;;  %s11378_s16 = sshra.s32 %s379_s8, 7 }
  0xdc   : > { %v530_v5 = vld [vmem:[%s11337_s14 + $0x420] sm:$0xff]  ;;  %s9048_s29 = sshll.u32 %s11378_s16, 2 }
  0xdd   : > { %v406_v7 = vld [vmem:[%s11337_s14 + $0x40] sm:$0xff]  ;;  %v9190_v9 = vcombine.high %v526_v3, %v530_v5  ;;  %v9189_v10 = vcombine.low %v526_v3, %v530_v5  ;;  %5048 = vmatprep.subr.bf16.mxu0 %v9062_v4  ;;  %s11389_s24 = scalar_lea.vmem [#allocation3], %s9048_s29 }
  0xde   : > { %v410_v8 = vld [vmem:[%s11337_s14 + $0x60] sm:$0xff]  ;;  %5049 = vmatpush1.bf16.msra.mxu0 %v9061_v6  ;;  %v11395_v55 = vld [vmem:[%s11389_s24 + $0x8] sm:$0xff] }
  0xdf   : > { %v9070_v11 = vcombine.high %v406_v7, %v410_v8  ;;  %v534_v12 = vld [vmem:[%s11337_s14 + $0x440] sm:$0xff]  ;;  %5089 = vmatprep.subr.bf16.mxu1 %v9190_v9  ;;  %v9069_v19 = vcombine.low %v406_v7, %v410_v8  ;;  %v11405_v60 = vcombine.high %v11395_v55, %v11395_v55 }
  0xe0   : > { %v538_v13 = vld [vmem:[%s11337_s14 + $0x460] sm:$0xff]  ;;  %5090 = vmatpush1.bf16.msra.mxu1 %v9189_v10 }
  0xe1   : > { %v414_v14 = vld [vmem:[%s11337_s14 + $0x80] sm:$0xff]  ;;  %v9198_v15 = vcombine.high %v534_v12, %v538_v13  ;;  %5050 = vmatprep.subr.bf16.mxu0 %v9070_v11  ;;  %v9197_v20 = vcombine.low %v534_v12, %v538_v13  ;;  %5121 = vmatprep.mubr.bf16.mxu1 %v11405_v60 }
  0xe2   : > { %v418_v16 = vld [vmem:[%s11337_s14 + $0xa0] sm:$0xff]  ;;  %5051 = vmatpush1.bf16.msra.mxu0 %v9069_v19 }
  0xe3   : > { %v542_v17 = vld [vmem:[%s11337_s14 + $0x480] sm:$0xff]  ;;  %v9078_v21 = vcombine.high %v414_v14, %v418_v16  ;;  %5091 = vmatprep.subr.bf16.mxu1 %v9198_v15  ;;  %v9077_v27 = vcombine.low %v414_v14, %v418_v16 }
  0xe4   : > { %v546_v18 = vld [vmem:[%s11337_s14 + $0x4a0] sm:$0xff]  ;;  %5092 = vmatpush1.bf16.msra.mxu1 %v9197_v20 }
  0xe5   : > { %v9206_v22 = vcombine.high %v542_v17, %v546_v18  ;;  %v422_v23 = vld [vmem:[%s11337_s14 + $0xc0] sm:$0xff]  ;;  %5052 = vmatprep.subr.bf16.mxu0 %v9078_v21  ;;  %v9205_v28 = vcombine.low %v542_v17, %v546_v18 }
  0xe6   : > { %v426_v24 = vld [vmem:[%s11337_s14 + $0xe0] sm:$0xff]  ;;  %5053 = vmatpush1.bf16.msra.mxu0 %v9077_v27 }
  0xe7   : > { %v550_v25 = vld [vmem:[%s11337_s14 + $0x4c0] sm:$0xff]  ;;  %v9086_v29 = vcombine.high %v422_v23, %v426_v24  ;;  %5093 = vmatprep.subr.bf16.mxu1 %v9206_v22  ;;  %v9085_v35 = vcombine.low %v422_v23, %v426_v24 }
  0xe8   : > { %v554_v26 = vld [vmem:[%s11337_s14 + $0x4e0] sm:$0xff]  ;;  %5094 = vmatpush1.bf16.msra.mxu1 %v9205_v28 }
  0xe9   : > { %v9214_v30 = vcombine.high %v550_v25, %v554_v26  ;;  %v430_v31 = vld [vmem:[%s11337_s14 + $0x100] sm:$0xff]  ;;  %5054 = vmatprep.subr.bf16.mxu0 %v9086_v29  ;;  %v9213_v36 = vcombine.low %v550_v25, %v554_v26 }
  0xea   : > { %v434_v32 = vld [vmem:[%s11337_s14 + $0x120] sm:$0xff]  ;;  %5055 = vmatpush1.bf16.msra.mxu0 %v9085_v35 }
  0xeb   : > { %v558_v33 = vld [vmem:[%s11337_s14 + $0x500] sm:$0xff]  ;;  %v9094_v37 = vcombine.high %v430_v31, %v434_v32  ;;  %5095 = vmatprep.subr.bf16.mxu1 %v9214_v30  ;;  %v9093_v43 = vcombine.low %v430_v31, %v434_v32 }
  0xec   : > { %v562_v34 = vld [vmem:[%s11337_s14 + $0x520] sm:$0xff]  ;;  %5096 = vmatpush1.bf16.msra.mxu1 %v9213_v36 }
  0xed   : > { %v9222_v38 = vcombine.high %v558_v33, %v562_v34  ;;  %v438_v39 = vld [vmem:[%s11337_s14 + $0x140] sm:$0xff]  ;;  %5056 = vmatprep.subr.bf16.mxu0 %v9094_v37  ;;  %v9221_v44 = vcombine.low %v558_v33, %v562_v34 }
  0xee   : > { %v442_v40 = vld [vmem:[%s11337_s14 + $0x160] sm:$0xff]  ;;  %5057 = vmatpush1.bf16.msra.mxu0 %v9093_v43 }
  0xef   : > { %v566_v41 = vld [vmem:[%s11337_s14 + $0x540] sm:$0xff]  ;;  %v9102_v45 = vcombine.high %v438_v39, %v442_v40  ;;  %5097 = vmatprep.subr.bf16.mxu1 %v9222_v38  ;;  %v9101_v51 = vcombine.low %v438_v39, %v442_v40 }
  0xf0   : > { %v570_v42 = vld [vmem:[%s11337_s14 + $0x560] sm:$0xff]  ;;  %5098 = vmatpush1.bf16.msra.mxu1 %v9221_v44 }
  0xf1   : > { %v9230_v46 = vcombine.high %v566_v41, %v570_v42  ;;  %v446_v47 = vld [vmem:[%s11337_s14 + $0x180] sm:$0xff]  ;;  %5058 = vmatprep.subr.bf16.mxu0 %v9102_v45  ;;  %v9229_v52 = vcombine.low %v566_v41, %v570_v42 }
  0xf2   : > { %v450_v48 = vld [vmem:[%s11337_s14 + $0x1a0] sm:$0xff]  ;;  %5059 = vmatpush1.bf16.msra.mxu0 %v9101_v51 }
  0xf3   : > { %v574_v49 = vld [vmem:[%s11337_s14 + $0x580] sm:$0xff]  ;;  %v9110_v53 = vcombine.high %v446_v47, %v450_v48  ;;  %5099 = vmatprep.subr.bf16.mxu1 %v9230_v46  ;;  %v9109_v63 = vcombine.low %v446_v47, %v450_v48 }
  0xf4   : > { %v578_v50 = vld [vmem:[%s11337_s14 + $0x5a0] sm:$0xff]  ;;  %5100 = vmatpush1.bf16.msra.mxu1 %v9229_v52 }
  0xf5   : > { %v11392_v54 = vld [vmem:[%s11389_s24] sm:$0xff]  ;;  %v9238_v56 = vcombine.high %v574_v49, %v578_v50  ;;  %5060 = vmatprep.subr.bf16.mxu0 %v9110_v53  ;;  %v9237_v0 = vcombine.low %v574_v49, %v578_v50 }
  0xf6   : > { %v454_v57 = vld [vmem:[%s11337_s14 + $0x1c0] sm:$0xff]  ;;  %v11401_v59 = vcombine.high %v11392_v54, %v11392_v54  ;;  %5061 = vmatpush1.bf16.msra.mxu0 %v9109_v63 }
  0xf7   : > { %v458_v58 = vld [vmem:[%s11337_s14 + $0x1e0] sm:$0xff]  ;;  %5101 = vmatprep.subr.bf16.mxu1 %v9238_v56 }
  0xf8   : > { %v582_v61 = vld [vmem:[%s11337_s14 + $0x5c0] sm:$0xff]  ;;  %5080 = vmatprep.mubr.bf16.mxu0 %v11401_v59  ;;  %v9118_v1 = vcombine.high %v454_v57, %v458_v58  ;;  %v9117_v7 = vcombine.low %v454_v57, %v458_v58  ;;  %5102 = vmatpush1.bf16.msra.mxu1 %v9237_v0 }
  0xf9   : > { %v586_v62 = vld [vmem:[%s11337_s14 + $0x5e0] sm:$0xff] }
  0xfa   : > { %v9246_v2 = vcombine.high %v582_v61, %v586_v62  ;;  %v462_v3 = vld [vmem:[%s11337_s14 + $0x200] sm:$0xff]  ;;  %5062 = vmatprep.subr.bf16.mxu0 %v9118_v1  ;;  %v9245_v8 = vcombine.low %v582_v61, %v586_v62 }
  0xfb   : > { %v466_v4 = vld [vmem:[%s11337_s14 + $0x220] sm:$0xff]  ;;  %5063 = vmatpush1.bf16.msra.mxu0 %v9117_v7 }
  0xfc   : > { %v590_v5 = vld [vmem:[%s11337_s14 + $0x600] sm:$0xff]  ;;  %v9126_v9 = vcombine.high %v462_v3, %v466_v4  ;;  %5103 = vmatprep.subr.bf16.mxu1 %v9246_v2  ;;  %v9125_v15 = vcombine.low %v462_v3, %v466_v4 }
  0xfd   : > { %v594_v6 = vld [vmem:[%s11337_s14 + $0x620] sm:$0xff]  ;;  %5104 = vmatpush1.bf16.msra.mxu1 %v9245_v8 }
  0xfe   : > { %v9254_v10 = vcombine.high %v590_v5, %v594_v6  ;;  %v470_v11 = vld [vmem:[%s11337_s14 + $0x240] sm:$0xff]  ;;  %5064 = vmatprep.subr.bf16.mxu0 %v9126_v9  ;;  %v9253_v16 = vcombine.low %v590_v5, %v594_v6 }
  0xff   : > { %v474_v12 = vld [vmem:[%s11337_s14 + $0x260] sm:$0xff]  ;;  %5065 = vmatpush1.bf16.msra.mxu0 %v9125_v15 }
 0x100   : > { %v598_v13 = vld [vmem:[%s11337_s14 + $0x640] sm:$0xff]  ;;  %v9134_v17 = vcombine.high %v470_v11, %v474_v12  ;;  %5105 = vmatprep.subr.bf16.mxu1 %v9254_v10  ;;  %v9133_v23 = vcombine.low %v470_v11, %v474_v12 }
 0x101   : > { %v602_v14 = vld [vmem:[%s11337_s14 + $0x660] sm:$0xff]  ;;  %5106 = vmatpush1.bf16.msra.mxu1 %v9253_v16 }
 0x102   : > { %v9262_v18 = vcombine.high %v598_v13, %v602_v14  ;;  %v478_v19 = vld [vmem:[%s11337_s14 + $0x280] sm:$0xff]  ;;  %5066 = vmatprep.subr.bf16.mxu0 %v9134_v17  ;;  %v9261_v24 = vcombine.low %v598_v13, %v602_v14  ;;  %v11451_v17 = vcombine.low %v11392_v54, %v11392_v54 }
 0x103   : > { %v482_v20 = vld [vmem:[%s11337_s14 + $0x2a0] sm:$0xff]  ;;  %5067 = vmatpush1.bf16.msra.mxu0 %v9133_v23  ;;  %v11463_v23 = vld [vmem:[%s11389_s24 + $0x18] sm:$0xff] }
 0x104   : > { %v606_v21 = vld [vmem:[%s11337_s14 + $0x680] sm:$0xff]  ;;  %v9142_v25 = vcombine.high %v478_v19, %v482_v20  ;;  %5107 = vmatprep.subr.bf16.mxu1 %v9262_v18  ;;  %v9141_v31 = vcombine.low %v478_v19, %v482_v20  ;;  %v11456_v20 = vld [vmem:[%s11389_s24 + $0x10] sm:$0xff] }
 0x105   : > { %v610_v22 = vld [vmem:[%s11337_s14 + $0x6a0] sm:$0xff]  ;;  %5108 = vmatpush1.bf16.msra.mxu1 %v9261_v24 }
 0x106   : > { %v9270_v26 = vcombine.high %v606_v21, %v610_v22  ;;  %v486_v27 = vld [vmem:[%s11337_s14 + $0x2c0] sm:$0xff]  ;;  %5068 = vmatprep.subr.bf16.mxu0 %v9142_v25  ;;  %v9269_v32 = vcombine.low %v606_v21, %v610_v22  ;;  %v11460_v21 = vcombine.low %v11395_v55, %v11395_v55 }
 0x107   : > { %v490_v28 = vld [vmem:[%s11337_s14 + $0x2e0] sm:$0xff]  ;;  %5069 = vmatpush1.bf16.msra.mxu0 %v9141_v31 }
 0x108   : > { %v614_v29 = vld [vmem:[%s11337_s14 + $0x6c0] sm:$0xff]  ;;  %v9150_v33 = vcombine.high %v486_v27, %v490_v28  ;;  %5109 = vmatprep.subr.bf16.mxu1 %v9270_v26  ;;  %v9149_v39 = vcombine.low %v486_v27, %v490_v28  ;;  %v11469_v28 = vcombine.high %v11456_v20, %v11456_v20 }
 0x109   : > { %v618_v30 = vld [vmem:[%s11337_s14 + $0x6e0] sm:$0xff]  ;;  %5110 = vmatpush1.bf16.msra.mxu1 %v9269_v32 }
 0x10a   : > { %v9278_v34 = vcombine.high %v614_v29, %v618_v30  ;;  %v494_v35 = vld [vmem:[%s11337_s14 + $0x300] sm:$0xff]  ;;  %5070 = vmatprep.subr.bf16.mxu0 %v9150_v33  ;;  %v9277_v40 = vcombine.low %v614_v29, %v618_v30  ;;  %v11476_v30 = vcombine.high %v11463_v23, %v11463_v23 }
 0x10b   : > { %v498_v36 = vld [vmem:[%s11337_s14 + $0x320] sm:$0xff]  ;;  %5071 = vmatpush1.bf16.msra.mxu0 %v9149_v39 }
 0x10c   : > { %v622_v37 = vld [vmem:[%s11337_s14 + $0x700] sm:$0xff]  ;;  %v9158_v41 = vcombine.high %v494_v35, %v498_v36  ;;  %5111 = vmatprep.subr.bf16.mxu1 %v9278_v34  ;;  %v9157_v47 = vcombine.low %v494_v35, %v498_v36 }
 0x10d   : > { %v626_v38 = vld [vmem:[%s11337_s14 + $0x720] sm:$0xff]  ;;  %5112 = vmatpush1.bf16.msra.mxu1 %v9277_v40 }
 0x10e   : > { %v9286_v42 = vcombine.high %v622_v37, %v626_v38  ;;  %v502_v43 = vld [vmem:[%s11337_s14 + $0x340] sm:$0xff]  ;;  %5072 = vmatprep.subr.bf16.mxu0 %v9158_v41  ;;  %v9285_v48 = vcombine.low %v622_v37, %v626_v38 }
 0x10f   : > { %v506_v44 = vld [vmem:[%s11337_s14 + $0x360] sm:$0xff]  ;;  %5073 = vmatpush1.bf16.msra.mxu0 %v9157_v47 }
 0x110   : > { %v630_v45 = vld [vmem:[%s11337_s14 + $0x740] sm:$0xff]  ;;  %v9166_v49 = vcombine.high %v502_v43, %v506_v44  ;;  %5113 = vmatprep.subr.bf16.mxu1 %v9286_v42  ;;  %v9165_v57 = vcombine.low %v502_v43, %v506_v44 }
 0x111   : > { %v634_v46 = vld [vmem:[%s11337_s14 + $0x760] sm:$0xff]  ;;  %5114 = vmatpush1.bf16.msra.mxu1 %v9285_v48 }
 0x112   : > { %v9294_v50 = vcombine.high %v630_v45, %v634_v46  ;;  %v510_v51 = vld [vmem:[%s11337_s14 + $0x380] sm:$0xff]  ;;  %5074 = vmatprep.subr.bf16.mxu0 %v9166_v49  ;;  %v9293_v58 = vcombine.low %v630_v45, %v634_v46 }
 0x113   : > { %v514_v52 = vld [vmem:[%s11337_s14 + $0x3a0] sm:$0xff]  ;;  %5075 = vmatpush1.bf16.msra.mxu0 %v9165_v57 }
 0x114   : > { %v638_v53 = vld [vmem:[%s11337_s14 + $0x780] sm:$0xff]  ;;  %v9174_v61 = vcombine.high %v510_v51, %v514_v52  ;;  %5115 = vmatprep.subr.bf16.mxu1 %v9294_v50  ;;  %v9173_v3 = vcombine.low %v510_v51, %v514_v52 }
 0x115   : > { %v642_v56 = vld [vmem:[%s11337_s14 + $0x7a0] sm:$0xff]  ;;  %5116 = vmatpush1.bf16.msra.mxu1 %v9293_v58 }
 0x116   : > { %v9302_v62 = vcombine.high %v638_v53, %v642_v56  ;;  %v518_v63 = vld [vmem:[%s11337_s14 + $0x3c0] sm:$0xff]  ;;  %5076 = vmatprep.subr.bf16.mxu0 %v9174_v61  ;;  %v9301_v4 = vcombine.low %v638_v53, %v642_v56 }
 0x117   : > { %v522_v0 = vld [vmem:[%s11337_s14 + $0x3e0] sm:$0xff]  ;;  %5077 = vmatpush1.bf16.msra.mxu0 %v9173_v3 }
 0x118   : > { %v646_v1 = vld [vmem:[%s11337_s14 + $0x7c0] sm:$0xff]  ;;  %v9182_v5 = vcombine.high %v518_v63, %v522_v0  ;;  %5117 = vmatprep.subr.bf16.mxu1 %v9302_v62  ;;  %v9181_v11 = vcombine.low %v518_v63, %v522_v0 }
 0x119   : > { %v650_v2 = vld [vmem:[%s11337_s14 + $0x7e0] sm:$0xff]  ;;  %5118 = vmatpush1.bf16.msra.mxu1 %v9301_v4 }
 0x11a   : > { %v9310_v6 = vcombine.high %v646_v1, %v650_v2  ;;  %v654_v7 = vld [vmem:[%s11337_s14 + $0x800] sm:$0xff]  ;;  %5078 = vmatprep.subr.bf16.mxu0 %v9182_v5  ;;  %v9309_v12 = vcombine.low %v646_v1, %v650_v2 }
 0x11b   : > { %v658_v8 = vld [vmem:[%s11337_s14 + $0x820] sm:$0xff]  ;;  %5079 = vmatpush1.bf16.msra.mxu0 %v9181_v11 }
 0x11c   : > { %v782_v9 = vld [vmem:[%s11337_s14 + $0xc00] sm:$0xff]  ;;  %v9318_v13 = vcombine.high %v654_v7, %v658_v8  ;;  %5119 = vmatprep.subr.bf16.mxu1 %v9310_v6  ;;  %v9317_v22 = vcombine.low %v654_v7, %v658_v8 }
 0x11d   : > { %v786_v10 = vld [vmem:[%s11337_s14 + $0xc20] sm:$0xff]  ;;  %5120 = vmatpush1.bf16.msra.mxu1 %v9309_v12 }
 0x11e   : > { %v9446_v14 = vcombine.high %v782_v9, %v786_v10  ;;  %v662_v15 = vld [vmem:[%s11337_s14 + $0x840] sm:$0xff]  ;;  %5130 = vmatprep.subr.bf16.mxu0 %v9318_v13  ;;  %v9445_v24 = vcombine.low %v782_v9, %v786_v10  ;;  %5081 = vmatmul.mubr.bf16.vlgmr.msra.gmra.mrb[0].mxu0 %v11451_v17 }
 0x11f   : > { %v666_v16 = vld [vmem:[%s11337_s14 + $0x860] sm:$0xff]  ;;  %5131 = vmatpush1.bf16.msra.mxu0 %v9317_v22  ;;  %5162 = vmatprep.mubr.bf16.mxu0 %v11469_v28 }
 0x120   : > { %v790_v18 = vld [vmem:[%s11337_s14 + $0xc40] sm:$0xff]  ;;  %v9326_v25 = vcombine.high %v662_v15, %v666_v16  ;;  %5171 = vmatprep.subr.bf16.mxu1 %v9446_v14  ;;  %5122 = vmatmul.mubr.bf16.vlgmr.msra.gmra.mrb[0].mxu1 %v11460_v21  ;;  %v9325_v31 = vcombine.low %v662_v15, %v666_v16 }
 0x121   : > { %v794_v19 = vld [vmem:[%s11337_s14 + $0xc60] sm:$0xff]  ;;  %5172 = vmatpush1.bf16.msra.mxu1 %v9445_v24  ;;  %5203 = vmatprep.mubr.bf16.mxu1 %v11476_v30 }
 0x122   : > { %v9454_v54 = vcombine.high %v790_v18, %v794_v19  ;;  %v670_v26 = vld [vmem:[%s11337_s14 + $0x880] sm:$0xff]  ;;  %5132 = vmatprep.subr.bf16.mxu0 %v9326_v25  ;;  %v9453_v32 = vcombine.low %v790_v18, %v794_v19 }
 0x123   : > { %v674_v27 = vld [vmem:[%s11337_s14 + $0x8a0] sm:$0xff]  ;;  %5133 = vmatpush1.bf16.msra.mxu0 %v9325_v31 }
 0x124   : > { %v798_v55 = vld [vmem:[%s11337_s14 + $0xc80] sm:$0xff]  ;;  %v9334_v33 = vcombine.high %v670_v26, %v674_v27  ;;  %5173 = vmatprep.subr.bf16.mxu1 %v9454_v54  ;;  %v9333_v39 = vcombine.low %v670_v26, %v674_v27 }
 0x125   : > { %v802_v29 = vld [vmem:[%s11337_s14 + $0xca0] sm:$0xff]  ;;  %5174 = vmatpush1.bf16.msra.mxu1 %v9453_v32 }
 0x126   : > { %v9462_v34 = vcombine.high %v798_v55, %v802_v29  ;;  %v678_v35 = vld [vmem:[%s11337_s14 + $0x8c0] sm:$0xff]  ;;  %5134 = vmatprep.subr.bf16.mxu0 %v9334_v33  ;;  %v9461_v40 = vcombine.low %v798_v55, %v802_v29 }
 0x127   : > { %v682_v36 = vld [vmem:[%s11337_s14 + $0x8e0] sm:$0xff]  ;;  %5135 = vmatpush1.bf16.msra.mxu0 %v9333_v39 }
 0x128   : > { %v806_v37 = vld [vmem:[%s11337_s14 + $0xcc0] sm:$0xff]  ;;  %v9342_v41 = vcombine.high %v678_v35, %v682_v36  ;;  %5175 = vmatprep.subr.bf16.mxu1 %v9462_v34  ;;  %v9341_v47 = vcombine.low %v678_v35, %v682_v36 }
 0x129   : > { %v810_v38 = vld [vmem:[%s11337_s14 + $0xce0] sm:$0xff]  ;;  %5176 = vmatpush1.bf16.msra.mxu1 %v9461_v40 }
 0x12a   : > { %v9470_v42 = vcombine.high %v806_v37, %v810_v38  ;;  %v686_v43 = vld [vmem:[%s11337_s14 + $0x900] sm:$0xff]  ;;  %5136 = vmatprep.subr.bf16.mxu0 %v9342_v41  ;;  %v9469_v48 = vcombine.low %v806_v37, %v810_v38 }
 0x12b   : > { %v690_v44 = vld [vmem:[%s11337_s14 + $0x920] sm:$0xff]  ;;  %5137 = vmatpush1.bf16.msra.mxu0 %v9341_v47 }
 0x12c   : > { %v814_v45 = vld [vmem:[%s11337_s14 + $0xd00] sm:$0xff]  ;;  %v9350_v49 = vcombine.high %v686_v43, %v690_v44  ;;  %5177 = vmatprep.subr.bf16.mxu1 %v9470_v42  ;;  %v9349_v57 = vcombine.low %v686_v43, %v690_v44 }
 0x12d   : > { %v818_v46 = vld [vmem:[%s11337_s14 + $0xd20] sm:$0xff]  ;;  %5178 = vmatpush1.bf16.msra.mxu1 %v9469_v48 }
 0x12e   : > { %v9478_v50 = vcombine.high %v814_v45, %v818_v46  ;;  %v694_v51 = vld [vmem:[%s11337_s14 + $0x940] sm:$0xff]  ;;  %5138 = vmatprep.subr.bf16.mxu0 %v9350_v49  ;;  %v9477_v58 = vcombine.low %v814_v45, %v818_v46 }
 0x12f   : > { %v698_v52 = vld [vmem:[%s11337_s14 + $0x960] sm:$0xff]  ;;  %5139 = vmatpush1.bf16.msra.mxu0 %v9349_v57 }
 0x130   : > { %v822_v53 = vld [vmem:[%s11337_s14 + $0xd40] sm:$0xff]  ;;  %v9358_v61 = vcombine.high %v694_v51, %v698_v52  ;;  %5179 = vmatprep.subr.bf16.mxu1 %v9478_v50  ;;  %v9357_v3 = vcombine.low %v694_v51, %v698_v52 }
 0x131   : > { %v826_v56 = vld [vmem:[%s11337_s14 + $0xd60] sm:$0xff]  ;;  %5180 = vmatpush1.bf16.msra.mxu1 %v9477_v58 }
 0x132   : > { %v9486_v62 = vcombine.high %v822_v53, %v826_v56  ;;  %v702_v63 = vld [vmem:[%s11337_s14 + $0x980] sm:$0xff]  ;;  %5140 = vmatprep.subr.bf16.mxu0 %v9358_v61  ;;  %v9485_v4 = vcombine.low %v822_v53, %v826_v56 }
 0x133   : > { %v706_v0 = vld [vmem:[%s11337_s14 + $0x9a0] sm:$0xff]  ;;  %5141 = vmatpush1.bf16.msra.mxu0 %v9357_v3 }
 0x134   : > { %v830_v1 = vld [vmem:[%s11337_s14 + $0xd80] sm:$0xff]  ;;  %v9366_v5 = vcombine.high %v702_v63, %v706_v0  ;;  %5181 = vmatprep.subr.bf16.mxu1 %v9486_v62  ;;  %v9365_v11 = vcombine.low %v702_v63, %v706_v0 }
 0x135   : > { %v834_v2 = vld [vmem:[%s11337_s14 + $0xda0] sm:$0xff]  ;;  %5182 = vmatpush1.bf16.msra.mxu1 %v9485_v4 }
 0x136   : > { %v9494_v6 = vcombine.high %v830_v1, %v834_v2  ;;  %v710_v7 = vld [vmem:[%s11337_s14 + $0x9c0] sm:$0xff]  ;;  %5142 = vmatprep.subr.bf16.mxu0 %v9366_v5  ;;  %v9493_v12 = vcombine.low %v830_v1, %v834_v2 }
 0x137   : > { %v714_v8 = vld [vmem:[%s11337_s14 + $0x9e0] sm:$0xff]  ;;  %5143 = vmatpush1.bf16.msra.mxu0 %v9365_v11 }
 0x138   : > { %v838_v9 = vld [vmem:[%s11337_s14 + $0xdc0] sm:$0xff]  ;;  %v9374_v13 = vcombine.high %v710_v7, %v714_v8  ;;  %5183 = vmatprep.subr.bf16.mxu1 %v9494_v6  ;;  %v9373_v22 = vcombine.low %v710_v7, %v714_v8 }
 0x139   : > { %v842_v10 = vld [vmem:[%s11337_s14 + $0xde0] sm:$0xff]  ;;  %5184 = vmatpush1.bf16.msra.mxu1 %v9493_v12 }
 0x13a   : > { %v9502_v14 = vcombine.high %v838_v9, %v842_v10  ;;  %v718_v15 = vld [vmem:[%s11337_s14 + $0xa00] sm:$0xff]  ;;  %5144 = vmatprep.subr.bf16.mxu0 %v9374_v13  ;;  %v9501_v24 = vcombine.low %v838_v9, %v842_v10 }
 0x13b   : > { %v722_v16 = vld [vmem:[%s11337_s14 + $0xa20] sm:$0xff]  ;;  %5145 = vmatpush1.bf16.msra.mxu0 %v9373_v22 }
 0x13c   : > { %v846_v18 = vld [vmem:[%s11337_s14 + $0xe00] sm:$0xff]  ;;  %v9382_v25 = vcombine.high %v718_v15, %v722_v16  ;;  %5185 = vmatprep.subr.bf16.mxu1 %v9502_v14  ;;  %v9381_v31 = vcombine.low %v718_v15, %v722_v16 }
 0x13d   : > { %v850_v19 = vld [vmem:[%s11337_s14 + $0xe20] sm:$0xff]  ;;  %5186 = vmatpush1.bf16.msra.mxu1 %v9501_v24 }
 0x13e   : > { %v9510_v54 = vcombine.high %v846_v18, %v850_v19  ;;  %v726_v26 = vld [vmem:[%s11337_s14 + $0xa40] sm:$0xff]  ;;  %5146 = vmatprep.subr.bf16.mxu0 %v9382_v25  ;;  %v9509_v32 = vcombine.low %v846_v18, %v850_v19 }
 0x13f   : > { %v730_v27 = vld [vmem:[%s11337_s14 + $0xa60] sm:$0xff]  ;;  %5147 = vmatpush1.bf16.msra.mxu0 %v9381_v31 }
 0x140   : > { %v854_v55 = vld [vmem:[%s11337_s14 + $0xe40] sm:$0xff]  ;;  %v9390_v33 = vcombine.high %v726_v26, %v730_v27  ;;  %5187 = vmatprep.subr.bf16.mxu1 %v9510_v54  ;;  %v9389_v39 = vcombine.low %v726_v26, %v730_v27 }
 0x141   : > { %v858_v29 = vld [vmem:[%s11337_s14 + $0xe60] sm:$0xff]  ;;  %5188 = vmatpush1.bf16.msra.mxu1 %v9509_v32 }
 0x142   : > { %v9518_v34 = vcombine.high %v854_v55, %v858_v29  ;;  %v734_v35 = vld [vmem:[%s11337_s14 + $0xa80] sm:$0xff]  ;;  %5148 = vmatprep.subr.bf16.mxu0 %v9390_v33  ;;  %v9517_v40 = vcombine.low %v854_v55, %v858_v29 }
 0x143   : > { %v738_v36 = vld [vmem:[%s11337_s14 + $0xaa0] sm:$0xff]  ;;  %5149 = vmatpush1.bf16.msra.mxu0 %v9389_v39 }
 0x144   : > { %v862_v37 = vld [vmem:[%s11337_s14 + $0xe80] sm:$0xff]  ;;  %v9398_v41 = vcombine.high %v734_v35, %v738_v36  ;;  %5189 = vmatprep.subr.bf16.mxu1 %v9518_v34  ;;  %v9397_v47 = vcombine.low %v734_v35, %v738_v36 }
 0x145   : > { %v866_v38 = vld [vmem:[%s11337_s14 + $0xea0] sm:$0xff]  ;;  %5190 = vmatpush1.bf16.msra.mxu1 %v9517_v40 }
 0x146   : > { %v9526_v42 = vcombine.high %v862_v37, %v866_v38  ;;  %v742_v43 = vld [vmem:[%s11337_s14 + $0xac0] sm:$0xff]  ;;  %5150 = vmatprep.subr.bf16.mxu0 %v9398_v41  ;;  %v9525_v48 = vcombine.low %v862_v37, %v866_v38  ;;  %v11541_v37 = vcombine.low %v11456_v20, %v11456_v20  ;;  %v11550_v41 = vcombine.low %v11463_v23, %v11463_v23 }
 0x147   : > { %v746_v44 = vld [vmem:[%s11337_s14 + $0xae0] sm:$0xff]  ;;  %5151 = vmatpush1.bf16.msra.mxu0 %v9397_v47 }
 0x148   : > { %v870_v45 = vld [vmem:[%s11337_s14 + $0xec0] sm:$0xff]  ;;  %v9406_v49 = vcombine.high %v742_v43, %v746_v44  ;;  %5191 = vmatprep.subr.bf16.mxu1 %v9526_v42  ;;  %v9405_v57 = vcombine.low %v742_v43, %v746_v44  ;;  %v11553_v43 = vld [vmem:[%s11389_s24 + $0x28] sm:$0xff] }
 0x149   : > { %v874_v46 = vld [vmem:[%s11337_s14 + $0xee0] sm:$0xff]  ;;  %5192 = vmatpush1.bf16.msra.mxu1 %v9525_v48 }
 0x14a   : > { %v9534_v50 = vcombine.high %v870_v45, %v874_v46  ;;  %v750_v51 = vld [vmem:[%s11337_s14 + $0xb00] sm:$0xff]  ;;  %5152 = vmatprep.subr.bf16.mxu0 %v9406_v49  ;;  %v9533_v58 = vcombine.low %v870_v45, %v874_v46 }
 0x14b   : > { %v754_v52 = vld [vmem:[%s11337_s14 + $0xb20] sm:$0xff]  ;;  %5153 = vmatpush1.bf16.msra.mxu0 %v9405_v57 }
 0x14c   : > { %v878_v53 = vld [vmem:[%s11337_s14 + $0xf00] sm:$0xff]  ;;  %v9414_v61 = vcombine.high %v750_v51, %v754_v52  ;;  %5193 = vmatprep.subr.bf16.mxu1 %v9534_v50  ;;  %v9413_v3 = vcombine.low %v750_v51, %v754_v52  ;;  %v11566_v50 = vcombine.high %v11553_v43, %v11553_v43 }
 0x14d   : > { %v882_v56 = vld [vmem:[%s11337_s14 + $0xf20] sm:$0xff]  ;;  %5194 = vmatpush1.bf16.msra.mxu1 %v9533_v58 }
 0x14e   : > { %v9542_v62 = vcombine.high %v878_v53, %v882_v56  ;;  %v758_v63 = vld [vmem:[%s11337_s14 + $0xb40] sm:$0xff]  ;;  %5154 = vmatprep.subr.bf16.mxu0 %v9414_v61  ;;  %v9541_v4 = vcombine.low %v878_v53, %v882_v56 }
 0x14f   : > { %v762_v0 = vld [vmem:[%s11337_s14 + $0xb60] sm:$0xff]  ;;  %5155 = vmatpush1.bf16.msra.mxu0 %v9413_v3 }
 0x150   : > { %v886_v1 = vld [vmem:[%s11337_s14 + $0xf40] sm:$0xff]  ;;  %v9422_v5 = vcombine.high %v758_v63, %v762_v0  ;;  %5195 = vmatprep.subr.bf16.mxu1 %v9542_v62  ;;  %v9421_v11 = vcombine.low %v758_v63, %v762_v0 }
 0x151   : > { %v890_v2 = vld [vmem:[%s11337_s14 + $0xf60] sm:$0xff]  ;;  %5196 = vmatpush1.bf16.msra.mxu1 %v9541_v4 }
 0x152   : > { %v9550_v6 = vcombine.high %v886_v1, %v890_v2  ;;  %v766_v7 = vld [vmem:[%s11337_s14 + $0xb80] sm:$0xff]  ;;  %5156 = vmatprep.subr.bf16.mxu0 %v9422_v5  ;;  %v9549_v12 = vcombine.low %v886_v1, %v890_v2 }
 0x153   : > { %v770_v8 = vld [vmem:[%s11337_s14 + $0xba0] sm:$0xff]  ;;  %5157 = vmatpush1.bf16.msra.mxu0 %v9421_v11 }
 0x154   : > { %v894_v9 = vld [vmem:[%s11337_s14 + $0xf80] sm:$0xff]  ;;  %v9430_v13 = vcombine.high %v766_v7, %v770_v8  ;;  %5197 = vmatprep.subr.bf16.mxu1 %v9550_v6  ;;  %v9429_v22 = vcombine.low %v766_v7, %v770_v8 }
 0x155   : > { %v898_v10 = vld [vmem:[%s11337_s14 + $0xfa0] sm:$0xff]  ;;  %5198 = vmatpush1.bf16.msra.mxu1 %v9549_v12 }
 0x156   : > { %v9558_v14 = vcombine.high %v894_v9, %v898_v10  ;;  %v774_v15 = vld [vmem:[%s11337_s14 + $0xbc0] sm:$0xff]  ;;  %5158 = vmatprep.subr.bf16.mxu0 %v9430_v13  ;;  %v9557_v24 = vcombine.low %v894_v9, %v898_v10 }
 0x157   : > { %v778_v16 = vld [vmem:[%s11337_s14 + $0xbe0] sm:$0xff]  ;;  %5159 = vmatpush1.bf16.msra.mxu0 %v9429_v22 }
 0x158   : > { %v902_v18 = vld [vmem:[%s11337_s14 + $0xfc0] sm:$0xff]  ;;  %v9438_v25 = vcombine.high %v774_v15, %v778_v16  ;;  %5199 = vmatprep.subr.bf16.mxu1 %v9558_v14  ;;  %v9437_v31 = vcombine.low %v774_v15, %v778_v16 }
 0x159   : > { %v906_v19 = vld [vmem:[%s11337_s14 + $0xfe0] sm:$0xff]  ;;  %5200 = vmatpush1.bf16.msra.mxu1 %v9557_v24 }
 0x15a   : > { %v9566_v54 = vcombine.high %v902_v18, %v906_v19  ;;  %v910_v26 = vld [vmem:[%s11337_s14 + $0x1000] sm:$0xff]  ;;  %5160 = vmatprep.subr.bf16.mxu0 %v9438_v25  ;;  %v9565_v32 = vcombine.low %v902_v18, %v906_v19 }
 0x15b   : > { %v914_v27 = vld [vmem:[%s11337_s14 + $0x1020] sm:$0xff]  ;;  %5161 = vmatpush1.bf16.msra.mxu0 %v9437_v31 }
 0x15c   : > { %v1038_v55 = vld [vmem:[%s11337_s14 + $0x1400] sm:$0xff]  ;;  %v9574_v33 = vcombine.high %v910_v26, %v914_v27  ;;  %5201 = vmatprep.subr.bf16.mxu1 %v9566_v54  ;;  %v9573_v42 = vcombine.low %v910_v26, %v914_v27 }
 0x15d   : > { %v1042_v29 = vld [vmem:[%s11337_s14 + $0x1420] sm:$0xff]  ;;  %5202 = vmatpush1.bf16.msra.mxu1 %v9565_v32 }
 0x15e   : > { %v9702_v34 = vcombine.high %v1038_v55, %v1042_v29  ;;  %v918_v35 = vld [vmem:[%s11337_s14 + $0x1040] sm:$0xff]  ;;  %5212 = vmatprep.subr.bf16.mxu0 %v9574_v33  ;;  %v9701_v44 = vcombine.low %v1038_v55, %v1042_v29  ;;  %5163 = vmatmul.mubr.bf16.vlgmr.msra.gmra.mrb[4].mxu0 %v11541_v37 }
 0x15f   : > { %v922_v36 = vld [vmem:[%s11337_s14 + $0x1060] sm:$0xff]  ;;  %5213 = vmatpush1.bf16.msra.mxu0 %v9573_v42 }
 0x160   : > { %v1046_v38 = vld [vmem:[%s11337_s14 + $0x1440] sm:$0xff]  ;;  %v9582_v45 = vcombine.high %v918_v35, %v922_v36  ;;  %5253 = vmatprep.subr.bf16.mxu1 %v9702_v34  ;;  %5204 = vmatmul.mubr.bf16.vlgmr.msra.gmra.mrb[4].mxu1 %v11550_v41  ;;  %v9581_v51 = vcombine.low %v918_v35, %v922_v36 }
 0x161   : > { %v1050_v39 = vld [vmem:[%s11337_s14 + $0x1460] sm:$0xff]  ;;  %5254 = vmatpush1.bf16.msra.mxu1 %v9701_v44  ;;  %5285 = vmatprep.mubr.bf16.mxu1 %v11566_v50 }
 0x162   : > { %v11546_v40 = vld [vmem:[%s11389_s24 + $0x20] sm:$0xff]  ;;  %v9710_v20 = vcombine.high %v1046_v38, %v1050_v39  ;;  %5214 = vmatprep.subr.bf16.mxu0 %v9582_v45  ;;  %v9709_v52 = vcombine.low %v1046_v38, %v1050_v39 }
 0x163   : > { %v926_v46 = vld [vmem:[%s11337_s14 + $0x1080] sm:$0xff]  ;;  %v11559_v48 = vcombine.high %v11546_v40, %v11546_v40  ;;  %5215 = vmatpush1.bf16.msra.mxu0 %v9581_v51 }
 0x164   : > { %v930_v47 = vld [vmem:[%s11337_s14 + $0x10a0] sm:$0xff]  ;;  %5255 = vmatprep.subr.bf16.mxu1 %v9710_v20 }
 0x165   : > { %v1054_v23 = vld [vmem:[%s11337_s14 + $0x1480] sm:$0xff]  ;;  %v9590_v53 = vcombine.high %v926_v46, %v930_v47  ;;  %5244 = vmatprep.mubr.bf16.mxu0 %v11559_v48  ;;  %v9589_v63 = vcombine.low %v926_v46, %v930_v47  ;;  %5256 = vmatpush1.bf16.msra.mxu1 %v9709_v52 }
 0x166   : > { %v1058_v49 = vld [vmem:[%s11337_s14 + $0x14a0] sm:$0xff] }
 0x167   : > { %v9718_v56 = vcombine.high %v1054_v23, %v1058_v49  ;;  %v934_v57 = vld [vmem:[%s11337_s14 + $0x10c0] sm:$0xff]  ;;  %5216 = vmatprep.subr.bf16.mxu0 %v9590_v53  ;;  %v9717_v0 = vcombine.low %v1054_v23, %v1058_v49 }
 0x168   : > { %v938_v58 = vld [vmem:[%s11337_s14 + $0x10e0] sm:$0xff]  ;;  %5217 = vmatpush1.bf16.msra.mxu0 %v9589_v63 }
 0x169   : > { %v1062_v61 = vld [vmem:[%s11337_s14 + $0x14c0] sm:$0xff]  ;;  %v9598_v1 = vcombine.high %v934_v57, %v938_v58  ;;  %5257 = vmatprep.subr.bf16.mxu1 %v9718_v56  ;;  %v9597_v7 = vcombine.low %v934_v57, %v938_v58 }
 0x16a   : > { %v1066_v62 = vld [vmem:[%s11337_s14 + $0x14e0] sm:$0xff]  ;;  %5258 = vmatpush1.bf16.msra.mxu1 %v9717_v0 }
 0x16b   : > { %v9726_v2 = vcombine.high %v1062_v61, %v1066_v62  ;;  %v942_v3 = vld [vmem:[%s11337_s14 + $0x1100] sm:$0xff]  ;;  %5218 = vmatprep.subr.bf16.mxu0 %v9598_v1  ;;  %v9725_v8 = vcombine.low %v1062_v61, %v1066_v62 }
 0x16c   : > { %v946_v4 = vld [vmem:[%s11337_s14 + $0x1120] sm:$0xff]  ;;  %5219 = vmatpush1.bf16.msra.mxu0 %v9597_v7 }
 0x16d   : > { %v1070_v5 = vld [vmem:[%s11337_s14 + $0x1500] sm:$0xff]  ;;  %v9606_v9 = vcombine.high %v942_v3, %v946_v4  ;;  %5259 = vmatprep.subr.bf16.mxu1 %v9726_v2  ;;  %v9605_v15 = vcombine.low %v942_v3, %v946_v4 }
 0x16e   : > { %v1074_v6 = vld [vmem:[%s11337_s14 + $0x1520] sm:$0xff]  ;;  %5260 = vmatpush1.bf16.msra.mxu1 %v9725_v8 }
 0x16f   : > { %v9734_v10 = vcombine.high %v1070_v5, %v1074_v6  ;;  %v950_v11 = vld [vmem:[%s11337_s14 + $0x1140] sm:$0xff]  ;;  %5220 = vmatprep.subr.bf16.mxu0 %v9606_v9  ;;  %v9733_v16 = vcombine.low %v1070_v5, %v1074_v6 }
 0x170   : > { %v954_v12 = vld [vmem:[%s11337_s14 + $0x1160] sm:$0xff]  ;;  %5221 = vmatpush1.bf16.msra.mxu0 %v9605_v15 }
 0x171   : > { %v1078_v13 = vld [vmem:[%s11337_s14 + $0x1540] sm:$0xff]  ;;  %v9614_v18 = vcombine.high %v950_v11, %v954_v12  ;;  %5261 = vmatprep.subr.bf16.mxu1 %v9734_v10  ;;  %v9613_v26 = vcombine.low %v950_v11, %v954_v12 }
 0x172   : > { %v1082_v14 = vld [vmem:[%s11337_s14 + $0x1560] sm:$0xff]  ;;  %5262 = vmatpush1.bf16.msra.mxu1 %v9733_v16 }
 0x173   : > { %v9742_v19 = vcombine.high %v1078_v13, %v1082_v14  ;;  %v958_v22 = vld [vmem:[%s11337_s14 + $0x1180] sm:$0xff]  ;;  %5222 = vmatprep.subr.bf16.mxu0 %v9614_v18  ;;  %v9741_v27 = vcombine.low %v1078_v13, %v1082_v14 }
 0x174   : > { %v962_v24 = vld [vmem:[%s11337_s14 + $0x11a0] sm:$0xff]  ;;  %5223 = vmatpush1.bf16.msra.mxu0 %v9613_v26 }
 0x175   : > { %v1086_v25 = vld [vmem:[%s11337_s14 + $0x1580] sm:$0xff]  ;;  %v9622_v55 = vcombine.high %v958_v22, %v962_v24  ;;  %5263 = vmatprep.subr.bf16.mxu1 %v9742_v19  ;;  %v9621_v35 = vcombine.low %v958_v22, %v962_v24 }
 0x176   : > { %v1090_v54 = vld [vmem:[%s11337_s14 + $0x15a0] sm:$0xff]  ;;  %5264 = vmatpush1.bf16.msra.mxu1 %v9741_v27 }
 0x177   : > { %v9750_v29 = vcombine.high %v1086_v25, %v1090_v54  ;;  %v966_v31 = vld [vmem:[%s11337_s14 + $0x11c0] sm:$0xff]  ;;  %5224 = vmatprep.subr.bf16.mxu0 %v9622_v55  ;;  %v9749_v36 = vcombine.low %v1086_v25, %v1090_v54 }
 0x178   : > { %v970_v32 = vld [vmem:[%s11337_s14 + $0x11e0] sm:$0xff]  ;;  %5225 = vmatpush1.bf16.msra.mxu0 %v9621_v35 }
 0x179   : > { %v1094_v33 = vld [vmem:[%s11337_s14 + $0x15c0] sm:$0xff]  ;;  %v9630_v38 = vcombine.high %v966_v31, %v970_v32  ;;  %5265 = vmatprep.subr.bf16.mxu1 %v9750_v29  ;;  %v9629_v46 = vcombine.low %v966_v31, %v970_v32 }
 0x17a   : > { %v1098_v34 = vld [vmem:[%s11337_s14 + $0x15e0] sm:$0xff]  ;;  %5266 = vmatpush1.bf16.msra.mxu1 %v9749_v36 }
 0x17b   : > { %v9758_v39 = vcombine.high %v1094_v33, %v1098_v34  ;;  %v974_v42 = vld [vmem:[%s11337_s14 + $0x1200] sm:$0xff]  ;;  %5226 = vmatprep.subr.bf16.mxu0 %v9630_v38  ;;  %v9757_v47 = vcombine.low %v1094_v33, %v1098_v34 }
 0x17c   : > { %v978_v44 = vld [vmem:[%s11337_s14 + $0x1220] sm:$0xff]  ;;  %5227 = vmatpush1.bf16.msra.mxu0 %v9629_v46 }
 0x17d   : > { %v1102_v45 = vld [vmem:[%s11337_s14 + $0x1600] sm:$0xff]  ;;  %v9638_v23 = vcombine.high %v974_v42, %v978_v44  ;;  %5267 = vmatprep.subr.bf16.mxu1 %v9758_v39  ;;  %v9637_v57 = vcombine.low %v974_v42, %v978_v44 }
 0x17e   : > { %v1106_v20 = vld [vmem:[%s11337_s14 + $0x1620] sm:$0xff]  ;;  %5268 = vmatpush1.bf16.msra.mxu1 %v9757_v47 }
 0x17f   : > { %v9766_v49 = vcombine.high %v1102_v45, %v1106_v20  ;;  %v982_v51 = vld [vmem:[%s11337_s14 + $0x1240] sm:$0xff]  ;;  %5228 = vmatprep.subr.bf16.mxu0 %v9638_v23  ;;  %v9765_v58 = vcombine.low %v1102_v45, %v1106_v20 }
 0x180   : > { %v986_v52 = vld [vmem:[%s11337_s14 + $0x1260] sm:$0xff]  ;;  %5229 = vmatpush1.bf16.msra.mxu0 %v9637_v57  ;;  %v399_v57 = vld [vmem:[%s11337_s14 + $0x8] sm:$0xff] }
 0x181   : > { %v1110_v53 = vld [vmem:[%s11337_s14 + $0x1640] sm:$0xff]  ;;  %v9646_v61 = vcombine.high %v982_v51, %v986_v52  ;;  %5269 = vmatprep.subr.bf16.mxu1 %v9766_v49  ;;  %v9645_v3 = vcombine.low %v982_v51, %v986_v52 }
 0x182   : > { %v1114_v56 = vld [vmem:[%s11337_s14 + $0x1660] sm:$0xff]  ;;  %5270 = vmatpush1.bf16.msra.mxu1 %v9765_v58  ;;  %v403_v58 = vld [vmem:[%s11337_s14 + $0x28] sm:$0xff] }
 0x183   : > { %v9774_v62 = vcombine.high %v1110_v53, %v1114_v56  ;;  %v990_v63 = vld [vmem:[%s11337_s14 + $0x1280] sm:$0xff]  ;;  %5230 = vmatprep.subr.bf16.mxu0 %v9646_v61  ;;  %v9773_v4 = vcombine.low %v1110_v53, %v1114_v56  ;;  %v527_v61 = vld [vmem:[%s11337_s14 + $0x408] sm:$0xff] }
 0x184   : > { %v994_v0 = vld [vmem:[%s11337_s14 + $0x12a0] sm:$0xff]  ;;  %5231 = vmatpush1.bf16.msra.mxu0 %v9645_v3  ;;  %v407_v3 = vld [vmem:[%s11337_s14 + $0x48] sm:$0xff] }
 0x185   : > { %v1118_v1 = vld [vmem:[%s11337_s14 + $0x1680] sm:$0xff]  ;;  %v9654_v5 = vcombine.high %v990_v63, %v994_v0  ;;  %5271 = vmatprep.subr.bf16.mxu1 %v9774_v62  ;;  %v9653_v11 = vcombine.low %v990_v63, %v994_v0  ;;  %v531_v62 = vld [vmem:[%s11337_s14 + $0x428] sm:$0xff] }
 0x186   : > { %v1122_v2 = vld [vmem:[%s11337_s14 + $0x16a0] sm:$0xff]  ;;  %5272 = vmatpush1.bf16.msra.mxu1 %v9773_v4  ;;  %v411_v4 = vld [vmem:[%s11337_s14 + $0x68] sm:$0xff] }
 0x187   : > { %v9782_v6 = vcombine.high %v1118_v1, %v1122_v2  ;;  %v998_v7 = vld [vmem:[%s11337_s14 + $0x12c0] sm:$0xff]  ;;  %5232 = vmatprep.subr.bf16.mxu0 %v9654_v5  ;;  %v9781_v12 = vcombine.low %v1118_v1, %v1122_v2  ;;  %v9064_v1 = vcombine.high %v399_v57, %v403_v58  ;;  %v9192_v2 = vcombine.high %v527_v61, %v531_v62 }
 0x188   : > { %v1002_v8 = vld [vmem:[%s11337_s14 + $0x12e0] sm:$0xff]  ;;  %5233 = vmatpush1.bf16.msra.mxu0 %v9653_v11  ;;  %v11631_v5 = vcombine.low %v11546_v40, %v11546_v40  ;;  %v9072_v11 = vcombine.high %v407_v3, %v411_v4  ;;  %v419_v40 = vld [vmem:[%s11337_s14 + $0xa8] sm:$0xff] }
 0x189   : > { %v1126_v9 = vld [vmem:[%s11337_s14 + $0x16c0] sm:$0xff]  ;;  %v9662_v13 = vcombine.high %v998_v7, %v1002_v8  ;;  %5273 = vmatprep.subr.bf16.mxu1 %v9782_v6  ;;  %v9661_v22 = vcombine.low %v998_v7, %v1002_v8  ;;  %v535_v6 = vld [vmem:[%s11337_s14 + $0x448] sm:$0xff]  ;;  %v11637_v8 = vcombine.low %v11553_v43, %v11553_v43  ;;  %v9071_v43 = vcombine.low %v407_v3, %v411_v4 }
 0x18a   : > { %v1130_v10 = vld [vmem:[%s11337_s14 + $0x16e0] sm:$0xff]  ;;  %5274 = vmatpush1.bf16.msra.mxu1 %v9781_v12  ;;  %v539_v7 = vld [vmem:[%s11337_s14 + $0x468] sm:$0xff] }
 0x18b   : > { %v9790_v14 = vcombine.high %v1126_v9, %v1130_v10  ;;  %v1006_v15 = vld [vmem:[%s11337_s14 + $0x1300] sm:$0xff]  ;;  %5234 = vmatprep.subr.bf16.mxu0 %v9662_v13  ;;  %v9789_v24 = vcombine.low %v1126_v9, %v1130_v10  ;;  %v9063_v9 = vcombine.low %v399_v57, %v403_v58  ;;  %v9191_v10 = vcombine.low %v527_v61, %v531_v62  ;;  %v415_v13 = vld [vmem:[%s11337_s14 + $0x88] sm:$0xff] }
 0x18c   : > { %v1010_v16 = vld [vmem:[%s11337_s14 + $0x1320] sm:$0xff]  ;;  %5235 = vmatpush1.bf16.msra.mxu0 %v9661_v22  ;;  %v9200_v12 = vcombine.high %v535_v6, %v539_v7  ;;  %v423_v22 = vld [vmem:[%s11337_s14 + $0xc8] sm:$0xff] }
 0x18d   : > { %v1134_v18 = vld [vmem:[%s11337_s14 + $0x1700] sm:$0xff]  ;;  %v9670_v25 = vcombine.high %v1006_v15, %v1010_v16  ;;  %5275 = vmatprep.subr.bf16.mxu1 %v9790_v14  ;;  %v9669_v31 = vcombine.low %v1006_v15, %v1010_v16  ;;  %v543_v14 = vld [vmem:[%s11337_s14 + $0x488] sm:$0xff]  ;;  %v9199_v16 = vcombine.low %v535_v6, %v539_v7 }
 0x18e   : > { %v1138_v19 = vld [vmem:[%s11337_s14 + $0x1720] sm:$0xff]  ;;  %5276 = vmatpush1.bf16.msra.mxu1 %v9789_v24  ;;  %v547_v15 = vld [vmem:[%s11337_s14 + $0x4a8] sm:$0xff] }
 0x18f   : > { %v9798_v54 = vcombine.high %v1134_v18, %v1138_v19  ;;  %v1014_v26 = vld [vmem:[%s11337_s14 + $0x1340] sm:$0xff]  ;;  %5236 = vmatprep.subr.bf16.mxu0 %v9670_v25  ;;  %v9797_v32 = vcombine.low %v1134_v18, %v1138_v19  ;;  %v9080_v18 = vcombine.high %v415_v13, %v419_v40  ;;  %v9208_v19 = vcombine.high %v543_v14, %v547_v15  ;;  %v427_v24 = vld [vmem:[%s11337_s14 + $0xe8] sm:$0xff] }
 0x190   : > { %v1018_v27 = vld [vmem:[%s11337_s14 + $0x1360] sm:$0xff]  ;;  %5237 = vmatpush1.bf16.msra.mxu0 %v9669_v31  ;;  %v551_v25 = vld [vmem:[%s11337_s14 + $0x4c8] sm:$0xff] }
 0x191   : > { %v1142_v55 = vld [vmem:[%s11337_s14 + $0x1740] sm:$0xff]  ;;  %v9678_v33 = vcombine.high %v1014_v26, %v1018_v27  ;;  %5277 = vmatprep.subr.bf16.mxu1 %v9798_v54  ;;  %v9677_v42 = vcombine.low %v1014_v26, %v1018_v27  ;;  %v555_v54 = vld [vmem:[%s11337_s14 + $0x4e8] sm:$0xff]  ;;  %v9079_v26 = vcombine.low %v415_v13, %v419_v40  ;;  %v9207_v27 = vcombine.low %v543_v14, %v547_v15 }
 0x192   : > { %v1146_v29 = vld [vmem:[%s11337_s14 + $0x1760] sm:$0xff]  ;;  %5278 = vmatpush1.bf16.msra.mxu1 %v9797_v32  ;;  %v431_v31 = vld [vmem:[%s11337_s14 + $0x108] sm:$0xff] }
 0x193   : > { %v9806_v34 = vcombine.high %v1142_v55, %v1146_v29  ;;  %v1022_v35 = vld [vmem:[%s11337_s14 + $0x1380] sm:$0xff]  ;;  %5238 = vmatprep.subr.bf16.mxu0 %v9678_v33  ;;  %v9805_v44 = vcombine.low %v1142_v55, %v1146_v29  ;;  %v9088_v55 = vcombine.high %v423_v22, %v427_v24  ;;  %v9216_v29 = vcombine.high %v551_v25, %v555_v54  ;;  %v435_v32 = vld [vmem:[%s11337_s14 + $0x128] sm:$0xff] }
 0x194   : > { %v1026_v36 = vld [vmem:[%s11337_s14 + $0x13a0] sm:$0xff]  ;;  %5239 = vmatpush1.bf16.msra.mxu0 %v9677_v42  ;;  %v559_v33 = vld [vmem:[%s11337_s14 + $0x508] sm:$0xff] }
 0x195   : > { %v1150_v38 = vld [vmem:[%s11337_s14 + $0x1780] sm:$0xff]  ;;  %v9686_v45 = vcombine.high %v1022_v35, %v1026_v36  ;;  %5279 = vmatprep.subr.bf16.mxu1 %v9806_v34  ;;  %v9685_v51 = vcombine.low %v1022_v35, %v1026_v36  ;;  %v563_v34 = vld [vmem:[%s11337_s14 + $0x528] sm:$0xff]  ;;  %v9087_v35 = vcombine.low %v423_v22, %v427_v24  ;;  %v9215_v36 = vcombine.low %v551_v25, %v555_v54 }
 0x196   : > { %v1154_v39 = vld [vmem:[%s11337_s14 + $0x17a0] sm:$0xff]  ;;  %5280 = vmatpush1.bf16.msra.mxu1 %v9805_v44  ;;  %v439_v42 = vld [vmem:[%s11337_s14 + $0x148] sm:$0xff] }
 0x197   : > { %v9814_v20 = vcombine.high %v1150_v38, %v1154_v39  ;;  %v1030_v46 = vld [vmem:[%s11337_s14 + $0x13c0] sm:$0xff]  ;;  %5240 = vmatprep.subr.bf16.mxu0 %v9686_v45  ;;  %v9813_v52 = vcombine.low %v1150_v38, %v1154_v39  ;;  %v9096_v38 = vcombine.high %v431_v31, %v435_v32  ;;  %v9224_v39 = vcombine.high %v559_v33, %v563_v34  ;;  %v443_v44 = vld [vmem:[%s11337_s14 + $0x168] sm:$0xff] }
 0x198   : > { %v1034_v47 = vld [vmem:[%s11337_s14 + $0x13e0] sm:$0xff]  ;;  %5241 = vmatpush1.bf16.msra.mxu0 %v9685_v51  ;;  %v567_v45 = vld [vmem:[%s11337_s14 + $0x548] sm:$0xff]  ;;  %v9103_v57 = vcombine.low %v439_v42, %v443_v44 }
 0x199   : > { %v1158_v23 = vld [vmem:[%s11337_s14 + $0x17c0] sm:$0xff]  ;;  %v9694_v53 = vcombine.high %v1030_v46, %v1034_v47  ;;  %5281 = vmatprep.subr.bf16.mxu1 %v9814_v20  ;;  %v9693_v63 = vcombine.low %v1030_v46, %v1034_v47  ;;  %v571_v20 = vld [vmem:[%s11337_s14 + $0x568] sm:$0xff]  ;;  %v9095_v46 = vcombine.low %v431_v31, %v435_v32  ;;  %v9223_v47 = vcombine.low %v559_v33, %v563_v34 }
 0x19a   : > { %v1162_v49 = vld [vmem:[%s11337_s14 + $0x17e0] sm:$0xff]  ;;  %5282 = vmatpush1.bf16.msra.mxu1 %v9813_v52  ;;  %v447_v51 = vld [vmem:[%s11337_s14 + $0x188] sm:$0xff]  ;;  %v9231_v58 = vcombine.low %v567_v45, %v571_v20 }
 0x19b   : > { %v9822_v56 = vcombine.high %v1158_v23, %v1162_v49  ;;  %5242 = vmatprep.subr.bf16.mxu0 %v9694_v53  ;;  %v9821_v0 = vcombine.low %v1158_v23, %v1162_v49  ;;  %v9104_v23 = vcombine.high %v439_v42, %v443_v44  ;;  %v9232_v49 = vcombine.high %v567_v45, %v571_v20  ;;  %v451_v52 = vld [vmem:[%s11337_s14 + $0x1a8] sm:$0xff] }
 0x19c   : > { %5243 = vmatpush1.bf16.msra.mxu0 %v9693_v63  ;;  %v575_v53 = vld [vmem:[%s11337_s14 + $0x588] sm:$0xff]  ;;  %v9112_v61 = vcombine.high %v447_v51, %v451_v52  ;;  %v9111_v3 = vcombine.low %v447_v51, %v451_v52 }
 0x19d   : > { %5283 = vmatprep.subr.bf16.mxu1 %v9822_v56  ;;  %5294 = vmatprep.subr.bf16.mxu0 %v9064_v1  ;;  %v579_v56 = vld [vmem:[%s11337_s14 + $0x5a8] sm:$0xff] }
 0x19e   : > { %5284 = vmatpush1.bf16.msra.mxu1 %v9821_v0  ;;  %v9240_v62 = vcombine.high %v575_v53, %v579_v56  ;;  %v455_v63 = vld [vmem:[%s11337_s14 + $0x1c8] sm:$0xff]  ;;  %v9239_v4 = vcombine.low %v575_v53, %v579_v56 }
 0x19f   : > { %5335 = vmatprep.subr.bf16.mxu1 %v9192_v2  ;;  %5245 = vmatmul.mubr.bf16.vlgmr.msra.gmra.mrb[8].mxu0 %v11631_v5  ;;  %v459_v0 = vld [vmem:[%s11337_s14 + $0x1e8] sm:$0xff] }
 0x1a0   : > { %5295 = vmatpush1.bf16.msra.mxu0 %v9063_v9  ;;  %5326 = vmatprep.mubr.bf16.mxu0 %v11401_v59  ;;  %v583_v1 = vld [vmem:[%s11337_s14 + $0x5c8] sm:$0xff]  ;;  %v9120_v6 = vcombine.high %v455_v63, %v459_v0  ;;  %v9119_v13 = vcombine.low %v455_v63, %v459_v0 }
 0x1a1   : > { %5286 = vmatmul.mubr.bf16.vlgmr.msra.gmra.mrb[8].mxu1 %v11637_v8  ;;  %5296 = vmatprep.subr.bf16.mxu0 %v9072_v11  ;;  %v587_v2 = vld [vmem:[%s11337_s14 + $0x5e8] sm:$0xff] }
 0x1a2   : > { %5336 = vmatpush1.bf16.msra.mxu1 %v9191_v10  ;;  %5367 = vmatprep.mubr.bf16.mxu1 %v11405_v60  ;;  %v9248_v7 = vcombine.high %v583_v1, %v587_v2  ;;  %v463_v9 = vld [vmem:[%s11337_s14 + $0x208] sm:$0xff]  ;;  %v9247_v40 = vcombine.low %v583_v1, %v587_v2 }
 0x1a3   : > { %5337 = vmatprep.subr.bf16.mxu1 %v9200_v12  ;;  %v467_v10 = vld [vmem:[%s11337_s14 + $0x228] sm:$0xff] }
 0x1a4   : > { %5297 = vmatpush1.bf16.msra.mxu0 %v9071_v43  ;;  %v591_v11 = vld [vmem:[%s11337_s14 + $0x608] sm:$0xff]  ;;  %v9128_v14 = vcombine.high %v463_v9, %v467_v10  ;;  %v9127_v22 = vcombine.low %v463_v9, %v467_v10 }
 0x1a5   : > { %5298 = vmatprep.subr.bf16.mxu0 %v9080_v18  ;;  %v595_v12 = vld [vmem:[%s11337_s14 + $0x628] sm:$0xff] }
 0x1a6   : > { %5338 = vmatpush1.bf16.msra.mxu1 %v9199_v16  ;;  %v9256_v15 = vcombine.high %v591_v11, %v595_v12  ;;  %v471_v43 = vld [vmem:[%s11337_s14 + $0x248] sm:$0xff]  ;;  %v9255_v24 = vcombine.low %v591_v11, %v595_v12 }
 0x1a7   : > { %5339 = vmatprep.subr.bf16.mxu1 %v9208_v19  ;;  %v475_v16 = vld [vmem:[%s11337_s14 + $0x268] sm:$0xff] }
 0x1a8   : > { %5299 = vmatpush1.bf16.msra.mxu0 %v9079_v26  ;;  %v599_v18 = vld [vmem:[%s11337_s14 + $0x648] sm:$0xff]  ;;  %v9136_v25 = vcombine.high %v471_v43, %v475_v16  ;;  %v9135_v31 = vcombine.low %v471_v43, %v475_v16 }
 0x1a9   : > { %5300 = vmatprep.subr.bf16.mxu0 %v9088_v55  ;;  %v603_v19 = vld [vmem:[%s11337_s14 + $0x668] sm:$0xff] }
 0x1aa   : > { %5340 = vmatpush1.bf16.msra.mxu1 %v9207_v27  ;;  %v9264_v54 = vcombine.high %v599_v18, %v603_v19  ;;  %v479_v26 = vld [vmem:[%s11337_s14 + $0x288] sm:$0xff]  ;;  %v9263_v32 = vcombine.low %v599_v18, %v603_v19 }
 0x1ab   : > { %5341 = vmatprep.subr.bf16.mxu1 %v9216_v29  ;;  %v483_v27 = vld [vmem:[%s11337_s14 + $0x2a8] sm:$0xff] }
 0x1ac   : > { %5301 = vmatpush1.bf16.msra.mxu0 %v9087_v35  ;;  %v607_v55 = vld [vmem:[%s11337_s14 + $0x688] sm:$0xff]  ;;  %v9144_v33 = vcombine.high %v479_v26, %v483_v27  ;;  %v9143_v42 = vcombine.low %v479_v26, %v483_v27 }
 0x1ad   : > { %5302 = vmatprep.subr.bf16.mxu0 %v9096_v38  ;;  %v611_v29 = vld [vmem:[%s11337_s14 + $0x6a8] sm:$0xff] }
 0x1ae   : > { %5342 = vmatpush1.bf16.msra.mxu1 %v9215_v36  ;;  %v9272_v34 = vcombine.high %v607_v55, %v611_v29  ;;  %v487_v35 = vld [vmem:[%s11337_s14 + $0x2c8] sm:$0xff]  ;;  %v9271_v44 = vcombine.low %v607_v55, %v611_v29 }
 0x1af   : > { %5343 = vmatprep.subr.bf16.mxu1 %v9224_v39  ;;  %v491_v36 = vld [vmem:[%s11337_s14 + $0x2e8] sm:$0xff] }
 0x1b0   : > { %5303 = vmatpush1.bf16.msra.mxu0 %v9095_v46  ;;  %v615_v38 = vld [vmem:[%s11337_s14 + $0x6c8] sm:$0xff]  ;;  %v9152_v45 = vcombine.high %v487_v35, %v491_v36  ;;  %v9151_v51 = vcombine.low %v487_v35, %v491_v36 }
 0x1b1   : > { %5304 = vmatprep.subr.bf16.mxu0 %v9104_v23  ;;  %v619_v39 = vld [vmem:[%s11337_s14 + $0x6e8] sm:$0xff] }
 0x1b2   : > { %5344 = vmatpush1.bf16.msra.mxu1 %v9223_v47  ;;  %v9280_v20 = vcombine.high %v615_v38, %v619_v39  ;;  %v495_v46 = vld [vmem:[%s11337_s14 + $0x308] sm:$0xff]  ;;  %v9279_v52 = vcombine.low %v615_v38, %v619_v39 }
 0x1b3   : > { %5345 = vmatprep.subr.bf16.mxu1 %v9232_v49  ;;  %v499_v47 = vld [vmem:[%s11337_s14 + $0x328] sm:$0xff] }
 0x1b4   : > { %5305 = vmatpush1.bf16.msra.mxu0 %v9103_v57  ;;  %v623_v23 = vld [vmem:[%s11337_s14 + $0x708] sm:$0xff]  ;;  %v9160_v53 = vcombine.high %v495_v46, %v499_v47  ;;  %v9159_v63 = vcombine.low %v495_v46, %v499_v47 }
 0x1b5   : > { %5306 = vmatprep.subr.bf16.mxu0 %v9112_v61  ;;  %v627_v49 = vld [vmem:[%s11337_s14 + $0x728] sm:$0xff] }
 0x1b6   : > { %5346 = vmatpush1.bf16.msra.mxu1 %v9231_v58  ;;  %v9288_v56 = vcombine.high %v623_v23, %v627_v49  ;;  %v503_v57 = vld [vmem:[%s11337_s14 + $0x348] sm:$0xff]  ;;  %v9287_v0 = vcombine.low %v623_v23, %v627_v49 }
 0x1b7   : > { %5347 = vmatprep.subr.bf16.mxu1 %v9240_v62  ;;  %v507_v58 = vld [vmem:[%s11337_s14 + $0x368] sm:$0xff] }
 0x1b8   : > { %5307 = vmatpush1.bf16.msra.mxu0 %v9111_v3  ;;  %v631_v61 = vld [vmem:[%s11337_s14 + $0x748] sm:$0xff]  ;;  %v9168_v1 = vcombine.high %v503_v57, %v507_v58  ;;  %v9167_v9 = vcombine.low %v503_v57, %v507_v58 }
 0x1b9   : > { %5308 = vmatprep.subr.bf16.mxu0 %v9120_v6  ;;  %v635_v62 = vld [vmem:[%s11337_s14 + $0x768] sm:$0xff] }
 0x1ba   : > { %5348 = vmatpush1.bf16.msra.mxu1 %v9239_v4  ;;  %v9296_v2 = vcombine.high %v631_v61, %v635_v62  ;;  %v511_v3 = vld [vmem:[%s11337_s14 + $0x388] sm:$0xff]  ;;  %v9295_v10 = vcombine.low %v631_v61, %v635_v62 }
 0x1bb   : > { %5349 = vmatprep.subr.bf16.mxu1 %v9248_v7  ;;  %v515_v4 = vld [vmem:[%s11337_s14 + $0x3a8] sm:$0xff] }
 0x1bc   : > { %5309 = vmatpush1.bf16.msra.mxu0 %v9119_v13  ;;  %v639_v6 = vld [vmem:[%s11337_s14 + $0x788] sm:$0xff]  ;;  %v9176_v11 = vcombine.high %v511_v3, %v515_v4  ;;  %v9175_v43 = vcombine.low %v511_v3, %v515_v4 }
 0x1bd   : > { %5310 = vmatprep.subr.bf16.mxu0 %v9128_v14  ;;  %v643_v7 = vld [vmem:[%s11337_s14 + $0x7a8] sm:$0xff] }
 0x1be   : > { %5350 = vmatpush1.bf16.msra.mxu1 %v9247_v40  ;;  %v9304_v12 = vcombine.high %v639_v6, %v643_v7  ;;  %v519_v13 = vld [vmem:[%s11337_s14 + $0x3c8] sm:$0xff]  ;;  %v9303_v16 = vcombine.low %v639_v6, %v643_v7 }
 0x1bf   : > { %5351 = vmatprep.subr.bf16.mxu1 %v9256_v15  ;;  %v523_v40 = vld [vmem:[%s11337_s14 + $0x3e8] sm:$0xff] }
 0x1c0   : > { %5311 = vmatpush1.bf16.msra.mxu0 %v9127_v22  ;;  %v647_v14 = vld [vmem:[%s11337_s14 + $0x7c8] sm:$0xff]  ;;  %v9184_v18 = vcombine.high %v519_v13, %v523_v40  ;;  %v9183_v26 = vcombine.low %v519_v13, %v523_v40 }
 0x1c1   : > { %5312 = vmatprep.subr.bf16.mxu0 %v9136_v25  ;;  %v651_v15 = vld [vmem:[%s11337_s14 + $0x7e8] sm:$0xff] }
 0x1c2   : > { %5352 = vmatpush1.bf16.msra.mxu1 %v9255_v24  ;;  %v9312_v19 = vcombine.high %v647_v14, %v651_v15  ;;  %v655_v22 = vld [vmem:[%s11337_s14 + $0x808] sm:$0xff]  ;;  %v9311_v27 = vcombine.low %v647_v14, %v651_v15 }
 0x1c3   : > { %5353 = vmatprep.subr.bf16.mxu1 %v9264_v54  ;;  %v659_v24 = vld [vmem:[%s11337_s14 + $0x828] sm:$0xff] }
 0x1c4   : > { %5313 = vmatpush1.bf16.msra.mxu0 %v9135_v31  ;;  %v783_v25 = vld [vmem:[%s11337_s14 + $0xc08] sm:$0xff]  ;;  %v9320_v55 = vcombine.high %v655_v22, %v659_v24  ;;  %v9319_v35 = vcombine.low %v655_v22, %v659_v24 }
 0x1c5   : > { %5314 = vmatprep.subr.bf16.mxu0 %v9144_v33  ;;  %v787_v54 = vld [vmem:[%s11337_s14 + $0xc28] sm:$0xff] }
 0x1c6   : > { %5354 = vmatpush1.bf16.msra.mxu1 %v9263_v32  ;;  %v9448_v29 = vcombine.high %v783_v25, %v787_v54  ;;  %v663_v31 = vld [vmem:[%s11337_s14 + $0x848] sm:$0xff]  ;;  %v9447_v36 = vcombine.low %v783_v25, %v787_v54 }
 0x1c7   : > { %5355 = vmatprep.subr.bf16.mxu1 %v9272_v34  ;;  %v667_v32 = vld [vmem:[%s11337_s14 + $0x868] sm:$0xff] }
 0x1c8   : > { %5315 = vmatpush1.bf16.msra.mxu0 %v9143_v42  ;;  %v791_v33 = vld [vmem:[%s11337_s14 + $0xc48] sm:$0xff]  ;;  %v9328_v38 = vcombine.high %v663_v31, %v667_v32  ;;  %v9327_v46 = vcombine.low %v663_v31, %v667_v32 }
 0x1c9   : > { %5316 = vmatprep.subr.bf16.mxu0 %v9152_v45  ;;  %v795_v34 = vld [vmem:[%s11337_s14 + $0xc68] sm:$0xff] }
 0x1ca   : > { %5356 = vmatpush1.bf16.msra.mxu1 %v9271_v44  ;;  %v9456_v39 = vcombine.high %v791_v33, %v795_v34  ;;  %v671_v42 = vld [vmem:[%s11337_s14 + $0x888] sm:$0xff]  ;;  %v9455_v47 = vcombine.low %v791_v33, %v795_v34 }
 0x1cb   : > { %5357 = vmatprep.subr.bf16.mxu1 %v9280_v20  ;;  %v675_v44 = vld [vmem:[%s11337_s14 + $0x8a8] sm:$0xff] }
 0x1cc   : > { %5317 = vmatpush1.bf16.msra.mxu0 %v9151_v51  ;;  %v799_v45 = vld [vmem:[%s11337_s14 + $0xc88] sm:$0xff]  ;;  %v9336_v23 = vcombine.high %v671_v42, %v675_v44  ;;  %v9335_v57 = vcombine.low %v671_v42, %v675_v44 }
 0x1cd   : > { %5318 = vmatprep.subr.bf16.mxu0 %v9160_v53  ;;  %v803_v20 = vld [vmem:[%s11337_s14 + $0xca8] sm:$0xff] }
 0x1ce   : > { %5358 = vmatpush1.bf16.msra.mxu1 %v9279_v52  ;;  %v9464_v49 = vcombine.high %v799_v45, %v803_v20  ;;  %v679_v51 = vld [vmem:[%s11337_s14 + $0x8c8] sm:$0xff]  ;;  %v9463_v58 = vcombine.low %v799_v45, %v803_v20 }
 0x1cf   : > { %5359 = vmatprep.subr.bf16.mxu1 %v9288_v56  ;;  %v683_v52 = vld [vmem:[%s11337_s14 + $0x8e8] sm:$0xff] }
 0x1d0   : > { %5319 = vmatpush1.bf16.msra.mxu0 %v9159_v63  ;;  %v807_v53 = vld [vmem:[%s11337_s14 + $0xcc8] sm:$0xff]  ;;  %v9344_v61 = vcombine.high %v679_v51, %v683_v52  ;;  %v9343_v3 = vcombine.low %v679_v51, %v683_v52 }
 0x1d1   : > { %5320 = vmatprep.subr.bf16.mxu0 %v9168_v1  ;;  %v811_v56 = vld [vmem:[%s11337_s14 + $0xce8] sm:$0xff] }
 0x1d2   : > { %5360 = vmatpush1.bf16.msra.mxu1 %v9287_v0  ;;  %v9472_v62 = vcombine.high %v807_v53, %v811_v56  ;;  %v687_v63 = vld [vmem:[%s11337_s14 + $0x908] sm:$0xff]  ;;  %v9471_v4 = vcombine.low %v807_v53, %v811_v56 }
 0x1d3   : > { %5361 = vmatprep.subr.bf16.mxu1 %v9296_v2  ;;  %v691_v0 = vld [vmem:[%s11337_s14 + $0x928] sm:$0xff] }
 0x1d4   : > { %5321 = vmatpush1.bf16.msra.mxu0 %v9167_v9  ;;  %v815_v1 = vld [vmem:[%s11337_s14 + $0xd08] sm:$0xff]  ;;  %v9352_v6 = vcombine.high %v687_v63, %v691_v0  ;;  %v9351_v13 = vcombine.low %v687_v63, %v691_v0 }
 0x1d5   : > { %5322 = vmatprep.subr.bf16.mxu0 %v9176_v11  ;;  %v819_v2 = vld [vmem:[%s11337_s14 + $0xd28] sm:$0xff] }
 0x1d6   : > { %5362 = vmatpush1.bf16.msra.mxu1 %v9295_v10  ;;  %v9480_v7 = vcombine.high %v815_v1, %v819_v2  ;;  %v695_v9 = vld [vmem:[%s11337_s14 + $0x948] sm:$0xff]  ;;  %v9479_v40 = vcombine.low %v815_v1, %v819_v2 }
 0x1d7   : > { %5363 = vmatprep.subr.bf16.mxu1 %v9304_v12  ;;  %v699_v10 = vld [vmem:[%s11337_s14 + $0x968] sm:$0xff] }
 0x1d8   : > { %5323 = vmatpush1.bf16.msra.mxu0 %v9175_v43  ;;  %v823_v11 = vld [vmem:[%s11337_s14 + $0xd48] sm:$0xff]  ;;  %v9360_v14 = vcombine.high %v695_v9, %v699_v10  ;;  %v9359_v22 = vcombine.low %v695_v9, %v699_v10 }
 0x1d9   : > { %5324 = vmatprep.subr.bf16.mxu0 %v9184_v18  ;;  %v827_v12 = vld [vmem:[%s11337_s14 + $0xd68] sm:$0xff] }
 0x1da   : > { %5364 = vmatpush1.bf16.msra.mxu1 %v9303_v16  ;;  %v9488_v15 = vcombine.high %v823_v11, %v827_v12  ;;  %v703_v43 = vld [vmem:[%s11337_s14 + $0x988] sm:$0xff]  ;;  %v9487_v24 = vcombine.low %v823_v11, %v827_v12 }
 0x1db   : > { %5365 = vmatprep.subr.bf16.mxu1 %v9312_v19  ;;  %v707_v16 = vld [vmem:[%s11337_s14 + $0x9a8] sm:$0xff] }
 0x1dc   : > { %5325 = vmatpush1.bf16.msra.mxu0 %v9183_v26  ;;  %v831_v18 = vld [vmem:[%s11337_s14 + $0xd88] sm:$0xff]  ;;  %v9368_v25 = vcombine.high %v703_v43, %v707_v16 }
 0x1dd   : > { %5376 = vmatprep.subr.bf16.mxu0 %v9320_v55  ;;  %v835_v19 = vld [vmem:[%s11337_s14 + $0xda8] sm:$0xff] }
 0x1de   : > { %5366 = vmatpush1.bf16.msra.mxu1 %v9311_v27  ;;  %v9496_v26 = vcombine.high %v831_v18, %v835_v19  ;;  %v711_v27 = vld [vmem:[%s11337_s14 + $0x9c8] sm:$0xff]  ;;  %v9495_v45 = vcombine.low %v831_v18, %v835_v19 }
 0x1df   : > { %5417 = vmatprep.subr.bf16.mxu1 %v9448_v29  ;;  %5327 = vmatmul.mubr.bf16.vlgmr.msra.gmra.mrb[12].mxu0 %v11451_v17  ;;  %v715_v55 = vld [vmem:[%s11337_s14 + $0x9e8] sm:$0xff] }
 0x1e0   : > { %5377 = vmatpush1.bf16.msra.mxu0 %v9319_v35  ;;  %5408 = vmatprep.mubr.bf16.mxu0 %v11469_v28  ;;  %v839_v32 = vld [vmem:[%s11337_s14 + $0xdc8] sm:$0xff]  ;;  %v9376_v20 = vcombine.high %v711_v27, %v715_v55  ;;  %v9375_v53 = vcombine.low %v711_v27, %v715_v55 }
 0x1e1   : > { %5368 = vmatmul.mubr.bf16.vlgmr.msra.gmra.mrb[12].mxu1 %v11460_v21  ;;  %5378 = vmatprep.subr.bf16.mxu0 %v9328_v38  ;;  %v843_v33 = vld [vmem:[%s11337_s14 + $0xde8] sm:$0xff]  ;;  %v9367_v38 = vcombine.low %v703_v43, %v707_v16 }
 0x1e2   : > { %5418 = vmatpush1.bf16.msra.mxu1 %v9447_v36  ;;  %5449 = vmatprep.mubr.bf16.mxu1 %v11476_v30  ;;  %v847_v51 = vld [vmem:[%s11337_s14 + $0xe08] sm:$0xff]  ;;  %v9503_v56 = vcombine.low %v839_v32, %v843_v33 }
 0x1e3   : > { %5419 = vmatprep.subr.bf16.mxu1 %v9456_v39  ;;  %v851_v52 = vld [vmem:[%s11337_s14 + $0xe28] sm:$0xff] }
 0x1e4   : > { %5379 = vmatpush1.bf16.msra.mxu0 %v9327_v46  ;;  %v855_v63 = vld [vmem:[%s11337_s14 + $0xe48] sm:$0xff]  ;;  %v9511_v2 = vcombine.low %v847_v51, %v851_v52 }
 0x1e5   : > { %5380 = vmatprep.subr.bf16.mxu0 %v9336_v23  ;;  %v719_v23 = vld [vmem:[%s11337_s14 + $0xa08] sm:$0xff] }
 0x1e6   : > { %5420 = vmatpush1.bf16.msra.mxu1 %v9455_v47  ;;  %v9504_v47 = vcombine.high %v839_v32, %v843_v33  ;;  %v859_v0 = vld [vmem:[%s11337_s14 + $0xe68] sm:$0xff] }
 0x1e7   : > { %5421 = vmatprep.subr.bf16.mxu1 %v9464_v49  ;;  %v723_v49 = vld [vmem:[%s11337_s14 + $0xa28] sm:$0xff]  ;;  %v9519_v12 = vcombine.low %v855_v63, %v859_v0 }
 0x1e8   : > { %5381 = vmatpush1.bf16.msra.mxu0 %v9335_v57  ;;  %v9384_v57 = vcombine.high %v719_v23, %v723_v49  ;;  %v9383_v1 = vcombine.low %v719_v23, %v723_v49  ;;  %v863_v9 = vld [vmem:[%s11337_s14 + $0xe88] sm:$0xff] }
 0x1e9   : > { %5382 = vmatprep.subr.bf16.mxu0 %v9344_v61  ;;  %v727_v61 = vld [vmem:[%s11337_s14 + $0xa48] sm:$0xff] }
 0x1ea   : > { %5422 = vmatpush1.bf16.msra.mxu1 %v9463_v58  ;;  %v9512_v58 = vcombine.high %v847_v51, %v851_v52  ;;  %v867_v10 = vld [vmem:[%s11337_s14 + $0xea8] sm:$0xff] }
 0x1eb   : > { %5423 = vmatprep.subr.bf16.mxu1 %v9472_v62  ;;  %v731_v62 = vld [vmem:[%s11337_s14 + $0xa68] sm:$0xff]  ;;  %v9527_v19 = vcombine.low %v863_v9, %v867_v10 }
 0x1ec   : > { %5383 = vmatpush1.bf16.msra.mxu0 %v9343_v3  ;;  %v9392_v3 = vcombine.high %v727_v61, %v731_v62  ;;  %v9391_v11 = vcombine.low %v727_v61, %v731_v62  ;;  %v871_v43 = vld [vmem:[%s11337_s14 + $0xec8] sm:$0xff] }
 0x1ed   : > { %5384 = vmatprep.subr.bf16.mxu0 %v9352_v6  ;;  %v735_v6 = vld [vmem:[%s11337_s14 + $0xa88] sm:$0xff] }
 0x1ee   : > { %5424 = vmatpush1.bf16.msra.mxu1 %v9471_v4  ;;  %v9520_v4 = vcombine.high %v855_v63, %v859_v0  ;;  %v875_v16 = vld [vmem:[%s11337_s14 + $0xee8] sm:$0xff] }
 0x1ef   : > { %5425 = vmatprep.subr.bf16.mxu1 %v9480_v7  ;;  %v739_v7 = vld [vmem:[%s11337_s14 + $0xaa8] sm:$0xff] }
 0x1f0   : > { %5385 = vmatpush1.bf16.msra.mxu0 %v9351_v13  ;;  %v9400_v13 = vcombine.high %v735_v6, %v739_v7  ;;  %v9399_v18 = vcombine.low %v735_v6, %v739_v7  ;;  %v883_v27 = vld [vmem:[%s11337_s14 + $0xf28] sm:$0xff] }
 0x1f1   : > { %5386 = vmatprep.subr.bf16.mxu0 %v9360_v14  ;;  %v5082_v54 = vpop.f32.mrb[0].mxu0  ;;  %v743_v14 = vld [vmem:[%s11337_s14 + $0xac8] sm:$0xff] }
 0x1f2   : > { %5426 = vmatpush1.bf16.msra.mxu1 %v9479_v40  ;;  %v5084_v31 = vpop.f32.mrb[1].mxu0  ;;  %v9528_v40 = vcombine.high %v863_v9, %v867_v10  ;;  %v759_v33 = vld [vmem:[%s11337_s14 + $0xb48] sm:$0xff] }
 0x1f3   : > { %5427 = vmatprep.subr.bf16.mxu1 %v9488_v15  ;;  %v5123_v29 = vpop.f32.mrb[0].mxu1  ;;  %v5086_v36 = vpop.f32.mrb[2].mxu0  ;;  %v747_v15 = vld [vmem:[%s11337_s14 + $0xae8] sm:$0xff] }
 0x1f4   : > { %v11735_v34 = vadd.f32 %v5123_v29, %v5082_v54  ;;  %v5125_v35 = vpop.f32.mrb[1].mxu1  ;;  %5387 = vmatpush1.bf16.msra.mxu0 %v9359_v22  ;;  %v5087_v44 = vpop.f32.mrb[3].mxu0  ;;  %v9408_v22 = vcombine.high %v743_v14, %v747_v15  ;;  %v755_v54 = vld [vmem:[%s11337_s14 + $0xb28] sm:$0xff]  ;;  %v9407_v55 = vcombine.low %v743_v14, %v747_v15  ;;  %v9535_v29 = vcombine.low %v871_v43, %v875_v16 }
 0x1f5   : > { %v11737_v39 = vadd.f32 %v5125_v35, %v5084_v31  ;;  %v5127_v42 = vpop.f32.mrb[2].mxu1  ;;  %5388 = vmatprep.subr.bf16.mxu0 %v9368_v25  ;;  %v751_v25 = vld [vmem:[%s11337_s14 + $0xb08] sm:$0xff] }
 0x1f6   : > { %5428 = vmatpush1.bf16.msra.mxu1 %v9487_v24  ;;  %v5128_v46 = vpop.f32.mrb[3].mxu1  ;;  %v9536_v24 = vcombine.high %v871_v43, %v875_v16  ;;  %v9416_v31 = vcombine.high %v751_v25, %v755_v54  ;;  %v763_v35 = vld [vmem:[%s11337_s14 + $0xb68] sm:$0xff]  ;;  %v9415_v42 = vcombine.low %v751_v25, %v755_v54 }
 0x1f7   : > { %5429 = vmatprep.subr.bf16.mxu1 %v9496_v26  ;;  %v879_v26 = vld [vmem:[%s11337_s14 + $0xf08] sm:$0xff]  ;;  %v9423_v51 = vcombine.low %v759_v33, %v763_v35 }
 0x1f8   : > { %5389 = vmatpush1.bf16.msra.mxu0 %v9367_v38  ;;  %v9544_v32 = vcombine.high %v879_v26, %v883_v27  ;;  %v887_v36 = vld [vmem:[%s11337_s14 + $0xf48] sm:$0xff]  ;;  %v9543_v44 = vcombine.low %v879_v26, %v883_v27 }
 0x1f9   : > { %5390 = vmatprep.subr.bf16.mxu0 %v9376_v20  ;;  %v891_v38 = vld [vmem:[%s11337_s14 + $0xf68] sm:$0xff] }
 0x1fa   : > { %5430 = vmatpush1.bf16.msra.mxu1 %v9495_v45  ;;  %v9424_v45 = vcombine.high %v759_v33, %v763_v35  ;;  %v9552_v20 = vcombine.high %v887_v36, %v891_v38  ;;  %v767_v46 = vld [vmem:[%s11337_s14 + $0xb88] sm:$0xff]  ;;  %v9551_v52 = vcombine.low %v887_v36, %v891_v38 }
 0x1fb   : > { %5431 = vmatprep.subr.bf16.mxu1 %v9504_v47  ;;  %v771_v47 = vld [vmem:[%s11337_s14 + $0xba8] sm:$0xff] }
 0x1fc   : > { %5391 = vmatpush1.bf16.msra.mxu0 %v9375_v53  ;;  %v895_v23 = vld [vmem:[%s11337_s14 + $0xf88] sm:$0xff]  ;;  %v9432_v53 = vcombine.high %v767_v46, %v771_v47  ;;  %v9431_v63 = vcombine.low %v767_v46, %v771_v47 }
 0x1fd   : > { %5392 = vmatprep.subr.bf16.mxu0 %v9384_v57  ;;  %v899_v49 = vld [vmem:[%s11337_s14 + $0xfa8] sm:$0xff] }
 0x1fe   : > { %5432 = vmatpush1.bf16.msra.mxu1 %v9503_v56  ;;  %v9560_v56 = vcombine.high %v895_v23, %v899_v49  ;;  %v775_v57 = vld [vmem:[%s11337_s14 + $0xbc8] sm:$0xff]  ;;  %v9559_v0 = vcombine.low %v895_v23, %v899_v49 }
 0x1ff   : > { %5433 = vmatprep.subr.bf16.mxu1 %v9512_v58  ;;  %v779_v58 = vld [vmem:[%s11337_s14 + $0xbe8] sm:$0xff] }
 0x200   : > { %5393 = vmatpush1.bf16.msra.mxu0 %v9383_v1  ;;  %v903_v61 = vld [vmem:[%s11337_s14 + $0xfc8] sm:$0xff]  ;;  %v9440_v1 = vcombine.high %v775_v57, %v779_v58  ;;  %v9439_v9 = vcombine.low %v775_v57, %v779_v58 }
 0x201   : > { %5394 = vmatprep.subr.bf16.mxu0 %v9392_v3  ;;  %v907_v62 = vld [vmem:[%s11337_s14 + $0xfe8] sm:$0xff] }
 0x202   : > { %5434 = vmatpush1.bf16.msra.mxu1 %v9511_v2  ;;  %v9568_v2 = vcombine.high %v903_v61, %v907_v62  ;;  %v911_v3 = vld [vmem:[%s11337_s14 + $0x1008] sm:$0xff]  ;;  %v9567_v10 = vcombine.low %v903_v61, %v907_v62 }
 0x203   : > { %5435 = vmatprep.subr.bf16.mxu1 %v9520_v4  ;;  %v915_v4 = vld [vmem:[%s11337_s14 + $0x1028] sm:$0xff] }
 0x204   : > { %5395 = vmatpush1.bf16.msra.mxu0 %v9391_v11  ;;  %v1039_v6 = vld [vmem:[%s11337_s14 + $0x1408] sm:$0xff]  ;;  %v9576_v11 = vcombine.high %v911_v3, %v915_v4  ;;  %v9575_v43 = vcombine.low %v911_v3, %v915_v4 }
 0x205   : > { %5396 = vmatprep.subr.bf16.mxu0 %v9400_v13  ;;  %v1043_v7 = vld [vmem:[%s11337_s14 + $0x1428] sm:$0xff] }
 0x206   : > { %5436 = vmatpush1.bf16.msra.mxu1 %v9519_v12  ;;  %v9704_v12 = vcombine.high %v1039_v6, %v1043_v7  ;;  %v919_v13 = vld [vmem:[%s11337_s14 + $0x1048] sm:$0xff]  ;;  %v9703_v16 = vcombine.low %v1039_v6, %v1043_v7 }
 0x207   : > { %5437 = vmatprep.subr.bf16.mxu1 %v9528_v40  ;;  %v923_v40 = vld [vmem:[%s11337_s14 + $0x1068] sm:$0xff] }
 0x208   : > { %5397 = vmatpush1.bf16.msra.mxu0 %v9399_v18  ;;  %v1047_v14 = vld [vmem:[%s11337_s14 + $0x1448] sm:$0xff]  ;;  %v9584_v18 = vcombine.high %v919_v13, %v923_v40  ;;  %v9583_v26 = vcombine.low %v919_v13, %v923_v40 }
 0x209   : > { %5398 = vmatprep.subr.bf16.mxu0 %v9408_v22  ;;  %v1051_v15 = vld [vmem:[%s11337_s14 + $0x1468] sm:$0xff] }
 0x20a   : > { %5438 = vmatpush1.bf16.msra.mxu1 %v9527_v19  ;;  %v9712_v19 = vcombine.high %v1047_v14, %v1051_v15  ;;  %v927_v22 = vld [vmem:[%s11337_s14 + $0x1088] sm:$0xff]  ;;  %v9711_v27 = vcombine.low %v1047_v14, %v1051_v15 }
 0x20b   : > { %5439 = vmatprep.subr.bf16.mxu1 %v9536_v24  ;;  %v931_v24 = vld [vmem:[%s11337_s14 + $0x10a8] sm:$0xff] }
 0x20c   : > { %5399 = vmatpush1.bf16.msra.mxu0 %v9407_v55  ;;  %v1055_v25 = vld [vmem:[%s11337_s14 + $0x1488] sm:$0xff]  ;;  %v9592_v55 = vcombine.high %v927_v22, %v931_v24  ;;  %v9591_v36 = vcombine.low %v927_v22, %v931_v24 }
 0x20d   : > { %5400 = vmatprep.subr.bf16.mxu0 %v9416_v31  ;;  %v1059_v54 = vld [vmem:[%s11337_s14 + $0x14a8] sm:$0xff] }
 0x20e   : > { %5440 = vmatpush1.bf16.msra.mxu1 %v9535_v29  ;;  %v9720_v29 = vcombine.high %v1055_v25, %v1059_v54  ;;  %v935_v31 = vld [vmem:[%s11337_s14 + $0x10c8] sm:$0xff]  ;;  %v9719_v38 = vcombine.low %v1055_v25, %v1059_v54 }
 0x20f   : > { %5441 = vmatprep.subr.bf16.mxu1 %v9544_v32  ;;  %v939_v32 = vld [vmem:[%s11337_s14 + $0x10e8] sm:$0xff] }
 0x210   : > { %5401 = vmatpush1.bf16.msra.mxu0 %v9415_v42  ;;  %v1063_v33 = vld [vmem:[%s11337_s14 + $0x14c8] sm:$0xff]  ;;  %v9600_v42 = vcombine.high %v935_v31, %v939_v32  ;;  %v9599_v23 = vcombine.low %v935_v31, %v939_v32 }
 0x211   : > { %5402 = vmatprep.subr.bf16.mxu0 %v9424_v45  ;;  %v1067_v35 = vld [vmem:[%s11337_s14 + $0x14e8] sm:$0xff] }
 0x212   : > { %5442 = vmatpush1.bf16.msra.mxu1 %v9543_v44  ;;  %v9728_v44 = vcombine.high %v1063_v33, %v1067_v35  ;;  %v943_v45 = vld [vmem:[%s11337_s14 + $0x1108] sm:$0xff]  ;;  %v9727_v49 = vcombine.low %v1063_v33, %v1067_v35 }
 0x213   : > { %5443 = vmatprep.subr.bf16.mxu1 %v9552_v20  ;;  %v947_v20 = vld [vmem:[%s11337_s14 + $0x1128] sm:$0xff] }
 0x214   : > { %5403 = vmatpush1.bf16.msra.mxu0 %v9423_v51  ;;  %v1071_v46 = vld [vmem:[%s11337_s14 + $0x1508] sm:$0xff]  ;;  %v9608_v51 = vcombine.high %v943_v45, %v947_v20  ;;  %v9607_v61 = vcombine.low %v943_v45, %v947_v20 }
 0x215   : > { %5404 = vmatprep.subr.bf16.mxu0 %v9432_v53  ;;  %v1075_v47 = vld [vmem:[%s11337_s14 + $0x1528] sm:$0xff] }
 0x216   : > { %5444 = vmatpush1.bf16.msra.mxu1 %v9551_v52  ;;  %v9736_v52 = vcombine.high %v1071_v46, %v1075_v47  ;;  %v951_v53 = vld [vmem:[%s11337_s14 + $0x1148] sm:$0xff]  ;;  %v9735_v62 = vcombine.low %v1071_v46, %v1075_v47 }
 0x217   : > { %5445 = vmatprep.subr.bf16.mxu1 %v9560_v56  ;;  %v955_v56 = vld [vmem:[%s11337_s14 + $0x1168] sm:$0xff] }
 0x218   : > { %5405 = vmatpush1.bf16.msra.mxu0 %v9431_v63  ;;  %v1079_v57 = vld [vmem:[%s11337_s14 + $0x1548] sm:$0xff]  ;;  %v9616_v63 = vcombine.high %v951_v53, %v955_v56  ;;  %v9615_v6 = vcombine.low %v951_v53, %v955_v56 }
 0x219   : > { %5406 = vmatprep.subr.bf16.mxu0 %v9440_v1  ;;  %v1083_v58 = vld [vmem:[%s11337_s14 + $0x1568] sm:$0xff] }
 0x21a   : > { %5446 = vmatpush1.bf16.msra.mxu1 %v9559_v0  ;;  %v9744_v0 = vcombine.high %v1079_v57, %v1083_v58  ;;  %v959_v1 = vld [vmem:[%s11337_s14 + $0x1188] sm:$0xff]  ;;  %v9743_v7 = vcombine.low %v1079_v57, %v1083_v58 }
 0x21b   : > { %5447 = vmatprep.subr.bf16.mxu1 %v9568_v2  ;;  %v963_v2 = vld [vmem:[%s11337_s14 + $0x11a8] sm:$0xff] }
 0x21c   : > { %5407 = vmatpush1.bf16.msra.mxu0 %v9439_v9  ;;  %v1087_v3 = vld [vmem:[%s11337_s14 + $0x1588] sm:$0xff]  ;;  %v9624_v9 = vcombine.high %v959_v1, %v963_v2  ;;  %v9623_v24 = vcombine.low %v959_v1, %v963_v2 }
 0x21d   : > { %5458 = vmatprep.subr.bf16.mxu0 %v9576_v11  ;;  %v1091_v4 = vld [vmem:[%s11337_s14 + $0x15a8] sm:$0xff] }
 0x21e   : > { %5448 = vmatpush1.bf16.msra.mxu1 %v9567_v10  ;;  %v9752_v11 = vcombine.high %v1087_v3, %v1091_v4  ;;  %v971_v13 = vld [vmem:[%s11337_s14 + $0x11e8] sm:$0xff] }
 0x21f   : > { %5499 = vmatprep.subr.bf16.mxu1 %v9704_v12  ;;  %5409 = vmatmul.mubr.bf16.vlgmr.msra.gmra.mrb[16].mxu0 %v11541_v37  ;;  %v967_v12 = vld [vmem:[%s11337_s14 + $0x11c8] sm:$0xff] }
 0x220   : > { %5459 = vmatpush1.bf16.msra.mxu0 %v9575_v43  ;;  %5490 = vmatprep.mubr.bf16.mxu0 %v11559_v48  ;;  %v1095_v43 = vld [vmem:[%s11337_s14 + $0x15c8] sm:$0xff] }
 0x221   : > { %5450 = vmatmul.mubr.bf16.vlgmr.msra.gmra.mrb[16].mxu1 %v11550_v41  ;;  %5460 = vmatprep.subr.bf16.mxu0 %v9584_v18  ;;  %v975_v31 = vld [vmem:[%s11337_s14 + $0x1208] sm:$0xff] }
 0x222   : > { %5500 = vmatpush1.bf16.msra.mxu1 %v9703_v16  ;;  %5531 = vmatprep.mubr.bf16.mxu1 %v11566_v50  ;;  %v1099_v16 = vld [vmem:[%s11337_s14 + $0x15e8] sm:$0xff] }
 0x223   : > { %5501 = vmatprep.subr.bf16.mxu1 %v9712_v19  ;;  %v979_v32 = vld [vmem:[%s11337_s14 + $0x1228] sm:$0xff] }
 0x224   : > { %5461 = vmatpush1.bf16.msra.mxu0 %v9583_v26  ;;  %v1103_v33 = vld [vmem:[%s11337_s14 + $0x1608] sm:$0xff] }
 0x225   : > { %5462 = vmatprep.subr.bf16.mxu0 %v9592_v55  ;;  %v1107_v35 = vld [vmem:[%s11337_s14 + $0x1628] sm:$0xff] }
 0x226   : > { %5502 = vmatpush1.bf16.msra.mxu1 %v9711_v27  ;;  %v9632_v27 = vcombine.high %v967_v12, %v971_v13  ;;  %v983_v45 = vld [vmem:[%s11337_s14 + $0x1248] sm:$0xff] }
 0x227   : > { %5503 = vmatprep.subr.bf16.mxu1 %v9720_v29  ;;  %v9760_v29 = vcombine.high %v1095_v43, %v1099_v16  ;;  %v987_v20 = vld [vmem:[%s11337_s14 + $0x1268] sm:$0xff] }
 0x228   : > { %5463 = vmatpush1.bf16.msra.mxu0 %v9591_v36  ;;  %v9631_v36 = vcombine.low %v967_v12, %v971_v13  ;;  %v1111_v46 = vld [vmem:[%s11337_s14 + $0x1648] sm:$0xff] }
 0x229   : > { %5464 = vmatprep.subr.bf16.mxu0 %v9600_v42  ;;  %v9640_v42 = vcombine.high %v975_v31, %v979_v32  ;;  %v1115_v47 = vld [vmem:[%s11337_s14 + $0x1668] sm:$0xff] }
 0x22a   : > { %5504 = vmatpush1.bf16.msra.mxu1 %v9719_v38  ;;  %v9759_v38 = vcombine.low %v1095_v43, %v1099_v16  ;;  %v991_v53 = vld [vmem:[%s11337_s14 + $0x1288] sm:$0xff] }
 0x22b   : > { %5505 = vmatprep.subr.bf16.mxu1 %v9728_v44  ;;  %v9768_v44 = vcombine.high %v1103_v33, %v1107_v35  ;;  %v995_v56 = vld [vmem:[%s11337_s14 + $0x12a8] sm:$0xff] }
 0x22c   : > { %5465 = vmatpush1.bf16.msra.mxu0 %v9599_v23  ;;  %v9639_v23 = vcombine.low %v975_v31, %v979_v32  ;;  %v1119_v57 = vld [vmem:[%s11337_s14 + $0x1688] sm:$0xff] }
 0x22d   : > { %5466 = vmatprep.subr.bf16.mxu0 %v9608_v51  ;;  %v9648_v51 = vcombine.high %v983_v45, %v987_v20  ;;  %v1123_v58 = vld [vmem:[%s11337_s14 + $0x16a8] sm:$0xff] }
 0x22e   : > { %5506 = vmatpush1.bf16.msra.mxu1 %v9727_v49  ;;  %v9767_v49 = vcombine.low %v1103_v33, %v1107_v35  ;;  %v999_v1 = vld [vmem:[%s11337_s14 + $0x12c8] sm:$0xff] }
 0x22f   : > { %5507 = vmatprep.subr.bf16.mxu1 %v9736_v52  ;;  %v9776_v52 = vcombine.high %v1111_v46, %v1115_v47  ;;  %v1003_v2 = vld [vmem:[%s11337_s14 + $0x12e8] sm:$0xff] }
 0x230   : > { %5467 = vmatpush1.bf16.msra.mxu0 %v9607_v61  ;;  %v9647_v61 = vcombine.low %v983_v45, %v987_v20  ;;  %v1011_v12 = vld [vmem:[%s11337_s14 + $0x1328] sm:$0xff] }
 0x231   : > { %5468 = vmatprep.subr.bf16.mxu0 %v9616_v63  ;;  %v5164_v10 = vpop.f32.mrb[4].mxu0  ;;  %v9656_v63 = vcombine.high %v991_v53, %v995_v56  ;;  %v1135_v13 = vld [vmem:[%s11337_s14 + $0x1708] sm:$0xff] }
 0x232   : > { %5508 = vmatpush1.bf16.msra.mxu1 %v9735_v62  ;;  %v5165_v40 = vadd.f32 %v5164_v10, %v11735_v34  ;;  %v5166_v15 = vpop.f32.mrb[5].mxu0  ;;  %v9751_v34 = vcombine.low %v1087_v3, %v1091_v4  ;;  %v9775_v62 = vcombine.low %v1111_v46, %v1115_v47  ;;  %v1127_v3 = vld [vmem:[%s11337_s14 + $0x16c8] sm:$0xff] }
 0x233   : > { %5509 = vmatprep.subr.bf16.mxu1 %v9744_v0  ;;  %v5205_v14 = vpop.f32.mrb[4].mxu1  ;;  %v5167_v18 = vadd.f32 %v5166_v15, %v11737_v39  ;;  %v5168_v22 = vpop.f32.mrb[6].mxu0  ;;  %v9784_v0 = vcombine.high %v1119_v57, %v1123_v58  ;;  %v1131_v4 = vld [vmem:[%s11337_s14 + $0x16e8] sm:$0xff] }
 0x234   : > { %v5207_v19 = vpop.f32.mrb[5].mxu1  ;;  %5469 = vmatpush1.bf16.msra.mxu0 %v9615_v6  ;;  %v11809_v25 = vadd.f32 %v5205_v14, %v5165_v40  ;;  %v5169_v26 = vpop.f32.mrb[7].mxu0  ;;  %v9655_v6 = vcombine.low %v991_v53, %v995_v56  ;;  %v9792_v10 = vcombine.high %v1127_v3, %v1131_v4  ;;  %v1139_v40 = vld [vmem:[%s11337_s14 + $0x1728] sm:$0xff]  ;;  %v9663_v14 = vcombine.low %v999_v1, %v1003_v2  ;;  %v528_v53 = vld [vmem:[%s11337_s14 + $0x410] sm:$0xff] }
 0x235   : > { %v5209_v54 = vpop.f32.mrb[6].mxu1  ;;  %5470 = vmatprep.subr.bf16.mxu0 %v9624_v9  ;;  %v11811_v55 = vadd.f32 %v5207_v19, %v5167_v18  ;;  %v9664_v9 = vcombine.high %v999_v1, %v1003_v2  ;;  %v9791_v15 = vcombine.low %v1127_v3, %v1131_v4  ;;  %v9800_v16 = vcombine.high %v1135_v13, %v1139_v40  ;;  %v1015_v18 = vld [vmem:[%s11337_s14 + $0x1348] sm:$0xff]  ;;  %v532_v56 = vld [vmem:[%s11337_s14 + $0x430] sm:$0xff] }
 0x236   : > { %5510 = vmatpush1.bf16.msra.mxu1 %v9743_v7  ;;  %v5210_v39 = vpop.f32.mrb[7].mxu1  ;;  %v9783_v7 = vcombine.low %v1119_v57, %v1123_v58  ;;  %v1019_v19 = vld [vmem:[%s11337_s14 + $0x1368] sm:$0xff]  ;;  %v9799_v26 = vcombine.low %v1135_v13, %v1139_v40  ;;  %v536_v1 = vld [vmem:[%s11337_s14 + $0x450] sm:$0xff]  ;;  %v9193_v4 = vcombine.low %v528_v53, %v532_v56 }
 0x237   : > { %5511 = vmatprep.subr.bf16.mxu1 %v9752_v11  ;;  %v1007_v11 = vld [vmem:[%s11337_s14 + $0x1308] sm:$0xff]  ;;  %v9679_v33 = vcombine.low %v1015_v18, %v1019_v19  ;;  %v540_v2 = vld [vmem:[%s11337_s14 + $0x470] sm:$0xff] }
 0x238   : > { %5471 = vmatpush1.bf16.msra.mxu0 %v9623_v24  ;;  %v9672_v43 = vcombine.high %v1007_v11, %v1011_v12  ;;  %v1143_v22 = vld [vmem:[%s11337_s14 + $0x1748] sm:$0xff]  ;;  %v9671_v54 = vcombine.low %v1007_v11, %v1011_v12  ;;  %v544_v11 = vld [vmem:[%s11337_s14 + $0x490] sm:$0xff]  ;;  %v9201_v40 = vcombine.low %v536_v1, %v540_v2 }
 0x239   : > { %5472 = vmatprep.subr.bf16.mxu0 %v9632_v27  ;;  %v1147_v24 = vld [vmem:[%s11337_s14 + $0x1768] sm:$0xff]  ;;  %v548_v12 = vld [vmem:[%s11337_s14 + $0x4b0] sm:$0xff] }
 0x23a   : > { %5512 = vmatpush1.bf16.msra.mxu1 %v9751_v34  ;;  %v9680_v34 = vcombine.high %v1015_v18, %v1019_v19  ;;  %v9808_v27 = vcombine.high %v1143_v22, %v1147_v24  ;;  %v1023_v39 = vld [vmem:[%s11337_s14 + $0x1388] sm:$0xff]  ;;  %v9807_v35 = vcombine.low %v1143_v22, %v1147_v24  ;;  %v552_v18 = vld [vmem:[%s11337_s14 + $0x4d0] sm:$0xff]  ;;  %v9209_v24 = vcombine.low %v544_v11, %v548_v12 }
 0x23b   : > { %5513 = vmatprep.subr.bf16.mxu1 %v9760_v29  ;;  %v1027_v29 = vld [vmem:[%s11337_s14 + $0x13a8] sm:$0xff]  ;;  %v556_v19 = vld [vmem:[%s11337_s14 + $0x4f0] sm:$0xff] }
 0x23c   : > { %5473 = vmatpush1.bf16.msra.mxu0 %v9631_v36  ;;  %v1151_v31 = vld [vmem:[%s11337_s14 + $0x1788] sm:$0xff]  ;;  %v9688_v36 = vcombine.high %v1023_v39, %v1027_v29  ;;  %v9687_v46 = vcombine.low %v1023_v39, %v1027_v29  ;;  %v560_v39 = vld [vmem:[%s11337_s14 + $0x510] sm:$0xff] }
 0x23d   : > { %5474 = vmatprep.subr.bf16.mxu0 %v9640_v42  ;;  %v1155_v32 = vld [vmem:[%s11337_s14 + $0x17a8] sm:$0xff]  ;;  %v564_v29 = vld [vmem:[%s11337_s14 + $0x530] sm:$0xff] }
 0x23e   : > { %5514 = vmatpush1.bf16.msra.mxu1 %v9759_v38  ;;  %v9816_v38 = vcombine.high %v1151_v31, %v1155_v32  ;;  %v1031_v42 = vld [vmem:[%s11337_s14 + $0x13c8] sm:$0xff]  ;;  %v9815_v47 = vcombine.low %v1151_v31, %v1155_v32  ;;  %v9217_v32 = vcombine.low %v552_v18, %v556_v19 }
 0x23f   : > { %5515 = vmatprep.subr.bf16.mxu1 %v9768_v44  ;;  %v1035_v44 = vld [vmem:[%s11337_s14 + $0x13e8] sm:$0xff] }
 0x240   : > { %5475 = vmatpush1.bf16.msra.mxu0 %v9639_v23  ;;  %v1159_v45 = vld [vmem:[%s11337_s14 + $0x17c8] sm:$0xff]  ;;  %v9696_v23 = vcombine.high %v1031_v42, %v1035_v44  ;;  %v9695_v57 = vcombine.low %v1031_v42, %v1035_v44  ;;  %v568_v42 = vld [vmem:[%s11337_s14 + $0x550] sm:$0xff] }
 0x241   : > { %5476 = vmatprep.subr.bf16.mxu0 %v9648_v51  ;;  %v1163_v20 = vld [vmem:[%s11337_s14 + $0x17e8] sm:$0xff]  ;;  %v400_v51 = vld [vmem:[%s11337_s14 + $0x10] sm:$0xff] }
 0x242   : > { %5516 = vmatpush1.bf16.msra.mxu1 %v9767_v49  ;;  %v9824_v49 = vcombine.high %v1159_v45, %v1163_v20  ;;  %v9823_v58 = vcombine.low %v1159_v45, %v1163_v20  ;;  %v572_v44 = vld [vmem:[%s11337_s14 + $0x570] sm:$0xff]  ;;  %v9225_v20 = vcombine.low %v560_v39, %v564_v29 }
 0x243   : > { %5517 = vmatprep.subr.bf16.mxu1 %v9776_v52  ;;  %v404_v52 = vld [vmem:[%s11337_s14 + $0x30] sm:$0xff] }
 0x244   : > { %5477 = vmatpush1.bf16.msra.mxu0 %v9647_v61  ;;  %v9066_v61 = vcombine.high %v400_v51, %v404_v52  ;;  %v9065_v3 = vcombine.low %v400_v51, %v404_v52  ;;  %v576_v51 = vld [vmem:[%s11337_s14 + $0x590] sm:$0xff] }
 0x245   : > { %5478 = vmatprep.subr.bf16.mxu0 %v9656_v63  ;;  %v408_v63 = vld [vmem:[%s11337_s14 + $0x50] sm:$0xff] }
 0x246   : > { %5518 = vmatpush1.bf16.msra.mxu1 %v9775_v62  ;;  %v9194_v62 = vcombine.high %v528_v53, %v532_v56  ;;  %v580_v52 = vld [vmem:[%s11337_s14 + $0x5b0] sm:$0xff]  ;;  %v9233_v56 = vcombine.low %v568_v42, %v572_v44 }
 0x247   : > { %5519 = vmatprep.subr.bf16.mxu1 %v9784_v0  ;;  %v412_v0 = vld [vmem:[%s11337_s14 + $0x70] sm:$0xff] }
 0x248   : > { %5479 = vmatpush1.bf16.msra.mxu0 %v9655_v6  ;;  %v9074_v6 = vcombine.high %v408_v63, %v412_v0  ;;  %v9073_v13 = vcombine.low %v408_v63, %v412_v0  ;;  %v460_v63 = vld [vmem:[%s11337_s14 + $0x1f0] sm:$0xff] }
 0x249   : > { %5480 = vmatprep.subr.bf16.mxu0 %v9664_v9  ;;  %v416_v9 = vld [vmem:[%s11337_s14 + $0x90] sm:$0xff] }
 0x24a   : > { %5520 = vmatpush1.bf16.msra.mxu1 %v9783_v7  ;;  %v9202_v7 = vcombine.high %v536_v1, %v540_v2 }
 0x24b   : > { %5521 = vmatprep.subr.bf16.mxu1 %v9792_v10  ;;  %v420_v10 = vld [vmem:[%s11337_s14 + $0xb0] sm:$0xff] }
 0x24c   : > { %5481 = vmatpush1.bf16.msra.mxu0 %v9663_v14  ;;  %v9082_v14 = vcombine.high %v416_v9, %v420_v10  ;;  %v9081_v22 = vcombine.low %v416_v9, %v420_v10 }
 0x24d   : > { %5482 = vmatprep.subr.bf16.mxu0 %v9672_v43  ;;  %v424_v43 = vld [vmem:[%s11337_s14 + $0xd0] sm:$0xff] }
 0x24e   : > { %5522 = vmatpush1.bf16.msra.mxu1 %v9791_v15  ;;  %v9210_v15 = vcombine.high %v544_v11, %v548_v12 }
 0x24f   : > { %5523 = vmatprep.subr.bf16.mxu1 %v9800_v16  ;;  %v428_v16 = vld [vmem:[%s11337_s14 + $0xf0] sm:$0xff] }
 0x250   : > { %5483 = vmatpush1.bf16.msra.mxu0 %v9671_v54  ;;  %v9090_v54 = vcombine.high %v424_v43, %v428_v16  ;;  %v9089_v31 = vcombine.low %v424_v43, %v428_v16 }
 0x251   : > { %5484 = vmatprep.subr.bf16.mxu0 %v9680_v34  ;;  %v432_v34 = vld [vmem:[%s11337_s14 + $0x110] sm:$0xff] }
 0x252   : > { %5524 = vmatpush1.bf16.msra.mxu1 %v9799_v26  ;;  %v9218_v26 = vcombine.high %v552_v18, %v556_v19  ;;  %v464_v18 = vld [vmem:[%s11337_s14 + $0x210] sm:$0xff] }
 0x253   : > { %5525 = vmatprep.subr.bf16.mxu1 %v9808_v27  ;;  %v436_v27 = vld [vmem:[%s11337_s14 + $0x130] sm:$0xff] }
 0x254   : > { %5485 = vmatpush1.bf16.msra.mxu0 %v9679_v33  ;;  %v9098_v33 = vcombine.high %v432_v34, %v436_v27  ;;  %v9097_v45 = vcombine.low %v432_v34, %v436_v27  ;;  %v468_v19 = vld [vmem:[%s11337_s14 + $0x230] sm:$0xff] }
 0x255   : > { %5486 = vmatprep.subr.bf16.mxu0 %v9688_v36  ;;  %v440_v36 = vld [vmem:[%s11337_s14 + $0x150] sm:$0xff] }
 0x256   : > { %5526 = vmatpush1.bf16.msra.mxu1 %v9807_v35  ;;  %v9226_v35 = vcombine.high %v560_v39, %v564_v29  ;;  %v9130_v39 = vcombine.high %v464_v18, %v468_v19 }
 0x257   : > { %5527 = vmatprep.subr.bf16.mxu1 %v9816_v38  ;;  %v444_v38 = vld [vmem:[%s11337_s14 + $0x170] sm:$0xff] }
 0x258   : > { %5487 = vmatpush1.bf16.msra.mxu0 %v9687_v46  ;;  %v9106_v46 = vcombine.high %v440_v36, %v444_v38  ;;  %v9105_v53 = vcombine.low %v440_v36, %v444_v38  ;;  %v9129_v36 = vcombine.low %v464_v18, %v468_v19  ;;  %v640_v18 = vld [vmem:[%s11337_s14 + $0x790] sm:$0xff] }
 0x259   : > { %5488 = vmatprep.subr.bf16.mxu0 %v9696_v23  ;;  %v448_v23 = vld [vmem:[%s11337_s14 + $0x190] sm:$0xff] }
 0x25a   : > { %5528 = vmatpush1.bf16.msra.mxu1 %v9815_v47  ;;  %v9234_v47 = vcombine.high %v568_v42, %v572_v44  ;;  %v644_v19 = vld [vmem:[%s11337_s14 + $0x7b0] sm:$0xff] }
 0x25b   : > { %5529 = vmatprep.subr.bf16.mxu1 %v9824_v49  ;;  %v452_v49 = vld [vmem:[%s11337_s14 + $0x1b0] sm:$0xff] }
 0x25c   : > { %5489 = vmatpush1.bf16.msra.mxu0 %v9695_v57  ;;  %v9114_v57 = vcombine.high %v448_v23, %v452_v49  ;;  %v9113_v11 = vcombine.low %v448_v23, %v452_v49 }
 0x25d   : > { %5540 = vmatprep.subr.bf16.mxu0 %v9066_v61  ;;  %v9242_v61 = vcombine.high %v576_v51, %v580_v52 }
 0x25e   : > { %5530 = vmatpush1.bf16.msra.mxu1 %v9823_v58 }
 0x25f   : > { %5581 = vmatprep.subr.bf16.mxu1 %v9194_v62  ;;  %5491 = vmatmul.mubr.bf16.vlgmr.msra.gmra.mrb[20].mxu0 %v11631_v5  ;;  %v456_v62 = vld [vmem:[%s11337_s14 + $0x1d0] sm:$0xff] }
 0x260   : > { %5541 = vmatpush1.bf16.msra.mxu0 %v9065_v3  ;;  %5572 = vmatprep.mubr.bf16.mxu0 %v11401_v59  ;;  %v584_v3 = vld [vmem:[%s11337_s14 + $0x5d0] sm:$0xff]  ;;  %v9121_v34 = vcombine.low %v456_v62, %v460_v63 }
 0x261   : > { %5532 = vmatmul.mubr.bf16.vlgmr.msra.gmra.mrb[20].mxu1 %v11637_v8  ;;  %5542 = vmatprep.subr.bf16.mxu0 %v9074_v6  ;;  %v390_v6 = vld [vmem:[#allocation2] sm:$0xff] }
 0x262   : > { %5582 = vmatpush1.bf16.msra.mxu1 %v9193_v4  ;;  %5613 = vmatprep.mubr.bf16.mxu1 %v11405_v60  ;;  %v588_v4 = vld [vmem:[%s11337_s14 + $0x5f0] sm:$0xff] }
 0x263   : > { %5583 = vmatprep.subr.bf16.mxu1 %v9202_v7  ;;  %v9249_v27 = vcombine.low %v584_v3, %v588_v4 }
 0x264   : > { %5543 = vmatpush1.bf16.msra.mxu0 %v9073_v13  ;;  %v391_v13 = vld [vmem:[#allocation2 + $0x8] sm:$0xff] }
 0x265   : > { %5544 = vmatprep.subr.bf16.mxu0 %v9082_v14  ;;  %v9241_v14 = vcombine.low %v576_v51, %v580_v52 }
 0x266   : > { %5584 = vmatpush1.bf16.msra.mxu1 %v9201_v40 }
 0x267   : > { %5585 = vmatprep.subr.bf16.mxu1 %v9210_v15  ;;  %v9122_v15 = vcombine.high %v456_v62, %v460_v63 }
 0x268   : > { %5545 = vmatpush1.bf16.msra.mxu0 %v9081_v22 }
 0x269   : > { %5546 = vmatprep.subr.bf16.mxu0 %v9090_v54  ;;  %v596_v54 = vld [vmem:[%s11337_s14 + $0x630] sm:$0xff] }
 0x26a   : > { %5586 = vmatpush1.bf16.msra.mxu1 %v9209_v24  ;;  %v592_v24 = vld [vmem:[%s11337_s14 + $0x610] sm:$0xff] }
 0x26b   : > { %5587 = vmatprep.subr.bf16.mxu1 %v9218_v26  ;;  %v9258_v29 = vcombine.high %v592_v24, %v596_v54  ;;  %v9257_v38 = vcombine.low %v592_v24, %v596_v54 }
 0x26c   : > { %5547 = vmatpush1.bf16.msra.mxu0 %v9089_v31  ;;  %v472_v31 = vld [vmem:[%s11337_s14 + $0x250] sm:$0xff] }
 0x26d   : > { %5548 = vmatprep.subr.bf16.mxu0 %v9098_v33  ;;  %v600_v33 = vld [vmem:[%s11337_s14 + $0x650] sm:$0xff] }
 0x26e   : > { %5588 = vmatpush1.bf16.msra.mxu1 %v9217_v32  ;;  %v476_v32 = vld [vmem:[%s11337_s14 + $0x270] sm:$0xff] }
 0x26f   : > { %5589 = vmatprep.subr.bf16.mxu1 %v9226_v35  ;;  %v604_v35 = vld [vmem:[%s11337_s14 + $0x670] sm:$0xff]  ;;  %v9138_v42 = vcombine.high %v472_v31, %v476_v32  ;;  %v9137_v23 = vcombine.low %v472_v31, %v476_v32  ;;  %v9305_v32 = vcombine.low %v640_v18, %v644_v19 }
 0x270   : > { %5549 = vmatpush1.bf16.msra.mxu0 %v9097_v45  ;;  %v9266_v44 = vcombine.high %v600_v33, %v604_v35  ;;  %v480_v45 = vld [vmem:[%s11337_s14 + $0x290] sm:$0xff]  ;;  %v9265_v49 = vcombine.low %v600_v33, %v604_v35 }
 0x271   : > { %5550 = vmatprep.subr.bf16.mxu0 %v9106_v46  ;;  %v608_v46 = vld [vmem:[%s11337_s14 + $0x690] sm:$0xff] }
 0x272   : > { %5590 = vmatpush1.bf16.msra.mxu1 %v9225_v20  ;;  %v5246_v58 = vpop.f32.mrb[8].mxu0  ;;  %v484_v20 = vld [vmem:[%s11337_s14 + $0x2b0] sm:$0xff] }
 0x273   : > { %5591 = vmatprep.subr.bf16.mxu1 %v9234_v47  ;;  %v5247_v0 = vadd.f32 %v5246_v58, %v11809_v25  ;;  %v5248_v2 = vpop.f32.mrb[9].mxu0  ;;  %v612_v47 = vld [vmem:[%s11337_s14 + $0x6b0] sm:$0xff]  ;;  %v9146_v51 = vcombine.high %v480_v45, %v484_v20 }
 0x274   : > { %v5287_v1 = vpop.f32.mrb[8].mxu1  ;;  %v5249_v7 = vadd.f32 %v5248_v2, %v11811_v55  ;;  %v5250_v10 = vpop.f32.mrb[10].mxu0  ;;  %5551 = vmatpush1.bf16.msra.mxu0 %v9105_v53  ;;  %v9250_v55 = vcombine.high %v584_v3, %v588_v4  ;;  %v9274_v52 = vcombine.high %v608_v46, %v612_v47  ;;  %v488_v53 = vld [vmem:[%s11337_s14 + $0x2d0] sm:$0xff]  ;;  %v9273_v62 = vcombine.low %v608_v46, %v612_v47 }
 0x275   : > { %v5289_v9 = vpop.f32.mrb[9].mxu1  ;;  %v5288_v12 = vadd.f32 %v5287_v1, %v5247_v0  ;;  %v5251_v25 = vpop.f32.mrb[11].mxu0  ;;  %5552 = vmatprep.subr.bf16.mxu0 %v9114_v57  ;;  %v616_v57 = vld [vmem:[%s11337_s14 + $0x6d0] sm:$0xff] }
 0x276   : > { %v5291_v40 = vpop.f32.mrb[10].mxu1  ;;  %5592 = vmatpush1.bf16.msra.mxu1 %v9233_v56  ;;  %v5290_v43 = vadd.f32 %v5289_v9, %v5249_v7  ;;  %v492_v56 = vld [vmem:[%s11337_s14 + $0x2f0] sm:$0xff] }
 0x277   : > { %v5292_v16 = vpop.f32.mrb[11].mxu1  ;;  %5593 = vmatprep.subr.bf16.mxu1 %v9242_v61  ;;  %v6032_v22 = vadd.f32 %v5288_v12, %v390_v6  ;;  %v620_v58 = vld [vmem:[%s11337_s14 + $0x6f0] sm:$0xff]  ;;  %v9145_v61 = vcombine.low %v480_v45, %v484_v20  ;;  %v9154_v63 = vcombine.high %v488_v53, %v492_v56  ;;  %v9153_v6 = vcombine.low %v488_v53, %v492_v56 }
 0x278   : > { %v6033_v26 = vadd.f32 %v5290_v43, %v391_v13  ;;  %5553 = vmatpush1.bf16.msra.mxu0 %v9113_v11  ;;  %v9282_v0 = vcombine.high %v616_v57, %v620_v58  ;;  %v496_v1 = vld [vmem:[%s11337_s14 + $0x310] sm:$0xff]  ;;  %v9281_v7 = vcombine.low %v616_v57, %v620_v58 }
 0x279   : > { %6040 = vst [vmem:[#allocation2] sm:$0xff] %v6032_v22  ;;  %5554 = vmatprep.subr.bf16.mxu0 %v9122_v15  ;;  %v500_v2 = vld [vmem:[%s11337_s14 + $0x330] sm:$0xff] }
 0x27a   : > { %5594 = vmatpush1.bf16.msra.mxu1 %v9241_v14  ;;  %6041 = vst [vmem:[#allocation2 + $0x8] sm:$0xff] %v6033_v26  ;;  %v624_v3 = vld [vmem:[%s11337_s14 + $0x710] sm:$0xff]  ;;  %v9162_v9 = vcombine.high %v496_v1, %v500_v2  ;;  %v9161_v25 = vcombine.low %v496_v1, %v500_v2  ;;  %v9306_v26 = vcombine.high %v640_v18, %v644_v19 }
 0x27b   : > { %5595 = vmatprep.subr.bf16.mxu1 %v9250_v55  ;;  %v628_v4 = vld [vmem:[%s11337_s14 + $0x730] sm:$0xff] }
 0x27c   : > { %5555 = vmatpush1.bf16.msra.mxu0 %v9121_v34  ;;  %v9290_v10 = vcombine.high %v624_v3, %v628_v4  ;;  %v504_v11 = vld [vmem:[%s11337_s14 + $0x350] sm:$0xff]  ;;  %v9289_v14 = vcombine.low %v624_v3, %v628_v4 }
 0x27d   : > { %5556 = vmatprep.subr.bf16.mxu0 %v9130_v39  ;;  %v508_v12 = vld [vmem:[%s11337_s14 + $0x370] sm:$0xff] }
 0x27e   : > { %5596 = vmatpush1.bf16.msra.mxu1 %v9249_v27  ;;  %v632_v13 = vld [vmem:[%s11337_s14 + $0x750] sm:$0xff]  ;;  %v9170_v15 = vcombine.high %v504_v11, %v508_v12  ;;  %v9169_v22 = vcombine.low %v504_v11, %v508_v12 }
 0x27f   : > { %5597 = vmatprep.subr.bf16.mxu1 %v9258_v29  ;;  %v636_v40 = vld [vmem:[%s11337_s14 + $0x770] sm:$0xff] }
 0x280   : > { %5557 = vmatpush1.bf16.msra.mxu0 %v9129_v36  ;;  %v9298_v43 = vcombine.high %v632_v13, %v636_v40  ;;  %v512_v16 = vld [vmem:[%s11337_s14 + $0x390] sm:$0xff]  ;;  %v9297_v24 = vcombine.low %v632_v13, %v636_v40 }
 0x281   : > { %5558 = vmatprep.subr.bf16.mxu0 %v9138_v42  ;;  %v516_v55 = vld [vmem:[%s11337_s14 + $0x3b0] sm:$0xff] }
 0x282   : > { %5598 = vmatpush1.bf16.msra.mxu1 %v9257_v38  ;;  %v9178_v54 = vcombine.high %v512_v16, %v516_v55  ;;  %v520_v34 = vld [vmem:[%s11337_s14 + $0x3d0] sm:$0xff]  ;;  %v9177_v31 = vcombine.low %v512_v16, %v516_v55 }
 0x283   : > { %5599 = vmatprep.subr.bf16.mxu1 %v9266_v44  ;;  %v524_v27 = vld [vmem:[%s11337_s14 + $0x3f0] sm:$0xff] }
 0x284   : > { %5559 = vmatpush1.bf16.msra.mxu0 %v9137_v23  ;;  %v648_v39 = vld [vmem:[%s11337_s14 + $0x7d0] sm:$0xff]  ;;  %v9186_v33 = vcombine.high %v520_v34, %v524_v27  ;;  %v9185_v45 = vcombine.low %v520_v34, %v524_v27 }
 0x285   : > { %5560 = vmatprep.subr.bf16.mxu0 %v9146_v51  ;;  %v652_v29 = vld [vmem:[%s11337_s14 + $0x7f0] sm:$0xff] }
 0x286   : > { %5600 = vmatpush1.bf16.msra.mxu1 %v9265_v49  ;;  %v9314_v35 = vcombine.high %v648_v39, %v652_v29  ;;  %v656_v36 = vld [vmem:[%s11337_s14 + $0x810] sm:$0xff]  ;;  %v9313_v20 = vcombine.low %v648_v39, %v652_v29 }
 0x287   : > { %5601 = vmatprep.subr.bf16.mxu1 %v9274_v52  ;;  %v660_v38 = vld [vmem:[%s11337_s14 + $0x830] sm:$0xff] }
 0x288   : > { %5561 = vmatpush1.bf16.msra.mxu0 %v9145_v61  ;;  %v784_v42 = vld [vmem:[%s11337_s14 + $0xc10] sm:$0xff]  ;;  %v9322_v46 = vcombine.high %v656_v36, %v660_v38  ;;  %v9321_v53 = vcombine.low %v656_v36, %v660_v38 }
 0x289   : > { %5562 = vmatprep.subr.bf16.mxu0 %v9154_v63  ;;  %v788_v44 = vld [vmem:[%s11337_s14 + $0xc30] sm:$0xff] }
 0x28a   : > { %5602 = vmatpush1.bf16.msra.mxu1 %v9273_v62  ;;  %v9450_v47 = vcombine.high %v784_v42, %v788_v44  ;;  %v664_v23 = vld [vmem:[%s11337_s14 + $0x850] sm:$0xff]  ;;  %v9449_v56 = vcombine.low %v784_v42, %v788_v44 }
 0x28b   : > { %5603 = vmatprep.subr.bf16.mxu1 %v9282_v0  ;;  %v668_v49 = vld [vmem:[%s11337_s14 + $0x870] sm:$0xff] }
 0x28c   : > { %5563 = vmatpush1.bf16.msra.mxu0 %v9153_v6  ;;  %v792_v51 = vld [vmem:[%s11337_s14 + $0xc50] sm:$0xff]  ;;  %v9330_v57 = vcombine.high %v664_v23, %v668_v49  ;;  %v9329_v1 = vcombine.low %v664_v23, %v668_v49 }
 0x28d   : > { %5564 = vmatprep.subr.bf16.mxu0 %v9162_v9  ;;  %v796_v52 = vld [vmem:[%s11337_s14 + $0xc70] sm:$0xff] }
 0x28e   : > { %5604 = vmatpush1.bf16.msra.mxu1 %v9281_v7  ;;  %v9458_v58 = vcombine.high %v792_v51, %v796_v52  ;;  %v672_v61 = vld [vmem:[%s11337_s14 + $0x890] sm:$0xff]  ;;  %v9457_v2 = vcombine.low %v792_v51, %v796_v52 }
 0x28f   : > { %5605 = vmatprep.subr.bf16.mxu1 %v9290_v10  ;;  %v676_v62 = vld [vmem:[%s11337_s14 + $0x8b0] sm:$0xff] }
 0x290   : > { %5565 = vmatpush1.bf16.msra.mxu0 %v9161_v25  ;;  %v800_v63 = vld [vmem:[%s11337_s14 + $0xc90] sm:$0xff]  ;;  %v9338_v3 = vcombine.high %v672_v61, %v676_v62  ;;  %v9337_v11 = vcombine.low %v672_v61, %v676_v62 }
 0x291   : > { %5566 = vmatprep.subr.bf16.mxu0 %v9170_v15  ;;  %v804_v0 = vld [vmem:[%s11337_s14 + $0xcb0] sm:$0xff] }
 0x292   : > { %5606 = vmatpush1.bf16.msra.mxu1 %v9289_v14  ;;  %v9466_v4 = vcombine.high %v800_v63, %v804_v0  ;;  %v680_v6 = vld [vmem:[%s11337_s14 + $0x8d0] sm:$0xff]  ;;  %v9465_v12 = vcombine.low %v800_v63, %v804_v0 }
 0x293   : > { %5607 = vmatprep.subr.bf16.mxu1 %v9298_v43  ;;  %v684_v7 = vld [vmem:[%s11337_s14 + $0x8f0] sm:$0xff] }
 0x294   : > { %5567 = vmatpush1.bf16.msra.mxu0 %v9169_v22  ;;  %v808_v9 = vld [vmem:[%s11337_s14 + $0xcd0] sm:$0xff]  ;;  %v9346_v13 = vcombine.high %v680_v6, %v684_v7  ;;  %v9345_v16 = vcombine.low %v680_v6, %v684_v7 }
 0x295   : > { %5568 = vmatprep.subr.bf16.mxu0 %v9178_v54  ;;  %v812_v10 = vld [vmem:[%s11337_s14 + $0xcf0] sm:$0xff] }
 0x296   : > { %5608 = vmatpush1.bf16.msra.mxu1 %v9297_v24  ;;  %v9474_v40 = vcombine.high %v808_v9, %v812_v10  ;;  %v688_v25 = vld [vmem:[%s11337_s14 + $0x910] sm:$0xff]  ;;  %v9473_v55 = vcombine.low %v808_v9, %v812_v10 }
 0x297   : > { %5609 = vmatprep.subr.bf16.mxu1 %v9306_v26  ;;  %v692_v14 = vld [vmem:[%s11337_s14 + $0x930] sm:$0xff] }
 0x298   : > { %5569 = vmatpush1.bf16.msra.mxu0 %v9177_v31  ;;  %v816_v15 = vld [vmem:[%s11337_s14 + $0xd10] sm:$0xff]  ;;  %v9354_v18 = vcombine.high %v688_v25, %v692_v14  ;;  %v9353_v34 = vcombine.low %v688_v25, %v692_v14 }
 0x299   : > { %5570 = vmatprep.subr.bf16.mxu0 %v9186_v33  ;;  %v820_v43 = vld [vmem:[%s11337_s14 + $0xd30] sm:$0xff] }
 0x29a   : > { %5610 = vmatpush1.bf16.msra.mxu1 %v9305_v32  ;;  %v9482_v19 = vcombine.high %v816_v15, %v820_v43  ;;  %v696_v22 = vld [vmem:[%s11337_s14 + $0x950] sm:$0xff]  ;;  %v9481_v27 = vcombine.low %v816_v15, %v820_v43 }
 0x29b   : > { %5611 = vmatprep.subr.bf16.mxu1 %v9314_v35  ;;  %v700_v24 = vld [vmem:[%s11337_s14 + $0x970] sm:$0xff] }
 0x29c   : > { %5571 = vmatpush1.bf16.msra.mxu0 %v9185_v45  ;;  %v824_v54 = vld [vmem:[%s11337_s14 + $0xd50] sm:$0xff]  ;;  %v9362_v39 = vcombine.high %v696_v22, %v700_v24  ;;  %v9361_v36 = vcombine.low %v696_v22, %v700_v24 }
 0x29d   : > { %5622 = vmatprep.subr.bf16.mxu0 %v9322_v46  ;;  %v828_v26 = vld [vmem:[%s11337_s14 + $0xd70] sm:$0xff] }
 0x29e   : > { %5612 = vmatpush1.bf16.msra.mxu1 %v9313_v20  ;;  %v9490_v29 = vcombine.high %v824_v54, %v828_v26  ;;  %v704_v31 = vld [vmem:[%s11337_s14 + $0x990] sm:$0xff]  ;;  %v9489_v38 = vcombine.low %v824_v54, %v828_v26 }
 0x29f   : > { %5663 = vmatprep.subr.bf16.mxu1 %v9450_v47  ;;  %5573 = vmatmul.mubr.bf16.vlgmr.msra.gmra.mrb[24].mxu0 %v11451_v17  ;;  %v708_v32 = vld [vmem:[%s11337_s14 + $0x9b0] sm:$0xff] }
 0x2a0   : > { %5623 = vmatpush1.bf16.msra.mxu0 %v9321_v53  ;;  %5654 = vmatprep.mubr.bf16.mxu0 %v11469_v28  ;;  %v832_v33 = vld [vmem:[%s11337_s14 + $0xd90] sm:$0xff]  ;;  %v9370_v42 = vcombine.high %v704_v31, %v708_v32 }
 0x2a1   : > { %5614 = vmatmul.mubr.bf16.vlgmr.msra.gmra.mrb[24].mxu1 %v11460_v21  ;;  %5624 = vmatprep.subr.bf16.mxu0 %v9330_v57  ;;  %v836_v35 = vld [vmem:[%s11337_s14 + $0xdb0] sm:$0xff]  ;;  %v9369_v57 = vcombine.low %v704_v31, %v708_v32 }
 0x2a2   : > { %5664 = vmatpush1.bf16.msra.mxu1 %v9449_v56  ;;  %5695 = vmatprep.mubr.bf16.mxu1 %v11476_v30  ;;  %v9498_v45 = vcombine.high %v832_v33, %v836_v35  ;;  %v712_v20 = vld [vmem:[%s11337_s14 + $0x9d0] sm:$0xff]  ;;  %v9497_v63 = vcombine.low %v832_v33, %v836_v35 }
 0x2a3   : > { %5665 = vmatprep.subr.bf16.mxu1 %v9458_v58  ;;  %v716_v46 = vld [vmem:[%s11337_s14 + $0x9f0] sm:$0xff] }
 0x2a4   : > { %5625 = vmatpush1.bf16.msra.mxu0 %v9329_v1  ;;  %v840_v49 = vld [vmem:[%s11337_s14 + $0xdd0] sm:$0xff]  ;;  %v9378_v0 = vcombine.high %v712_v20, %v716_v46  ;;  %v9377_v9 = vcombine.low %v712_v20, %v716_v46 }
 0x2a5   : > { %5626 = vmatprep.subr.bf16.mxu0 %v9338_v3  ;;  %v844_v51 = vld [vmem:[%s11337_s14 + $0xdf0] sm:$0xff] }
 0x2a6   : > { %5666 = vmatpush1.bf16.msra.mxu1 %v9457_v2  ;;  %v9506_v2 = vcombine.high %v840_v49, %v844_v51  ;;  %v720_v3 = vld [vmem:[%s11337_s14 + $0xa10] sm:$0xff]  ;;  %v9505_v10 = vcombine.low %v840_v49, %v844_v51 }
 0x2a7   : > { %5667 = vmatprep.subr.bf16.mxu1 %v9466_v4  ;;  %v724_v4 = vld [vmem:[%s11337_s14 + $0xa30] sm:$0xff] }
 0x2a8   : > { %5627 = vmatpush1.bf16.msra.mxu0 %v9337_v11  ;;  %v848_v6 = vld [vmem:[%s11337_s14 + $0xe10] sm:$0xff]  ;;  %v9386_v11 = vcombine.high %v720_v3, %v724_v4  ;;  %v9385_v15 = vcombine.low %v720_v3, %v724_v4 }
 0x2a9   : > { %5628 = vmatprep.subr.bf16.mxu0 %v9346_v13  ;;  %v852_v7 = vld [vmem:[%s11337_s14 + $0xe30] sm:$0xff] }
 0x2aa   : > { %5668 = vmatpush1.bf16.msra.mxu1 %v9465_v12  ;;  %v9514_v12 = vcombine.high %v848_v6, %v852_v7  ;;  %v728_v13 = vld [vmem:[%s11337_s14 + $0xa50] sm:$0xff]  ;;  %v9513_v43 = vcombine.low %v848_v6, %v852_v7 }
 0x2ab   : > { %5669 = vmatprep.subr.bf16.mxu1 %v9474_v40  ;;  %v732_v40 = vld [vmem:[%s11337_s14 + $0xa70] sm:$0xff] }
 0x2ac   : > { %5629 = vmatpush1.bf16.msra.mxu0 %v9345_v16  ;;  %v856_v25 = vld [vmem:[%s11337_s14 + $0xe50] sm:$0xff]  ;;  %v9394_v16 = vcombine.high %v728_v13, %v732_v40  ;;  %v9393_v54 = vcombine.low %v728_v13, %v732_v40 }
 0x2ad   : > { %5630 = vmatprep.subr.bf16.mxu0 %v9354_v18  ;;  %v860_v14 = vld [vmem:[%s11337_s14 + $0xe70] sm:$0xff] }
 0x2ae   : > { %5670 = vmatpush1.bf16.msra.mxu1 %v9473_v55  ;;  %v9522_v55 = vcombine.high %v856_v25, %v860_v14  ;;  %v736_v18 = vld [vmem:[%s11337_s14 + $0xa90] sm:$0xff]  ;;  %v9521_v26 = vcombine.low %v856_v25, %v860_v14 }
 0x2af   : > { %5671 = vmatprep.subr.bf16.mxu1 %v9482_v19  ;;  %v740_v19 = vld [vmem:[%s11337_s14 + $0xab0] sm:$0xff] }
 0x2b0   : > { %5631 = vmatpush1.bf16.msra.mxu0 %v9353_v34  ;;  %v864_v22 = vld [vmem:[%s11337_s14 + $0xe90] sm:$0xff]  ;;  %v9402_v34 = vcombine.high %v736_v18, %v740_v19  ;;  %v9401_v33 = vcombine.low %v736_v18, %v740_v19 }
 0x2b1   : > { %5632 = vmatprep.subr.bf16.mxu0 %v9362_v39  ;;  %v868_v24 = vld [vmem:[%s11337_s14 + $0xeb0] sm:$0xff] }
 0x2b2   : > { %5672 = vmatpush1.bf16.msra.mxu1 %v9481_v27  ;;  %v5328_v44 = vpop.f32.mrb[12].mxu0  ;;  %v9530_v27 = vcombine.high %v864_v22, %v868_v24  ;;  %v744_v39 = vld [vmem:[%s11337_s14 + $0xad0] sm:$0xff]  ;;  %v9529_v35 = vcombine.low %v864_v22, %v868_v24 }
 0x2b3   : > { %5673 = vmatprep.subr.bf16.mxu1 %v9490_v29  ;;  %v5330_v23 = vpop.f32.mrb[13].mxu0  ;;  %v748_v29 = vld [vmem:[%s11337_s14 + $0xaf0] sm:$0xff] }
 0x2b4   : > { %v5369_v47 = vpop.f32.mrb[12].mxu1  ;;  %v5332_v56 = vpop.f32.mrb[14].mxu0  ;;  %5633 = vmatpush1.bf16.msra.mxu0 %v9361_v36  ;;  %v872_v31 = vld [vmem:[%s11337_s14 + $0xed0] sm:$0xff]  ;;  %v9410_v36 = vcombine.high %v744_v39, %v748_v29  ;;  %v9409_v46 = vcombine.low %v744_v39, %v748_v29 }
 0x2b5   : > { %v11951_v52 = vadd.f32 %v5369_v47, %v5328_v44  ;;  %v5371_v53 = vpop.f32.mrb[13].mxu1  ;;  %v5333_v62 = vpop.f32.mrb[15].mxu0  ;;  %5634 = vmatprep.subr.bf16.mxu0 %v9370_v42  ;;  %v876_v32 = vld [vmem:[%s11337_s14 + $0xef0] sm:$0xff] }
 0x2b6   : > { %v11953_v58 = vadd.f32 %v5371_v53, %v5330_v23  ;;  %v5373_v61 = vpop.f32.mrb[14].mxu1  ;;  %5674 = vmatpush1.bf16.msra.mxu1 %v9489_v38  ;;  %v9538_v38 = vcombine.high %v872_v31, %v876_v32  ;;  %v752_v42 = vld [vmem:[%s11337_s14 + $0xb10] sm:$0xff]  ;;  %v9537_v47 = vcombine.low %v872_v31, %v876_v32 }
 0x2b7   : > { %v5374_v1 = vpop.f32.mrb[15].mxu1  ;;  %5675 = vmatprep.subr.bf16.mxu1 %v9498_v45  ;;  %v756_v44 = vld [vmem:[%s11337_s14 + $0xb30] sm:$0xff] }
 0x2b8   : > { %5635 = vmatpush1.bf16.msra.mxu0 %v9369_v57  ;;  %v880_v45 = vld [vmem:[%s11337_s14 + $0xf10] sm:$0xff]  ;;  %v9418_v23 = vcombine.high %v752_v42, %v756_v44  ;;  %v9417_v61 = vcombine.low %v752_v42, %v756_v44 }
 0x2b9   : > { %5636 = vmatprep.subr.bf16.mxu0 %v9378_v0  ;;  %v884_v20 = vld [vmem:[%s11337_s14 + $0xf30] sm:$0xff] }
 0x2ba   : > { %5676 = vmatpush1.bf16.msra.mxu1 %v9497_v63  ;;  %v9546_v49 = vcombine.high %v880_v45, %v884_v20  ;;  %v760_v51 = vld [vmem:[%s11337_s14 + $0xb50] sm:$0xff]  ;;  %v9545_v62 = vcombine.low %v880_v45, %v884_v20 }
 0x2bb   : > { %5677 = vmatprep.subr.bf16.mxu1 %v9506_v2  ;;  %v764_v53 = vld [vmem:[%s11337_s14 + $0xb70] sm:$0xff] }
 0x2bc   : > { %5637 = vmatpush1.bf16.msra.mxu0 %v9377_v9  ;;  %v888_v56 = vld [vmem:[%s11337_s14 + $0xf50] sm:$0xff]  ;;  %v9426_v63 = vcombine.high %v760_v51, %v764_v53  ;;  %v9425_v6 = vcombine.low %v760_v51, %v764_v53 }
 0x2bd   : > { %5638 = vmatprep.subr.bf16.mxu0 %v9386_v11  ;;  %v892_v57 = vld [vmem:[%s11337_s14 + $0xf70] sm:$0xff] }
 0x2be   : > { %5678 = vmatpush1.bf16.msra.mxu1 %v9505_v10  ;;  %v9554_v0 = vcombine.high %v888_v56, %v892_v57  ;;  %v768_v1 = vld [vmem:[%s11337_s14 + $0xb90] sm:$0xff]  ;;  %v9553_v7 = vcombine.low %v888_v56, %v892_v57 }
 0x2bf   : > { %5679 = vmatprep.subr.bf16.mxu1 %v9514_v12  ;;  %v772_v2 = vld [vmem:[%s11337_s14 + $0xbb0] sm:$0xff] }
 0x2c0   : > { %5639 = vmatpush1.bf16.msra.mxu0 %v9385_v15  ;;  %v896_v3 = vld [vmem:[%s11337_s14 + $0xf90] sm:$0xff]  ;;  %v9434_v9 = vcombine.high %v768_v1, %v772_v2  ;;  %v9433_v25 = vcombine.low %v768_v1, %v772_v2 }
 0x2c1   : > { %5640 = vmatprep.subr.bf16.mxu0 %v9394_v16  ;;  %v900_v4 = vld [vmem:[%s11337_s14 + $0xfb0] sm:$0xff] }
 0x2c2   : > { %5680 = vmatpush1.bf16.msra.mxu1 %v9513_v43  ;;  %v9562_v10 = vcombine.high %v896_v3, %v900_v4  ;;  %v776_v11 = vld [vmem:[%s11337_s14 + $0xbd0] sm:$0xff]  ;;  %v9561_v14 = vcombine.low %v896_v3, %v900_v4 }
 0x2c3   : > { %5681 = vmatprep.subr.bf16.mxu1 %v9522_v55  ;;  %v780_v12 = vld [vmem:[%s11337_s14 + $0xbf0] sm:$0xff] }
 0x2c4   : > { %5641 = vmatpush1.bf16.msra.mxu0 %v9393_v54  ;;  %v904_v13 = vld [vmem:[%s11337_s14 + $0xfd0] sm:$0xff]  ;;  %v9442_v15 = vcombine.high %v776_v11, %v780_v12  ;;  %v9441_v22 = vcombine.low %v776_v11, %v780_v12 }
 0x2c5   : > { %5642 = vmatprep.subr.bf16.mxu0 %v9402_v34  ;;  %v908_v40 = vld [vmem:[%s11337_s14 + $0xff0] sm:$0xff] }
 0x2c6   : > { %5682 = vmatpush1.bf16.msra.mxu1 %v9521_v26  ;;  %v9570_v43 = vcombine.high %v904_v13, %v908_v40  ;;  %v912_v16 = vld [vmem:[%s11337_s14 + $0x1010] sm:$0xff]  ;;  %v9569_v24 = vcombine.low %v904_v13, %v908_v40 }
 0x2c7   : > { %5683 = vmatprep.subr.bf16.mxu1 %v9530_v27  ;;  %v916_v55 = vld [vmem:[%s11337_s14 + $0x1030] sm:$0xff] }
 0x2c8   : > { %5643 = vmatpush1.bf16.msra.mxu0 %v9401_v33  ;;  %v1040_v18 = vld [vmem:[%s11337_s14 + $0x1410] sm:$0xff]  ;;  %v9578_v54 = vcombine.high %v912_v16, %v916_v55  ;;  %v9577_v31 = vcombine.low %v912_v16, %v916_v55 }
 0x2c9   : > { %5644 = vmatprep.subr.bf16.mxu0 %v9410_v36  ;;  %v1044_v19 = vld [vmem:[%s11337_s14 + $0x1430] sm:$0xff] }
 0x2ca   : > { %5684 = vmatpush1.bf16.msra.mxu1 %v9529_v35  ;;  %v9706_v26 = vcombine.high %v1040_v18, %v1044_v19  ;;  %v920_v34 = vld [vmem:[%s11337_s14 + $0x1050] sm:$0xff]  ;;  %v9705_v32 = vcombine.low %v1040_v18, %v1044_v19 }
 0x2cb   : > { %5685 = vmatprep.subr.bf16.mxu1 %v9538_v38  ;;  %v924_v27 = vld [vmem:[%s11337_s14 + $0x1070] sm:$0xff] }
 0x2cc   : > { %5645 = vmatpush1.bf16.msra.mxu0 %v9409_v46  ;;  %v1048_v39 = vld [vmem:[%s11337_s14 + $0x1450] sm:$0xff]  ;;  %v9586_v33 = vcombine.high %v920_v34, %v924_v27  ;;  %v9585_v45 = vcombine.low %v920_v34, %v924_v27 }
 0x2cd   : > { %5646 = vmatprep.subr.bf16.mxu0 %v9418_v23  ;;  %v1052_v29 = vld [vmem:[%s11337_s14 + $0x1470] sm:$0xff] }
 0x2ce   : > { %5686 = vmatpush1.bf16.msra.mxu1 %v9537_v47  ;;  %v9714_v35 = vcombine.high %v1048_v39, %v1052_v29  ;;  %v928_v36 = vld [vmem:[%s11337_s14 + $0x1090] sm:$0xff]  ;;  %v9713_v20 = vcombine.low %v1048_v39, %v1052_v29 }
 0x2cf   : > { %5687 = vmatprep.subr.bf16.mxu1 %v9546_v49  ;;  %v932_v38 = vld [vmem:[%s11337_s14 + $0x10b0] sm:$0xff] }
 0x2d0   : > { %5647 = vmatpush1.bf16.msra.mxu0 %v9417_v61  ;;  %v1056_v42 = vld [vmem:[%s11337_s14 + $0x1490] sm:$0xff]  ;;  %v9594_v46 = vcombine.high %v928_v36, %v932_v38  ;;  %v9593_v56 = vcombine.low %v928_v36, %v932_v38 }
 0x2d1   : > { %5648 = vmatprep.subr.bf16.mxu0 %v9426_v63  ;;  %v1060_v44 = vld [vmem:[%s11337_s14 + $0x14b0] sm:$0xff] }
 0x2d2   : > { %5688 = vmatpush1.bf16.msra.mxu1 %v9545_v62  ;;  %v9722_v47 = vcombine.high %v1056_v42, %v1060_v44  ;;  %v936_v23 = vld [vmem:[%s11337_s14 + $0x10d0] sm:$0xff]  ;;  %v9721_v57 = vcombine.low %v1056_v42, %v1060_v44 }
 0x2d3   : > { %5689 = vmatprep.subr.bf16.mxu1 %v9554_v0  ;;  %v940_v49 = vld [vmem:[%s11337_s14 + $0x10f0] sm:$0xff] }
 0x2d4   : > { %5649 = vmatpush1.bf16.msra.mxu0 %v9425_v6  ;;  %v1064_v51 = vld [vmem:[%s11337_s14 + $0x14d0] sm:$0xff]  ;;  %v9602_v61 = vcombine.high %v936_v23, %v940_v49  ;;  %v9601_v3 = vcombine.low %v936_v23, %v940_v49 }
 0x2d5   : > { %5650 = vmatprep.subr.bf16.mxu0 %v9434_v9  ;;  %v1068_v53 = vld [vmem:[%s11337_s14 + $0x14f0] sm:$0xff] }
 0x2d6   : > { %5690 = vmatpush1.bf16.msra.mxu1 %v9553_v7  ;;  %v9730_v62 = vcombine.high %v1064_v51, %v1068_v53  ;;  %v944_v63 = vld [vmem:[%s11337_s14 + $0x1110] sm:$0xff]  ;;  %v9729_v4 = vcombine.low %v1064_v51, %v1068_v53 }
 0x2d7   : > { %5691 = vmatprep.subr.bf16.mxu1 %v9562_v10  ;;  %v948_v0 = vld [vmem:[%s11337_s14 + $0x1130] sm:$0xff] }
 0x2d8   : > { %5651 = vmatpush1.bf16.msra.mxu0 %v9433_v25  ;;  %v1072_v1 = vld [vmem:[%s11337_s14 + $0x1510] sm:$0xff]  ;;  %v9610_v6 = vcombine.high %v944_v63, %v948_v0  ;;  %v9609_v13 = vcombine.low %v944_v63, %v948_v0 }
 0x2d9   : > { %5652 = vmatprep.subr.bf16.mxu0 %v9442_v15  ;;  %v1076_v2 = vld [vmem:[%s11337_s14 + $0x1530] sm:$0xff] }
 0x2da   : > { %5692 = vmatpush1.bf16.msra.mxu1 %v9561_v14  ;;  %v9738_v7 = vcombine.high %v1072_v1, %v1076_v2  ;;  %v952_v9 = vld [vmem:[%s11337_s14 + $0x1150] sm:$0xff]  ;;  %v9737_v40 = vcombine.low %v1072_v1, %v1076_v2 }
 0x2db   : > { %5693 = vmatprep.subr.bf16.mxu1 %v9570_v43  ;;  %v956_v10 = vld [vmem:[%s11337_s14 + $0x1170] sm:$0xff] }
 0x2dc   : > { %5653 = vmatpush1.bf16.msra.mxu0 %v9441_v22  ;;  %v1080_v11 = vld [vmem:[%s11337_s14 + $0x1550] sm:$0xff]  ;;  %v9618_v25 = vcombine.high %v952_v9, %v956_v10  ;;  %v9617_v18 = vcombine.low %v952_v9, %v956_v10 }
 0x2dd   : > { %5704 = vmatprep.subr.bf16.mxu0 %v9578_v54  ;;  %v1084_v12 = vld [vmem:[%s11337_s14 + $0x1570] sm:$0xff] }
 0x2de   : > { %5694 = vmatpush1.bf16.msra.mxu1 %v9569_v24  ;;  %v9746_v14 = vcombine.high %v1080_v11, %v1084_v12  ;;  %v960_v15 = vld [vmem:[%s11337_s14 + $0x1190] sm:$0xff]  ;;  %v9745_v19 = vcombine.low %v1080_v11, %v1084_v12 }
 0x2df   : > { %5745 = vmatprep.subr.bf16.mxu1 %v9706_v26  ;;  %5655 = vmatmul.mubr.bf16.vlgmr.msra.gmra.mrb[28].mxu0 %v11541_v37  ;;  %v964_v43 = vld [vmem:[%s11337_s14 + $0x11b0] sm:$0xff] }
 0x2e0   : > { %5705 = vmatpush1.bf16.msra.mxu0 %v9577_v31  ;;  %5736 = vmatprep.mubr.bf16.mxu0 %v11559_v48  ;;  %v1088_v16 = vld [vmem:[%s11337_s14 + $0x1590] sm:$0xff]  ;;  %v9626_v22 = vcombine.high %v960_v15, %v964_v43  ;;  %v9625_v38 = vcombine.low %v960_v15, %v964_v43 }
 0x2e1   : > { %5696 = vmatmul.mubr.bf16.vlgmr.msra.gmra.mrb[28].mxu1 %v11550_v41  ;;  %5706 = vmatprep.subr.bf16.mxu0 %v9586_v33  ;;  %v1092_v55 = vld [vmem:[%s11337_s14 + $0x15b0] sm:$0xff] }
 0x2e2   : > { %5746 = vmatpush1.bf16.msra.mxu1 %v9705_v32  ;;  %5777 = vmatprep.mubr.bf16.mxu1 %v11566_v50  ;;  %v9754_v54 = vcombine.high %v1088_v16, %v1092_v55  ;;  %v968_v26 = vld [vmem:[%s11337_s14 + $0x11d0] sm:$0xff] }
 0x2e3   : > { %5747 = vmatprep.subr.bf16.mxu1 %v9714_v35  ;;  %v972_v34 = vld [vmem:[%s11337_s14 + $0x11f0] sm:$0xff] }
 0x2e4   : > { %5707 = vmatpush1.bf16.msra.mxu0 %v9585_v45  ;;  %v1096_v31 = vld [vmem:[%s11337_s14 + $0x15d0] sm:$0xff] }
 0x2e5   : > { %5708 = vmatprep.subr.bf16.mxu0 %v9594_v46  ;;  %v1100_v32 = vld [vmem:[%s11337_s14 + $0x15f0] sm:$0xff] }
 0x2e6   : > { %5748 = vmatpush1.bf16.msra.mxu1 %v9713_v20  ;;  %v9634_v20 = vcombine.high %v968_v26, %v972_v34  ;;  %v976_v23 = vld [vmem:[%s11337_s14 + $0x1210] sm:$0xff] }
 0x2e7   : > { %5749 = vmatprep.subr.bf16.mxu1 %v9722_v47  ;;  %v9762_v47 = vcombine.high %v1096_v31, %v1100_v32  ;;  %v980_v49 = vld [vmem:[%s11337_s14 + $0x1230] sm:$0xff] }
 0x2e8   : > { %5709 = vmatpush1.bf16.msra.mxu0 %v9593_v56  ;;  %v1104_v51 = vld [vmem:[%s11337_s14 + $0x1610] sm:$0xff]  ;;  %v9633_v56 = vcombine.low %v968_v26, %v972_v34 }
 0x2e9   : > { %5710 = vmatprep.subr.bf16.mxu0 %v9602_v61  ;;  %v1108_v53 = vld [vmem:[%s11337_s14 + $0x1630] sm:$0xff]  ;;  %v9642_v61 = vcombine.high %v976_v23, %v980_v49 }
 0x2ea   : > { %5750 = vmatpush1.bf16.msra.mxu1 %v9721_v57  ;;  %v9761_v57 = vcombine.low %v1096_v31, %v1100_v32  ;;  %v984_v63 = vld [vmem:[%s11337_s14 + $0x1250] sm:$0xff] }
 0x2eb   : > { %5751 = vmatprep.subr.bf16.mxu1 %v9730_v62  ;;  %v9770_v62 = vcombine.high %v1104_v51, %v1108_v53  ;;  %v988_v0 = vld [vmem:[%s11337_s14 + $0x1270] sm:$0xff] }
 0x2ec   : > { %5711 = vmatpush1.bf16.msra.mxu0 %v9601_v3  ;;  %v1112_v1 = vld [vmem:[%s11337_s14 + $0x1650] sm:$0xff]  ;;  %v9641_v3 = vcombine.low %v976_v23, %v980_v49 }
 0x2ed   : > { %5712 = vmatprep.subr.bf16.mxu0 %v9610_v6  ;;  %v1116_v2 = vld [vmem:[%s11337_s14 + $0x1670] sm:$0xff]  ;;  %v9650_v6 = vcombine.high %v984_v63, %v988_v0 }
 0x2ee   : > { %5752 = vmatpush1.bf16.msra.mxu1 %v9729_v4  ;;  %v9769_v4 = vcombine.low %v1104_v51, %v1108_v53  ;;  %v992_v9 = vld [vmem:[%s11337_s14 + $0x1290] sm:$0xff] }
 0x2ef   : > { %5753 = vmatprep.subr.bf16.mxu1 %v9738_v7  ;;  %v9778_v7 = vcombine.high %v1112_v1, %v1116_v2  ;;  %v996_v10 = vld [vmem:[%s11337_s14 + $0x12b0] sm:$0xff] }
 0x2f0   : > { %5713 = vmatpush1.bf16.msra.mxu0 %v9609_v13  ;;  %v1120_v11 = vld [vmem:[%s11337_s14 + $0x1690] sm:$0xff]  ;;  %v9649_v13 = vcombine.low %v984_v63, %v988_v0 }
 0x2f1   : > { %5714 = vmatprep.subr.bf16.mxu0 %v9618_v25  ;;  %v1124_v12 = vld [vmem:[%s11337_s14 + $0x16b0] sm:$0xff]  ;;  %v9658_v25 = vcombine.high %v992_v9, %v996_v10 }
 0x2f2   : > { %5754 = vmatpush1.bf16.msra.mxu1 %v9737_v40  ;;  %v5410_v24 = vpop.f32.mrb[16].mxu0  ;;  %v9777_v40 = vcombine.low %v1112_v1, %v1116_v2  ;;  %v1000_v15 = vld [vmem:[%s11337_s14 + $0x12d0] sm:$0xff] }
 0x2f3   : > { %5755 = vmatprep.subr.bf16.mxu1 %v9746_v14  ;;  %v5411_v27 = vadd.f32 %v5410_v24, %v11951_v52  ;;  %v5412_v29 = vpop.f32.mrb[17].mxu0  ;;  %v9753_v52 = vcombine.low %v1088_v16, %v1092_v55  ;;  %v9786_v14 = vcombine.high %v1120_v11, %v1124_v12  ;;  %v1004_v43 = vld [vmem:[%s11337_s14 + $0x12f0] sm:$0xff] }
 0x2f4   : > { %v5451_v39 = vpop.f32.mrb[16].mxu1  ;;  %v5413_v33 = vadd.f32 %v5412_v29, %v11953_v58  ;;  %v5414_v36 = vpop.f32.mrb[18].mxu0  ;;  %5715 = vmatpush1.bf16.msra.mxu0 %v9617_v18  ;;  %v1128_v16 = vld [vmem:[%s11337_s14 + $0x16d0] sm:$0xff]  ;;  %v9657_v18 = vcombine.low %v992_v9, %v996_v10  ;;  %v529_v9 = vld [vmem:[%s11337_s14 + $0x418] sm:$0xff] }
 0x2f5   : > { %v5453_v35 = vpop.f32.mrb[17].mxu1  ;;  %v12025_v42 = vadd.f32 %v5451_v39, %v5411_v27  ;;  %v5415_v45 = vpop.f32.mrb[19].mxu0  ;;  %5716 = vmatprep.subr.bf16.mxu0 %v9626_v22  ;;  %v1132_v55 = vld [vmem:[%s11337_s14 + $0x16f0] sm:$0xff]  ;;  %v9666_v22 = vcombine.high %v1000_v15, %v1004_v43  ;;  %v9665_v39 = vcombine.low %v1000_v15, %v1004_v43  ;;  %v533_v10 = vld [vmem:[%s11337_s14 + $0x438] sm:$0xff] }
 0x2f6   : > { %v5455_v44 = vpop.f32.mrb[18].mxu1  ;;  %5756 = vmatpush1.bf16.msra.mxu1 %v9745_v19  ;;  %v12027_v46 = vadd.f32 %v5453_v35, %v5413_v33  ;;  %v9785_v19 = vcombine.low %v1120_v11, %v1124_v12  ;;  %v9794_v24 = vcombine.high %v1128_v16, %v1132_v55  ;;  %v1012_v26 = vld [vmem:[%s11337_s14 + $0x1330] sm:$0xff]  ;;  %v9793_v29 = vcombine.low %v1128_v16, %v1132_v55  ;;  %v537_v15 = vld [vmem:[%s11337_s14 + $0x458] sm:$0xff] }
 0x2f7   : > { %v5456_v58 = vpop.f32.mrb[19].mxu1  ;;  %5757 = vmatprep.subr.bf16.mxu1 %v9754_v54  ;;  %v1008_v54 = vld [vmem:[%s11337_s14 + $0x1310] sm:$0xff]  ;;  %v541_v43 = vld [vmem:[%s11337_s14 + $0x478] sm:$0xff]  ;;  %v9195_v55 = vcombine.low %v529_v9, %v533_v10 }
 0x2f8   : > { %5717 = vmatpush1.bf16.msra.mxu0 %v9625_v38  ;;  %v1136_v34 = vld [vmem:[%s11337_s14 + $0x1710] sm:$0xff]  ;;  %v9674_v31 = vcombine.high %v1008_v54, %v1012_v26  ;;  %v9673_v44 = vcombine.low %v1008_v54, %v1012_v26  ;;  %v545_v54 = vld [vmem:[%s11337_s14 + $0x498] sm:$0xff] }
 0x2f9   : > { %5718 = vmatprep.subr.bf16.mxu0 %v9634_v20  ;;  %v1140_v27 = vld [vmem:[%s11337_s14 + $0x1730] sm:$0xff]  ;;  %v549_v26 = vld [vmem:[%s11337_s14 + $0x4b8] sm:$0xff] }
 0x2fa   : > { %5758 = vmatpush1.bf16.msra.mxu1 %v9753_v52  ;;  %v9802_v32 = vcombine.high %v1136_v34, %v1140_v27  ;;  %v1016_v33 = vld [vmem:[%s11337_s14 + $0x1350] sm:$0xff]  ;;  %v9801_v45 = vcombine.low %v1136_v34, %v1140_v27  ;;  %v9203_v27 = vcombine.low %v537_v15, %v541_v43 }
 0x2fb   : > { %5759 = vmatprep.subr.bf16.mxu1 %v9762_v47  ;;  %v1020_v35 = vld [vmem:[%s11337_s14 + $0x1370] sm:$0xff] }
 0x2fc   : > { %5719 = vmatpush1.bf16.msra.mxu0 %v9633_v56  ;;  %v1144_v36 = vld [vmem:[%s11337_s14 + $0x1750] sm:$0xff]  ;;  %v9682_v52 = vcombine.high %v1016_v33, %v1020_v35  ;;  %v9681_v51 = vcombine.low %v1016_v33, %v1020_v35  ;;  %v553_v33 = vld [vmem:[%s11337_s14 + $0x4d8] sm:$0xff] }
 0x2fd   : > { %5720 = vmatprep.subr.bf16.mxu0 %v9642_v61  ;;  %v1148_v38 = vld [vmem:[%s11337_s14 + $0x1770] sm:$0xff]  ;;  %v557_v35 = vld [vmem:[%s11337_s14 + $0x4f8] sm:$0xff] }
 0x2fe   : > { %5760 = vmatpush1.bf16.msra.mxu1 %v9761_v57  ;;  %v9810_v20 = vcombine.high %v1144_v36, %v1148_v38  ;;  %v1024_v58 = vld [vmem:[%s11337_s14 + $0x1390] sm:$0xff]  ;;  %v9809_v53 = vcombine.low %v1144_v36, %v1148_v38  ;;  %v9211_v38 = vcombine.low %v545_v54, %v549_v26 }
 0x2ff   : > { %5761 = vmatprep.subr.bf16.mxu1 %v9770_v62  ;;  %v1028_v47 = vld [vmem:[%s11337_s14 + $0x13b0] sm:$0xff] }
 0x300   : > { %5721 = vmatpush1.bf16.msra.mxu0 %v9641_v3  ;;  %v1152_v23 = vld [vmem:[%s11337_s14 + $0x1790] sm:$0xff]  ;;  %v9690_v56 = vcombine.high %v1024_v58, %v1028_v47  ;;  %v9689_v1 = vcombine.low %v1024_v58, %v1028_v47  ;;  %v561_v58 = vld [vmem:[%s11337_s14 + $0x518] sm:$0xff] }
 0x301   : > { %5722 = vmatprep.subr.bf16.mxu0 %v9650_v6  ;;  %v1156_v49 = vld [vmem:[%s11337_s14 + $0x17b0] sm:$0xff]  ;;  %v401_v6 = vld [vmem:[%s11337_s14 + $0x18] sm:$0xff] }
 0x302   : > { %5762 = vmatpush1.bf16.msra.mxu1 %v9769_v4  ;;  %v9818_v57 = vcombine.high %v1152_v23, %v1156_v49  ;;  %v1032_v61 = vld [vmem:[%s11337_s14 + $0x13d0] sm:$0xff]  ;;  %v9817_v2 = vcombine.low %v1152_v23, %v1156_v49 }
 0x303   : > { %5763 = vmatprep.subr.bf16.mxu1 %v9778_v7  ;;  %v1036_v62 = vld [vmem:[%s11337_s14 + $0x13f0] sm:$0xff]  ;;  %v405_v7 = vld [vmem:[%s11337_s14 + $0x38] sm:$0xff] }
 0x304   : > { %5723 = vmatpush1.bf16.msra.mxu0 %v9649_v13  ;;  %v1160_v63 = vld [vmem:[%s11337_s14 + $0x17d0] sm:$0xff]  ;;  %v9698_v3 = vcombine.high %v1032_v61, %v1036_v62  ;;  %v9697_v11 = vcombine.low %v1032_v61, %v1036_v62  ;;  %v9068_v13 = vcombine.high %v401_v6, %v405_v7  ;;  %v9067_v16 = vcombine.low %v401_v6, %v405_v7 }
 0x305   : > { %5724 = vmatprep.subr.bf16.mxu0 %v9658_v25  ;;  %v1164_v0 = vld [vmem:[%s11337_s14 + $0x17f0] sm:$0xff]  ;;  %v409_v25 = vld [vmem:[%s11337_s14 + $0x58] sm:$0xff] }
 0x306   : > { %5764 = vmatpush1.bf16.msra.mxu1 %v9777_v40  ;;  %v9826_v4 = vcombine.high %v1160_v63, %v1164_v0  ;;  %v9825_v12 = vcombine.low %v1160_v63, %v1164_v0  ;;  %v9196_v40 = vcombine.high %v529_v9, %v533_v10 }
 0x307   : > { %5765 = vmatprep.subr.bf16.mxu1 %v9786_v14  ;;  %v413_v14 = vld [vmem:[%s11337_s14 + $0x78] sm:$0xff] }
 0x308   : > { %5725 = vmatpush1.bf16.msra.mxu0 %v9657_v18  ;;  %v9076_v18 = vcombine.high %v409_v25, %v413_v14  ;;  %v9075_v34 = vcombine.low %v409_v25, %v413_v14 }
 0x309   : > { %5726 = vmatprep.subr.bf16.mxu0 %v9666_v22  ;;  %v417_v22 = vld [vmem:[%s11337_s14 + $0x98] sm:$0xff] }
 0x30a   : > { %5766 = vmatpush1.bf16.msra.mxu1 %v9785_v19  ;;  %v9204_v19 = vcombine.high %v537_v15, %v541_v43  ;;  %v585_v15 = vld [vmem:[%s11337_s14 + $0x5d8] sm:$0xff] }
 0x30b   : > { %5767 = vmatprep.subr.bf16.mxu1 %v9794_v24  ;;  %v421_v24 = vld [vmem:[%s11337_s14 + $0xb8] sm:$0xff] }
 0x30c   : > { %5727 = vmatpush1.bf16.msra.mxu0 %v9665_v39  ;;  %v9084_v39 = vcombine.high %v417_v22, %v421_v24  ;;  %v9083_v36 = vcombine.low %v417_v22, %v421_v24  ;;  %v589_v43 = vld [vmem:[%s11337_s14 + $0x5f8] sm:$0xff] }
 0x30d   : > { %5728 = vmatprep.subr.bf16.mxu0 %v9674_v31  ;;  %v425_v31 = vld [vmem:[%s11337_s14 + $0xd8] sm:$0xff] }
 0x30e   : > { %5768 = vmatpush1.bf16.msra.mxu1 %v9793_v29  ;;  %v9212_v29 = vcombine.high %v545_v54, %v549_v26  ;;  %v393_v54 = vld [vmem:[#allocation2 + $0x18] sm:$0xff] }
 0x30f   : > { %5769 = vmatprep.subr.bf16.mxu1 %v9802_v32  ;;  %v429_v32 = vld [vmem:[%s11337_s14 + $0xf8] sm:$0xff] }
 0x310   : > { %5729 = vmatpush1.bf16.msra.mxu0 %v9673_v44  ;;  %v9092_v44 = vcombine.high %v425_v31, %v429_v32  ;;  %v9091_v47 = vcombine.low %v425_v31, %v429_v32  ;;  %v465_v31 = vld [vmem:[%s11337_s14 + $0x218] sm:$0xff] }
 0x311   : > { %5730 = vmatprep.subr.bf16.mxu0 %v9682_v52  ;;  %v433_v52 = vld [vmem:[%s11337_s14 + $0x118] sm:$0xff] }
 0x312   : > { %5770 = vmatpush1.bf16.msra.mxu1 %v9801_v45  ;;  %v9220_v45 = vcombine.high %v553_v33, %v557_v35  ;;  %v469_v32 = vld [vmem:[%s11337_s14 + $0x238] sm:$0xff] }
 0x313   : > { %5771 = vmatprep.subr.bf16.mxu1 %v9810_v20  ;;  %v437_v20 = vld [vmem:[%s11337_s14 + $0x138] sm:$0xff] }
 0x314   : > { %5731 = vmatpush1.bf16.msra.mxu0 %v9681_v51  ;;  %v9100_v23 = vcombine.high %v433_v52, %v437_v20  ;;  %v441_v51 = vld [vmem:[%s11337_s14 + $0x158] sm:$0xff]  ;;  %v9099_v61 = vcombine.low %v433_v52, %v437_v20  ;;  %v9132_v52 = vcombine.high %v465_v31, %v469_v32 }
 0x315   : > { %5732 = vmatprep.subr.bf16.mxu0 %v9690_v56  ;;  %v569_v56 = vld [vmem:[%s11337_s14 + $0x558] sm:$0xff] }
 0x316   : > { %5772 = vmatpush1.bf16.msra.mxu1 %v9809_v53  ;;  %v445_v53 = vld [vmem:[%s11337_s14 + $0x178] sm:$0xff] }
 0x317   : > { %5773 = vmatprep.subr.bf16.mxu1 %v9818_v57  ;;  %v573_v57 = vld [vmem:[%s11337_s14 + $0x578] sm:$0xff]  ;;  %v9108_v63 = vcombine.high %v441_v51, %v445_v53  ;;  %v9107_v6 = vcombine.low %v441_v51, %v445_v53 }
 0x318   : > { %5733 = vmatpush1.bf16.msra.mxu0 %v9689_v1  ;;  %v9236_v0 = vcombine.high %v569_v56, %v573_v57  ;;  %v449_v1 = vld [vmem:[%s11337_s14 + $0x198] sm:$0xff]  ;;  %v9235_v7 = vcombine.low %v569_v56, %v573_v57 }
 0x319   : > { %5734 = vmatprep.subr.bf16.mxu0 %v9698_v3  ;;  %v577_v3 = vld [vmem:[%s11337_s14 + $0x598] sm:$0xff] }
 0x31a   : > { %5774 = vmatpush1.bf16.msra.mxu1 %v9817_v2  ;;  %v453_v2 = vld [vmem:[%s11337_s14 + $0x1b8] sm:$0xff] }
 0x31b   : > { %5775 = vmatprep.subr.bf16.mxu1 %v9826_v4  ;;  %v581_v4 = vld [vmem:[%s11337_s14 + $0x5b8] sm:$0xff]  ;;  %v9116_v9 = vcombine.high %v449_v1, %v453_v2  ;;  %v9115_v22 = vcombine.low %v449_v1, %v453_v2 }
 0x31c   : > { %5735 = vmatpush1.bf16.msra.mxu0 %v9697_v11  ;;  %v9244_v11 = vcombine.high %v577_v3, %v581_v4  ;;  %v481_v56 = vld [vmem:[%s11337_s14 + $0x298] sm:$0xff] }
 0x31d   : > { %5786 = vmatprep.subr.bf16.mxu0 %v9068_v13  ;;  %v461_v13 = vld [vmem:[%s11337_s14 + $0x1f8] sm:$0xff] }
 0x31e   : > { %5776 = vmatpush1.bf16.msra.mxu1 %v9825_v12  ;;  %v457_v12 = vld [vmem:[%s11337_s14 + $0x1d8] sm:$0xff] }
 0x31f   : > { %5827 = vmatprep.subr.bf16.mxu1 %v9196_v40  ;;  %5737 = vmatmul.mubr.bf16.vlgmr.msra.gmra.mrb[32].mxu0 %v11631_v5  ;;  %v485_v57 = vld [vmem:[%s11337_s14 + $0x2b8] sm:$0xff] }
 0x320   : > { %5787 = vmatpush1.bf16.msra.mxu0 %v9067_v16  ;;  %5818 = vmatprep.mubr.bf16.mxu0 %v11401_v59  ;;  %v565_v59 = vld [vmem:[%s11337_s14 + $0x538] sm:$0xff]  ;;  %v392_v16 = vld [vmem:[#allocation2 + $0x10] sm:$0xff]  ;;  %v9148_v1 = vcombine.high %v481_v56, %v485_v57 }
 0x321   : > { %5778 = vmatmul.mubr.bf16.vlgmr.msra.gmra.mrb[32].mxu1 %v11637_v8  ;;  %5788 = vmatprep.subr.bf16.mxu0 %v9076_v18  ;;  %v9228_v49 = vcombine.high %v561_v58, %v565_v59  ;;  %v9227_v62 = vcombine.low %v561_v58, %v565_v59  ;;  %v473_v58 = vld [vmem:[%s11337_s14 + $0x258] sm:$0xff] }
 0x322   : > { %5828 = vmatpush1.bf16.msra.mxu1 %v9195_v55  ;;  %5859 = vmatprep.mubr.bf16.mxu1 %v11405_v60  ;;  %v9219_v60 = vcombine.low %v553_v33, %v557_v35  ;;  %v593_v35 = vld [vmem:[%s11337_s14 + $0x618] sm:$0xff] }
 0x323   : > { %5829 = vmatprep.subr.bf16.mxu1 %v9204_v19  ;;  %v477_v59 = vld [vmem:[%s11337_s14 + $0x278] sm:$0xff] }
 0x324   : > { %5789 = vmatpush1.bf16.msra.mxu0 %v9075_v34  ;;  %v9243_v34 = vcombine.low %v577_v3, %v581_v4  ;;  %v9140_v51 = vcombine.high %v473_v58, %v477_v59  ;;  %v489_v3 = vld [vmem:[%s11337_s14 + $0x2d8] sm:$0xff] }
 0x325   : > { %5790 = vmatprep.subr.bf16.mxu0 %v9084_v39  ;;  %v493_v4 = vld [vmem:[%s11337_s14 + $0x2f8] sm:$0xff] }
 0x326   : > { %5830 = vmatpush1.bf16.msra.mxu1 %v9203_v27  ;;  %v9124_v27 = vcombine.high %v457_v12, %v461_v13 }
 0x327   : > { %5831 = vmatprep.subr.bf16.mxu1 %v9212_v29 }
 0x328   : > { %5791 = vmatpush1.bf16.msra.mxu0 %v9083_v36  ;;  %v597_v36 = vld [vmem:[%s11337_s14 + $0x638] sm:$0xff] }
 0x329   : > { %5792 = vmatprep.subr.bf16.mxu0 %v9092_v44  ;;  %v9123_v44 = vcombine.low %v457_v12, %v461_v13  ;;  %v9260_v20 = vcombine.high %v593_v35, %v597_v36  ;;  %v497_v13 = vld [vmem:[%s11337_s14 + $0x318] sm:$0xff] }
 0x32a   : > { %5832 = vmatpush1.bf16.msra.mxu1 %v9211_v38 }
 0x32b   : > { %5833 = vmatprep.subr.bf16.mxu1 %v9220_v45  ;;  %v9251_v45 = vcombine.low %v585_v15, %v589_v43 }
 0x32c   : > { %5793 = vmatpush1.bf16.msra.mxu0 %v9091_v47  ;;  %v601_v47 = vld [vmem:[%s11337_s14 + $0x658] sm:$0xff] }
 0x32d   : > { %5794 = vmatprep.subr.bf16.mxu0 %v9100_v23  ;;  %v9131_v23 = vcombine.low %v465_v31, %v469_v32 }
 0x32e   : > { %5834 = vmatpush1.bf16.msra.mxu1 %v9219_v60  ;;  %v605_v60 = vld [vmem:[%s11337_s14 + $0x678] sm:$0xff] }
 0x32f   : > { %5835 = vmatprep.subr.bf16.mxu1 %v9228_v49  ;;  %v9259_v49 = vcombine.low %v593_v35, %v597_v36  ;;  %v9268_v53 = vcombine.high %v601_v47, %v605_v60  ;;  %v521_v36 = vld [vmem:[%s11337_s14 + $0x3d8] sm:$0xff] }
 0x330   : > { %5795 = vmatpush1.bf16.msra.mxu0 %v9099_v61  ;;  %v609_v61 = vld [vmem:[%s11337_s14 + $0x698] sm:$0xff] }
 0x331   : > { %5796 = vmatprep.subr.bf16.mxu0 %v9108_v63  ;;  %v9139_v63 = vcombine.low %v473_v58, %v477_v59 }
 0x332   : > { %5836 = vmatpush1.bf16.msra.mxu1 %v9227_v62  ;;  %v5492_v10 = vpop.f32.mrb[20].mxu0  ;;  %v613_v62 = vld [vmem:[%s11337_s14 + $0x6b8] sm:$0xff] }
 0x333   : > { %5837 = vmatprep.subr.bf16.mxu1 %v9236_v0  ;;  %v5493_v40 = vadd.f32 %v5492_v10, %v12025_v42  ;;  %v5494_v14 = vpop.f32.mrb[21].mxu0  ;;  %v9267_v0 = vcombine.low %v601_v47, %v605_v60  ;;  %v9276_v2 = vcombine.high %v609_v61, %v613_v62  ;;  %v9275_v10 = vcombine.low %v609_v61, %v613_v62  ;;  %v657_v47 = vld [vmem:[%s11337_s14 + $0x818] sm:$0xff] }
 0x334   : > { %v5533_v25 = vpop.f32.mrb[20].mxu1  ;;  %v5495_v55 = vadd.f32 %v5494_v14, %v12027_v46  ;;  %v5496_v19 = vpop.f32.mrb[22].mxu0  ;;  %5797 = vmatpush1.bf16.msra.mxu0 %v9107_v6  ;;  %v9252_v46 = vcombine.high %v585_v15, %v589_v43  ;;  %v617_v6 = vld [vmem:[%s11337_s14 + $0x6d8] sm:$0xff]  ;;  %v9155_v15 = vcombine.low %v489_v3, %v493_v4 }
 0x335   : > { %v5535_v18 = vpop.f32.mrb[21].mxu1  ;;  %v5534_v24 = vadd.f32 %v5533_v25, %v5493_v40  ;;  %v5497_v42 = vpop.f32.mrb[23].mxu0  ;;  %5798 = vmatprep.subr.bf16.mxu0 %v9116_v9  ;;  %v9147_v9 = vcombine.low %v481_v56, %v485_v57  ;;  %v501_v40 = vld [vmem:[%s11337_s14 + $0x338] sm:$0xff] }
 0x336   : > { %v5537_v26 = vpop.f32.mrb[22].mxu1  ;;  %5838 = vmatpush1.bf16.msra.mxu1 %v9235_v7  ;;  %v5536_v39 = vadd.f32 %v5535_v18, %v5495_v55  ;;  %v621_v7 = vld [vmem:[%s11337_s14 + $0x6f8] sm:$0xff] }
 0x337   : > { %v5538_v29 = vpop.f32.mrb[23].mxu1  ;;  %5839 = vmatprep.subr.bf16.mxu1 %v9244_v11  ;;  %v6034_v33 = vadd.f32 %v5534_v24, %v392_v16  ;;  %v9156_v11 = vcombine.high %v489_v3, %v493_v4  ;;  %v9284_v12 = vcombine.high %v617_v6, %v621_v7  ;;  %v625_v25 = vld [vmem:[%s11337_s14 + $0x718] sm:$0xff]  ;;  %v9283_v43 = vcombine.low %v617_v6, %v621_v7 }
 0x338   : > { %v6035_v38 = vadd.f32 %v5536_v39, %v393_v54  ;;  %5799 = vmatpush1.bf16.msra.mxu0 %v9115_v22  ;;  %v629_v14 = vld [vmem:[%s11337_s14 + $0x738] sm:$0xff]  ;;  %v9164_v16 = vcombine.high %v497_v13, %v501_v40  ;;  %v9163_v54 = vcombine.low %v497_v13, %v501_v40 }
 0x339   : > { %6042 = vst [vmem:[#allocation2 + $0x10] sm:$0xff] %v6034_v33  ;;  %5800 = vmatprep.subr.bf16.mxu0 %v9124_v27  ;;  %v9292_v55 = vcombine.high %v625_v25, %v629_v14  ;;  %v505_v18 = vld [vmem:[%s11337_s14 + $0x358] sm:$0xff]  ;;  %v9291_v26 = vcombine.low %v625_v25, %v629_v14 }
 0x33a   : > { %5840 = vmatpush1.bf16.msra.mxu1 %v9243_v34  ;;  %6043 = vst [vmem:[#allocation2 + $0x18] sm:$0xff] %v6035_v38  ;;  %v509_v19 = vld [vmem:[%s11337_s14 + $0x378] sm:$0xff] }
 0x33b   : > { %5841 = vmatprep.subr.bf16.mxu1 %v9252_v46  ;;  %v633_v22 = vld [vmem:[%s11337_s14 + $0x758] sm:$0xff]  ;;  %v9172_v42 = vcombine.high %v505_v18, %v509_v19  ;;  %v9171_v31 = vcombine.low %v505_v18, %v509_v19 }
 0x33c   : > { %5801 = vmatpush1.bf16.msra.mxu0 %v9123_v44  ;;  %v637_v24 = vld [vmem:[%s11337_s14 + $0x778] sm:$0xff] }
 0x33d   : > { %5802 = vmatprep.subr.bf16.mxu0 %v9132_v52  ;;  %v9300_v34 = vcombine.high %v633_v22, %v637_v24  ;;  %v513_v27 = vld [vmem:[%s11337_s14 + $0x398] sm:$0xff]  ;;  %v9299_v32 = vcombine.low %v633_v22, %v637_v24 }
 0x33e   : > { %5842 = vmatpush1.bf16.msra.mxu1 %v9251_v45  ;;  %v517_v39 = vld [vmem:[%s11337_s14 + $0x3b8] sm:$0xff] }
 0x33f   : > { %5843 = vmatprep.subr.bf16.mxu1 %v9260_v20  ;;  %v641_v29 = vld [vmem:[%s11337_s14 + $0x798] sm:$0xff]  ;;  %v9180_v33 = vcombine.high %v513_v27, %v517_v39  ;;  %v9179_v52 = vcombine.low %v513_v27, %v517_v39 }
 0x340   : > { %5803 = vmatpush1.bf16.msra.mxu0 %v9131_v23  ;;  %v645_v46 = vld [vmem:[%s11337_s14 + $0x7b8] sm:$0xff] }
 0x341   : > { %5804 = vmatprep.subr.bf16.mxu0 %v9140_v51  ;;  %v9308_v35 = vcombine.high %v641_v29, %v645_v46  ;;  %v525_v38 = vld [vmem:[%s11337_s14 + $0x3f8] sm:$0xff]  ;;  %v9307_v20 = vcombine.low %v641_v29, %v645_v46 }
 0x342   : > { %5844 = vmatpush1.bf16.msra.mxu1 %v9259_v49  ;;  %v649_v44 = vld [vmem:[%s11337_s14 + $0x7d8] sm:$0xff]  ;;  %v9188_v58 = vcombine.high %v521_v36, %v525_v38  ;;  %v9187_v51 = vcombine.low %v521_v36, %v525_v38 }
 0x343   : > { %5845 = vmatprep.subr.bf16.mxu1 %v9268_v53  ;;  %v653_v45 = vld [vmem:[%s11337_s14 + $0x7f8] sm:$0xff] }
 0x344   : > { %5805 = vmatpush1.bf16.msra.mxu0 %v9139_v63  ;;  %v9316_v59 = vcombine.high %v649_v44, %v653_v45  ;;  %v661_v60 = vld [vmem:[%s11337_s14 + $0x838] sm:$0xff]  ;;  %v9315_v53 = vcombine.low %v649_v44, %v653_v45 }
 0x345   : > { %5806 = vmatprep.subr.bf16.mxu0 %v9148_v1  ;;  %v785_v23 = vld [vmem:[%s11337_s14 + $0xc18] sm:$0xff]  ;;  %v9324_v56 = vcombine.high %v657_v47, %v661_v60  ;;  %v9323_v1 = vcombine.low %v657_v47, %v661_v60 }
 0x346   : > { %5846 = vmatpush1.bf16.msra.mxu1 %v9267_v0  ;;  %v789_v49 = vld [vmem:[%s11337_s14 + $0xc38] sm:$0xff] }
 0x347   : > { %5847 = vmatprep.subr.bf16.mxu1 %v9276_v2  ;;  %v9452_v57 = vcombine.high %v785_v23, %v789_v49  ;;  %v665_v61 = vld [vmem:[%s11337_s14 + $0x858] sm:$0xff]  ;;  %v9451_v2 = vcombine.low %v785_v23, %v789_v49 }
 0x348   : > { %5807 = vmatpush1.bf16.msra.mxu0 %v9147_v9  ;;  %v669_v62 = vld [vmem:[%s11337_s14 + $0x878] sm:$0xff] }
 0x349   : > { %5808 = vmatprep.subr.bf16.mxu0 %v9156_v11  ;;  %v793_v63 = vld [vmem:[%s11337_s14 + $0xc58] sm:$0xff]  ;;  %v9332_v3 = vcombine.high %v665_v61, %v669_v62  ;;  %v9331_v11 = vcombine.low %v665_v61, %v669_v62 }
 0x34a   : > { %5848 = vmatpush1.bf16.msra.mxu1 %v9275_v10  ;;  %v797_v0 = vld [vmem:[%s11337_s14 + $0xc78] sm:$0xff] }
 0x34b   : > { %5849 = vmatprep.subr.bf16.mxu1 %v9284_v12  ;;  %v9460_v4 = vcombine.high %v793_v63, %v797_v0  ;;  %v673_v6 = vld [vmem:[%s11337_s14 + $0x898] sm:$0xff]  ;;  %v9459_v12 = vcombine.low %v793_v63, %v797_v0 }
 0x34c   : > { %5809 = vmatpush1.bf16.msra.mxu0 %v9155_v15  ;;  %v677_v7 = vld [vmem:[%s11337_s14 + $0x8b8] sm:$0xff] }
 0x34d   : > { %5810 = vmatprep.subr.bf16.mxu0 %v9164_v16  ;;  %v801_v9 = vld [vmem:[%s11337_s14 + $0xc98] sm:$0xff]  ;;  %v9340_v13 = vcombine.high %v673_v6, %v677_v7 }
 0x34e   : > { %5850 = vmatpush1.bf16.msra.mxu1 %v9283_v43  ;;  %v805_v10 = vld [vmem:[%s11337_s14 + $0xcb8] sm:$0xff] }
 0x34f   : > { %5851 = vmatprep.subr.bf16.mxu1 %v9292_v55  ;;  %v9468_v40 = vcombine.high %v801_v9, %v805_v10  ;;  %v681_v25 = vld [vmem:[%s11337_s14 + $0x8d8] sm:$0xff]  ;;  %v9467_v43 = vcombine.low %v801_v9, %v805_v10 }
 0x350   : > { %5811 = vmatpush1.bf16.msra.mxu0 %v9163_v54  ;;  %v685_v14 = vld [vmem:[%s11337_s14 + $0x8f8] sm:$0xff] }
 0x351   : > { %5812 = vmatprep.subr.bf16.mxu0 %v9172_v42  ;;  %v813_v15 = vld [vmem:[%s11337_s14 + $0xcf8] sm:$0xff]  ;;  %v9348_v16 = vcombine.high %v681_v25, %v685_v14  ;;  %v9347_v24 = vcombine.low %v681_v25, %v685_v14 }
 0x352   : > { %5852 = vmatpush1.bf16.msra.mxu1 %v9291_v26  ;;  %v689_v18 = vld [vmem:[%s11337_s14 + $0x918] sm:$0xff] }
 0x353   : > { %5853 = vmatprep.subr.bf16.mxu1 %v9300_v34  ;;  %v693_v19 = vld [vmem:[%s11337_s14 + $0x938] sm:$0xff] }
 0x354   : > { %5813 = vmatpush1.bf16.msra.mxu0 %v9171_v31  ;;  %v817_v22 = vld [vmem:[%s11337_s14 + $0xd18] sm:$0xff]  ;;  %v9356_v54 = vcombine.high %v689_v18, %v693_v19  ;;  %v9355_v29 = vcombine.low %v689_v18, %v693_v19 }
 0x355   : > { %5814 = vmatprep.subr.bf16.mxu0 %v9180_v33  ;;  %v697_v42 = vld [vmem:[%s11337_s14 + $0x958] sm:$0xff] }
 0x356   : > { %5854 = vmatpush1.bf16.msra.mxu1 %v9299_v32  ;;  %v701_v34 = vld [vmem:[%s11337_s14 + $0x978] sm:$0xff] }
 0x357   : > { %5855 = vmatprep.subr.bf16.mxu1 %v9308_v35  ;;  %v825_v27 = vld [vmem:[%s11337_s14 + $0xd58] sm:$0xff]  ;;  %v9364_v31 = vcombine.high %v697_v42, %v701_v34  ;;  %v9363_v44 = vcombine.low %v697_v42, %v701_v34 }
 0x358   : > { %5815 = vmatpush1.bf16.msra.mxu0 %v9179_v52  ;;  %v829_v39 = vld [vmem:[%s11337_s14 + $0xd78] sm:$0xff] }
 0x359   : > { %5816 = vmatprep.subr.bf16.mxu0 %v9188_v58  ;;  %v9492_v32 = vcombine.high %v825_v27, %v829_v39  ;;  %v705_v33 = vld [vmem:[%s11337_s14 + $0x998] sm:$0xff]  ;;  %v9491_v45 = vcombine.low %v825_v27, %v829_v39 }
 0x35a   : > { %5856 = vmatpush1.bf16.msra.mxu1 %v9307_v20  ;;  %v709_v35 = vld [vmem:[%s11337_s14 + $0x9b8] sm:$0xff] }
 0x35b   : > { %5857 = vmatprep.subr.bf16.mxu1 %v9316_v59  ;;  %v833_v36 = vld [vmem:[%s11337_s14 + $0xd98] sm:$0xff]  ;;  %v9372_v52 = vcombine.high %v705_v33, %v709_v35  ;;  %v9371_v61 = vcombine.low %v705_v33, %v709_v35 }
 0x35c   : > { %5817 = vmatpush1.bf16.msra.mxu0 %v9187_v51  ;;  %v837_v38 = vld [vmem:[%s11337_s14 + $0xdb8] sm:$0xff] }
 0x35d   : > { %5868 = vmatprep.subr.bf16.mxu0 %v9324_v56  ;;  %v9500_v58 = vcombine.high %v833_v36, %v837_v38  ;;  %v713_v59 = vld [vmem:[%s11337_s14 + $0x9d8] sm:$0xff] }
 0x35e   : > { %5858 = vmatpush1.bf16.msra.mxu1 %v9315_v53  ;;  %v717_v47 = vld [vmem:[%s11337_s14 + $0x9f8] sm:$0xff] }
 0x35f   : > { %5909 = vmatprep.subr.bf16.mxu1 %v9452_v57  ;;  %5819 = vmatmul.mubr.bf16.vlgmr.msra.gmra.mrb[36].mxu0 %v11451_v17  ;;  %v809_v17 = vld [vmem:[%s11337_s14 + $0xcd8] sm:$0xff] }
 0x360   : > { %5869 = vmatpush1.bf16.msra.mxu0 %v9323_v1  ;;  %5900 = vmatprep.mubr.bf16.mxu0 %v11469_v28  ;;  %v9476_v55 = vcombine.high %v809_v17, %v813_v15  ;;  %v821_v28 = vld [vmem:[%s11337_s14 + $0xd38] sm:$0xff]  ;;  %v9499_v1 = vcombine.low %v833_v36, %v837_v38 }
 0x361   : > { %5860 = vmatmul.mubr.bf16.vlgmr.msra.gmra.mrb[36].mxu1 %v11460_v21  ;;  %5870 = vmatprep.subr.bf16.mxu0 %v9332_v3  ;;  %v9339_v21 = vcombine.low %v673_v6, %v677_v7  ;;  %v9484_v26 = vcombine.high %v817_v22, %v821_v28  ;;  %v9483_v46 = vcombine.low %v817_v22, %v821_v28  ;;  %v841_v49 = vld [vmem:[%s11337_s14 + $0xdd8] sm:$0xff] }
 0x362   : > { %5910 = vmatpush1.bf16.msra.mxu1 %v9451_v2  ;;  %5941 = vmatprep.mubr.bf16.mxu1 %v11476_v30  ;;  %v9475_v30 = vcombine.low %v809_v17, %v813_v15  ;;  %v845_v51 = vld [vmem:[%s11337_s14 + $0xdf8] sm:$0xff]  ;;  %v9380_v2 = vcombine.high %v713_v59, %v717_v47 }
 0x363   : > { %5911 = vmatprep.subr.bf16.mxu1 %v9460_v4  ;;  %v9508_v4 = vcombine.high %v841_v49, %v845_v51  ;;  %v721_v6 = vld [vmem:[%s11337_s14 + $0xa18] sm:$0xff] }
 0x364   : > { %5871 = vmatpush1.bf16.msra.mxu0 %v9331_v11  ;;  %v725_v7 = vld [vmem:[%s11337_s14 + $0xa38] sm:$0xff]  ;;  %v9379_v11 = vcombine.low %v713_v59, %v717_v47 }
 0x365   : > { %5872 = vmatprep.subr.bf16.mxu0 %v9340_v13  ;;  %v849_v9 = vld [vmem:[%s11337_s14 + $0xe18] sm:$0xff]  ;;  %v9388_v13 = vcombine.high %v721_v6, %v725_v7 }
 0x366   : > { %5912 = vmatpush1.bf16.msra.mxu1 %v9459_v12  ;;  %v853_v10 = vld [vmem:[%s11337_s14 + $0xe38] sm:$0xff]  ;;  %v9507_v12 = vcombine.low %v841_v49, %v845_v51 }
 0x367   : > { %5913 = vmatprep.subr.bf16.mxu1 %v9468_v40  ;;  %v9516_v40 = vcombine.high %v849_v9, %v853_v10  ;;  %v729_v25 = vld [vmem:[%s11337_s14 + $0xa58] sm:$0xff] }
 0x368   : > { %5873 = vmatpush1.bf16.msra.mxu0 %v9339_v21  ;;  %v733_v14 = vld [vmem:[%s11337_s14 + $0xa78] sm:$0xff]  ;;  %v9387_v21 = vcombine.low %v721_v6, %v725_v7 }
 0x369   : > { %5874 = vmatprep.subr.bf16.mxu0 %v9348_v16  ;;  %v857_v17 = vld [vmem:[%s11337_s14 + $0xe58] sm:$0xff]  ;;  %v9396_v16 = vcombine.high %v729_v25, %v733_v14 }
 0x36a   : > { %5914 = vmatpush1.bf16.msra.mxu1 %v9467_v43  ;;  %v861_v15 = vld [vmem:[%s11337_s14 + $0xe78] sm:$0xff]  ;;  %v9515_v43 = vcombine.low %v849_v9, %v853_v10 }
 0x36b   : > { %5915 = vmatprep.subr.bf16.mxu1 %v9476_v55  ;;  %v9524_v55 = vcombine.high %v857_v17, %v861_v15  ;;  %v737_v18 = vld [vmem:[%s11337_s14 + $0xa98] sm:$0xff] }
 0x36c   : > { %5875 = vmatpush1.bf16.msra.mxu0 %v9347_v24  ;;  %v741_v19 = vld [vmem:[%s11337_s14 + $0xab8] sm:$0xff]  ;;  %v9395_v24 = vcombine.low %v729_v25, %v733_v14 }
 0x36d   : > { %5876 = vmatprep.subr.bf16.mxu0 %v9356_v54  ;;  %v865_v22 = vld [vmem:[%s11337_s14 + $0xe98] sm:$0xff]  ;;  %v9404_v54 = vcombine.high %v737_v18, %v741_v19 }
 0x36e   : > { %5916 = vmatpush1.bf16.msra.mxu1 %v9475_v30  ;;  %v869_v28 = vld [vmem:[%s11337_s14 + $0xeb8] sm:$0xff]  ;;  %v9523_v30 = vcombine.low %v857_v17, %v861_v15 }
 0x36f   : > { %5917 = vmatprep.subr.bf16.mxu1 %v9484_v26  ;;  %v9532_v26 = vcombine.high %v865_v22, %v869_v28  ;;  %v745_v42 = vld [vmem:[%s11337_s14 + $0xad8] sm:$0xff] }
 0x370   : > { %5877 = vmatpush1.bf16.msra.mxu0 %v9355_v29  ;;  %v749_v34 = vld [vmem:[%s11337_s14 + $0xaf8] sm:$0xff]  ;;  %v9403_v29 = vcombine.low %v737_v18, %v741_v19 }
 0x371   : > { %5878 = vmatprep.subr.bf16.mxu0 %v9364_v31  ;;  %v873_v27 = vld [vmem:[%s11337_s14 + $0xed8] sm:$0xff]  ;;  %v9412_v31 = vcombine.high %v745_v42, %v749_v34 }
 0x372   : > { %5918 = vmatpush1.bf16.msra.mxu1 %v9483_v46  ;;  %v5574_v20 = vpop.f32.mrb[24].mxu0  ;;  %v877_v39 = vld [vmem:[%s11337_s14 + $0xef8] sm:$0xff]  ;;  %v9531_v46 = vcombine.low %v865_v22, %v869_v28 }
 0x373   : > { %5919 = vmatprep.subr.bf16.mxu1 %v9492_v32  ;;  %v5576_v23 = vpop.f32.mrb[25].mxu0  ;;  %v9540_v32 = vcombine.high %v873_v27, %v877_v39  ;;  %v753_v33 = vld [vmem:[%s11337_s14 + $0xb18] sm:$0xff] }
 0x374   : > { %v5615_v60 = vpop.f32.mrb[24].mxu1  ;;  %v5578_v57 = vpop.f32.mrb[26].mxu0  ;;  %5879 = vmatpush1.bf16.msra.mxu0 %v9363_v44  ;;  %v757_v35 = vld [vmem:[%s11337_s14 + $0xb38] sm:$0xff]  ;;  %v9411_v44 = vcombine.low %v745_v42, %v749_v34 }
 0x375   : > { %v12167_v53 = vadd.f32 %v5615_v60, %v5574_v20  ;;  %v5617_v56 = vpop.f32.mrb[25].mxu1  ;;  %v5579_v0 = vpop.f32.mrb[27].mxu0  ;;  %5880 = vmatprep.subr.bf16.mxu0 %v9372_v52  ;;  %v881_v36 = vld [vmem:[%s11337_s14 + $0xf18] sm:$0xff]  ;;  %v9420_v52 = vcombine.high %v753_v33, %v757_v35 }
 0x376   : > { %v12169_v62 = vadd.f32 %v5617_v56, %v5576_v23  ;;  %v5619_v63 = vpop.f32.mrb[26].mxu1  ;;  %5920 = vmatpush1.bf16.msra.mxu1 %v9491_v45  ;;  %v885_v38 = vld [vmem:[%s11337_s14 + $0xf38] sm:$0xff]  ;;  %v9539_v45 = vcombine.low %v873_v27, %v877_v39  ;;  %v9419_v23 = vcombine.low %v753_v33, %v757_v35 }
 0x377   : > { %v5620_v3 = vpop.f32.mrb[27].mxu1  ;;  %5921 = vmatprep.subr.bf16.mxu1 %v9500_v58  ;;  %v9548_v20 = vcombine.high %v881_v36, %v885_v38  ;;  %v761_v58 = vld [vmem:[%s11337_s14 + $0xb58] sm:$0xff]  ;;  %v9547_v49 = vcombine.low %v881_v36, %v885_v38 }
 0x378   : > { %5881 = vmatpush1.bf16.msra.mxu0 %v9371_v61  ;;  %v765_v59 = vld [vmem:[%s11337_s14 + $0xb78] sm:$0xff] }
 0x379   : > { %5882 = vmatprep.subr.bf16.mxu0 %v9380_v2  ;;  %v889_v47 = vld [vmem:[%s11337_s14 + $0xf58] sm:$0xff]  ;;  %v9428_v51 = vcombine.high %v761_v58, %v765_v59 }
 0x37a   : > { %5922 = vmatpush1.bf16.msra.mxu1 %v9499_v1  ;;  %v893_v60 = vld [vmem:[%s11337_s14 + $0xf78] sm:$0xff]  ;;  %v9427_v1 = vcombine.low %v761_v58, %v765_v59 }
 0x37b   : > { %5923 = vmatprep.subr.bf16.mxu1 %v9508_v4  ;;  %v9556_v56 = vcombine.high %v889_v47, %v893_v60  ;;  %v769_v57 = vld [vmem:[%s11337_s14 + $0xb98] sm:$0xff]  ;;  %v9555_v2 = vcombine.low %v889_v47, %v893_v60 }
 0x37c   : > { %5883 = vmatpush1.bf16.msra.mxu0 %v9379_v11  ;;  %v773_v61 = vld [vmem:[%s11337_s14 + $0xbb8] sm:$0xff] }
 0x37d   : > { %5884 = vmatprep.subr.bf16.mxu0 %v9388_v13  ;;  %v897_v63 = vld [vmem:[%s11337_s14 + $0xf98] sm:$0xff]  ;;  %v9436_v3 = vcombine.high %v769_v57, %v773_v61  ;;  %v9435_v11 = vcombine.low %v769_v57, %v773_v61 }
 0x37e   : > { %5924 = vmatpush1.bf16.msra.mxu1 %v9507_v12  ;;  %v901_v0 = vld [vmem:[%s11337_s14 + $0xfb8] sm:$0xff] }
 0x37f   : > { %5925 = vmatprep.subr.bf16.mxu1 %v9516_v40  ;;  %v9564_v4 = vcombine.high %v897_v63, %v901_v0  ;;  %v777_v6 = vld [vmem:[%s11337_s14 + $0xbd8] sm:$0xff]  ;;  %v9563_v12 = vcombine.low %v897_v63, %v901_v0 }
 0x380   : > { %5885 = vmatpush1.bf16.msra.mxu0 %v9387_v21  ;;  %v781_v7 = vld [vmem:[%s11337_s14 + $0xbf8] sm:$0xff] }
 0x381   : > { %5886 = vmatprep.subr.bf16.mxu0 %v9396_v16  ;;  %v905_v9 = vld [vmem:[%s11337_s14 + $0xfd8] sm:$0xff]  ;;  %v9444_v13 = vcombine.high %v777_v6, %v781_v7  ;;  %v9443_v21 = vcombine.low %v777_v6, %v781_v7 }
 0x382   : > { %5926 = vmatpush1.bf16.msra.mxu1 %v9515_v43  ;;  %v909_v10 = vld [vmem:[%s11337_s14 + $0xff8] sm:$0xff] }
 0x383   : > { %5927 = vmatprep.subr.bf16.mxu1 %v9524_v55  ;;  %v9572_v40 = vcombine.high %v905_v9, %v909_v10  ;;  %v913_v25 = vld [vmem:[%s11337_s14 + $0x1018] sm:$0xff]  ;;  %v9571_v43 = vcombine.low %v905_v9, %v909_v10 }
 0x384   : > { %5887 = vmatpush1.bf16.msra.mxu0 %v9395_v24  ;;  %v917_v14 = vld [vmem:[%s11337_s14 + $0x1038] sm:$0xff] }
 0x385   : > { %5888 = vmatprep.subr.bf16.mxu0 %v9404_v54  ;;  %v1041_v17 = vld [vmem:[%s11337_s14 + $0x1418] sm:$0xff]  ;;  %v9580_v16 = vcombine.high %v913_v25, %v917_v14  ;;  %v9579_v24 = vcombine.low %v913_v25, %v917_v14 }
 0x386   : > { %5928 = vmatpush1.bf16.msra.mxu1 %v9523_v30  ;;  %v1045_v15 = vld [vmem:[%s11337_s14 + $0x1438] sm:$0xff] }
 0x387   : > { %5929 = vmatprep.subr.bf16.mxu1 %v9532_v26  ;;  %v9708_v55 = vcombine.high %v1041_v17, %v1045_v15  ;;  %v921_v18 = vld [vmem:[%s11337_s14 + $0x1058] sm:$0xff]  ;;  %v9707_v30 = vcombine.low %v1041_v17, %v1045_v15 }
 0x388   : > { %5889 = vmatpush1.bf16.msra.mxu0 %v9403_v29  ;;  %v925_v19 = vld [vmem:[%s11337_s14 + $0x1078] sm:$0xff] }
 0x389   : > { %5890 = vmatprep.subr.bf16.mxu0 %v9412_v31  ;;  %v1049_v22 = vld [vmem:[%s11337_s14 + $0x1458] sm:$0xff]  ;;  %v9588_v54 = vcombine.high %v921_v18, %v925_v19  ;;  %v9587_v29 = vcombine.low %v921_v18, %v925_v19 }
 0x38a   : > { %5930 = vmatpush1.bf16.msra.mxu1 %v9531_v46  ;;  %v1053_v28 = vld [vmem:[%s11337_s14 + $0x1478] sm:$0xff] }
 0x38b   : > { %5931 = vmatprep.subr.bf16.mxu1 %v9540_v32  ;;  %v9716_v26 = vcombine.high %v1049_v22, %v1053_v28  ;;  %v929_v42 = vld [vmem:[%s11337_s14 + $0x1098] sm:$0xff]  ;;  %v9715_v46 = vcombine.low %v1049_v22, %v1053_v28 }
 0x38c   : > { %5891 = vmatpush1.bf16.msra.mxu0 %v9411_v44  ;;  %v933_v34 = vld [vmem:[%s11337_s14 + $0x10b8] sm:$0xff] }
 0x38d   : > { %5892 = vmatprep.subr.bf16.mxu0 %v9420_v52  ;;  %v1057_v27 = vld [vmem:[%s11337_s14 + $0x1498] sm:$0xff]  ;;  %v9596_v31 = vcombine.high %v929_v42, %v933_v34 }
 0x38e   : > { %5932 = vmatpush1.bf16.msra.mxu1 %v9539_v45  ;;  %v1061_v39 = vld [vmem:[%s11337_s14 + $0x14b8] sm:$0xff] }
 0x38f   : > { %5933 = vmatprep.subr.bf16.mxu1 %v9548_v20  ;;  %v9724_v32 = vcombine.high %v1057_v27, %v1061_v39  ;;  %v937_v33 = vld [vmem:[%s11337_s14 + $0x10d8] sm:$0xff]  ;;  %v9723_v38 = vcombine.low %v1057_v27, %v1061_v39 }
 0x390   : > { %5893 = vmatpush1.bf16.msra.mxu0 %v9419_v23  ;;  %v941_v35 = vld [vmem:[%s11337_s14 + $0x10f8] sm:$0xff] }
 0x391   : > { %5894 = vmatprep.subr.bf16.mxu0 %v9428_v51  ;;  %v1069_v36 = vld [vmem:[%s11337_s14 + $0x14f8] sm:$0xff]  ;;  %v9604_v44 = vcombine.high %v937_v33, %v941_v35  ;;  %v9603_v59 = vcombine.low %v937_v33, %v941_v35 }
 0x392   : > { %5934 = vmatpush1.bf16.msra.mxu1 %v9547_v49  ;;  %v945_v52 = vld [vmem:[%s11337_s14 + $0x1118] sm:$0xff] }
 0x393   : > { %5935 = vmatprep.subr.bf16.mxu1 %v9556_v56  ;;  %v949_v20 = vld [vmem:[%s11337_s14 + $0x1138] sm:$0xff] }
 0x394   : > { %5895 = vmatpush1.bf16.msra.mxu0 %v9427_v1  ;;  %v1073_v58 = vld [vmem:[%s11337_s14 + $0x1518] sm:$0xff]  ;;  %v9612_v47 = vcombine.high %v945_v52, %v949_v20  ;;  %v9611_v57 = vcombine.low %v945_v52, %v949_v20 }
 0x395   : > { %5896 = vmatprep.subr.bf16.mxu0 %v9436_v3  ;;  %v953_v23 = vld [vmem:[%s11337_s14 + $0x1158] sm:$0xff] }
 0x396   : > { %5936 = vmatpush1.bf16.msra.mxu1 %v9555_v2  ;;  %v957_v49 = vld [vmem:[%s11337_s14 + $0x1178] sm:$0xff] }
 0x397   : > { %5937 = vmatprep.subr.bf16.mxu1 %v9564_v4  ;;  %v1081_v51 = vld [vmem:[%s11337_s14 + $0x1558] sm:$0xff]  ;;  %v9620_v63 = vcombine.high %v953_v23, %v957_v49  ;;  %v9619_v6 = vcombine.low %v953_v23, %v957_v49 }
 0x398   : > { %5897 = vmatpush1.bf16.msra.mxu0 %v9435_v11  ;;  %v1085_v56 = vld [vmem:[%s11337_s14 + $0x1578] sm:$0xff] }
 0x399   : > { %5898 = vmatprep.subr.bf16.mxu0 %v9444_v13  ;;  %v9748_v0 = vcombine.high %v1081_v51, %v1085_v56  ;;  %v961_v1 = vld [vmem:[%s11337_s14 + $0x1198] sm:$0xff]  ;;  %v9747_v7 = vcombine.low %v1081_v51, %v1085_v56 }
 0x39a   : > { %5938 = vmatpush1.bf16.msra.mxu1 %v9563_v12  ;;  %v965_v2 = vld [vmem:[%s11337_s14 + $0x11b8] sm:$0xff] }
 0x39b   : > { %5939 = vmatprep.subr.bf16.mxu1 %v9572_v40  ;;  %v1089_v3 = vld [vmem:[%s11337_s14 + $0x1598] sm:$0xff]  ;;  %v9628_v9 = vcombine.high %v961_v1, %v965_v2 }
 0x39c   : > { %5899 = vmatpush1.bf16.msra.mxu0 %v9443_v21  ;;  %v1093_v4 = vld [vmem:[%s11337_s14 + $0x15b8] sm:$0xff] }
 0x39d   : > { %5950 = vmatprep.subr.bf16.mxu0 %v9580_v16  ;;  %v9756_v11 = vcombine.high %v1089_v3, %v1093_v4  ;;  %v969_v12 = vld [vmem:[%s11337_s14 + $0x11d8] sm:$0xff] }
 0x39e   : > { %5940 = vmatpush1.bf16.msra.mxu1 %v9571_v43  ;;  %v973_v13 = vld [vmem:[%s11337_s14 + $0x11f8] sm:$0xff] }
 0x39f   : > { %5991 = vmatprep.subr.bf16.mxu1 %v9708_v55  ;;  %5901 = vmatmul.mubr.bf16.vlgmr.msra.gmra.mrb[40].mxu0 %v11541_v37  ;;  %v1065_v37 = vld [vmem:[%s11337_s14 + $0x14d8] sm:$0xff]  ;;  %v9627_v55 = vcombine.low %v961_v1, %v965_v2  ;;  %v9636_v28 = vcombine.high %v969_v12, %v973_v13  ;;  %v9635_v27 = vcombine.low %v969_v12, %v973_v13 }
 0x3a0   : > { %5951 = vmatpush1.bf16.msra.mxu0 %v9579_v24  ;;  %5982 = vmatprep.mubr.bf16.mxu0 %v11559_v48  ;;  %v9732_v45 = vcombine.high %v1065_v37, %v1069_v36  ;;  %v1077_v48 = vld [vmem:[%s11337_s14 + $0x1538] sm:$0xff] }
 0x3a1   : > { %5942 = vmatmul.mubr.bf16.vlgmr.msra.gmra.mrb[40].mxu1 %v11550_v41  ;;  %5952 = vmatprep.subr.bf16.mxu0 %v9588_v54  ;;  %v9595_v41 = vcombine.low %v929_v42, %v933_v34  ;;  %v9740_v60 = vcombine.high %v1073_v58, %v1077_v48  ;;  %v9739_v61 = vcombine.low %v1073_v58, %v1077_v48  ;;  %v1097_v17 = vld [vmem:[%s11337_s14 + $0x15d8] sm:$0xff] }
 0x3a2   : > { %5992 = vmatpush1.bf16.msra.mxu1 %v9707_v30  ;;  %6023 = vmatprep.mubr.bf16.mxu1 %v11566_v50  ;;  %v9731_v50 = vcombine.low %v1065_v37, %v1069_v36  ;;  %v1101_v15 = vld [vmem:[%s11337_s14 + $0x15f8] sm:$0xff] }
 0x3a3   : > { %5993 = vmatprep.subr.bf16.mxu1 %v9716_v26  ;;  %v9764_v30 = vcombine.high %v1097_v17, %v1101_v15  ;;  %v977_v54 = vld [vmem:[%s11337_s14 + $0x1218] sm:$0xff]  ;;  %v9763_v39 = vcombine.low %v1097_v17, %v1101_v15 }
 0x3a4   : > { %5953 = vmatpush1.bf16.msra.mxu0 %v9587_v29  ;;  %v981_v26 = vld [vmem:[%s11337_s14 + $0x1238] sm:$0xff] }
 0x3a5   : > { %5954 = vmatprep.subr.bf16.mxu0 %v9596_v31  ;;  %v1105_v42 = vld [vmem:[%s11337_s14 + $0x1618] sm:$0xff]  ;;  %v9644_v29 = vcombine.high %v977_v54, %v981_v26  ;;  %v9643_v37 = vcombine.low %v977_v54, %v981_v26 }
 0x3a6   : > { %5994 = vmatpush1.bf16.msra.mxu1 %v9715_v46  ;;  %v1109_v34 = vld [vmem:[%s11337_s14 + $0x1638] sm:$0xff] }
 0x3a7   : > { %5995 = vmatprep.subr.bf16.mxu1 %v9724_v32  ;;  %v9772_v46 = vcombine.high %v1105_v42, %v1109_v34  ;;  %v985_v31 = vld [vmem:[%s11337_s14 + $0x1258] sm:$0xff]  ;;  %v9771_v36 = vcombine.low %v1105_v42, %v1109_v34 }
 0x3a8   : > { %5955 = vmatpush1.bf16.msra.mxu0 %v9595_v41  ;;  %v989_v32 = vld [vmem:[%s11337_s14 + $0x1278] sm:$0xff] }
 0x3a9   : > { %5956 = vmatprep.subr.bf16.mxu0 %v9604_v44  ;;  %v1113_v33 = vld [vmem:[%s11337_s14 + $0x1658] sm:$0xff]  ;;  %v9652_v41 = vcombine.high %v985_v31, %v989_v32  ;;  %v9651_v58 = vcombine.low %v985_v31, %v989_v32 }
 0x3aa   : > { %5996 = vmatpush1.bf16.msra.mxu1 %v9723_v38  ;;  %v1117_v35 = vld [vmem:[%s11337_s14 + $0x1678] sm:$0xff] }
 0x3ab   : > { %5997 = vmatprep.subr.bf16.mxu1 %v9732_v45  ;;  %v9780_v38 = vcombine.high %v1113_v33, %v1117_v35  ;;  %v993_v44 = vld [vmem:[%s11337_s14 + $0x1298] sm:$0xff]  ;;  %v9779_v48 = vcombine.low %v1113_v33, %v1117_v35  ;;  %v394_v33 = vld [vmem:[#allocation2 + $0x20] sm:$0xff] }
 0x3ac   : > { %5957 = vmatpush1.bf16.msra.mxu0 %v9603_v59  ;;  %v997_v45 = vld [vmem:[%s11337_s14 + $0x12b8] sm:$0xff] }
 0x3ad   : > { %5958 = vmatprep.subr.bf16.mxu0 %v9612_v47  ;;  %v1121_v52 = vld [vmem:[%s11337_s14 + $0x1698] sm:$0xff]  ;;  %v9660_v59 = vcombine.high %v993_v44, %v997_v45  ;;  %v9659_v51 = vcombine.low %v993_v44, %v997_v45 }
 0x3ae   : > { %5998 = vmatpush1.bf16.msra.mxu1 %v9731_v50  ;;  %v1125_v20 = vld [vmem:[%s11337_s14 + $0x16b8] sm:$0xff] }
 0x3af   : > { %5999 = vmatprep.subr.bf16.mxu1 %v9740_v60  ;;  %v9788_v50 = vcombine.high %v1121_v52, %v1125_v20  ;;  %v1001_v47 = vld [vmem:[%s11337_s14 + $0x12d8] sm:$0xff]  ;;  %v9787_v56 = vcombine.low %v1121_v52, %v1125_v20 }
 0x3b0   : > { %5959 = vmatpush1.bf16.msra.mxu0 %v9611_v57  ;;  %v1005_v60 = vld [vmem:[%s11337_s14 + $0x12f8] sm:$0xff] }
 0x3b1   : > { %5960 = vmatprep.subr.bf16.mxu0 %v9620_v63  ;;  %v1129_v23 = vld [vmem:[%s11337_s14 + $0x16d8] sm:$0xff]  ;;  %v9668_v57 = vcombine.high %v1001_v47, %v1005_v60 }
 0x3b2   : > { %6000 = vmatpush1.bf16.msra.mxu1 %v9739_v61  ;;  %v5656_v10 = vpop.f32.mrb[28].mxu0  ;;  %v1133_v49 = vld [vmem:[%s11337_s14 + $0x16f8] sm:$0xff] }
 0x3b3   : > { %6001 = vmatprep.subr.bf16.mxu1 %v9748_v0  ;;  %v5657_v40 = vadd.f32 %v5656_v10, %v12167_v53  ;;  %v5658_v14 = vpop.f32.mrb[29].mxu0  ;;  %v9755_v53 = vcombine.low %v1089_v3, %v1093_v4  ;;  %v9796_v61 = vcombine.high %v1129_v23, %v1133_v49  ;;  %v1009_v63 = vld [vmem:[%s11337_s14 + $0x1318] sm:$0xff]  ;;  %v9667_v3 = vcombine.low %v1001_v47, %v1005_v60 }
 0x3b4   : > { %v5697_v25 = vpop.f32.mrb[28].mxu1  ;;  %v5659_v21 = vadd.f32 %v5658_v14, %v12169_v62  ;;  %v5660_v16 = vpop.f32.mrb[30].mxu0  ;;  %5961 = vmatpush1.bf16.msra.mxu0 %v9619_v6  ;;  %v1013_v0 = vld [vmem:[%s11337_s14 + $0x1338] sm:$0xff]  ;;  %v9795_v4 = vcombine.low %v1129_v23, %v1133_v49 }
 0x3b5   : > { %v5699_v43 = vpop.f32.mrb[29].mxu1  ;;  %v12241_v18 = vadd.f32 %v5697_v25, %v5657_v40  ;;  %v5661_v22 = vpop.f32.mrb[31].mxu0  ;;  %5962 = vmatprep.subr.bf16.mxu0 %v9628_v9  ;;  %v1137_v1 = vld [vmem:[%s11337_s14 + $0x1718] sm:$0xff]  ;;  %v9676_v6 = vcombine.high %v1009_v63, %v1013_v0  ;;  %v9675_v13 = vcombine.low %v1009_v63, %v1013_v0 }
 0x3b6   : > { %v5701_v19 = vpop.f32.mrb[30].mxu1  ;;  %6002 = vmatpush1.bf16.msra.mxu1 %v9747_v7  ;;  %v12243_v24 = vadd.f32 %v5699_v43, %v5659_v21  ;;  %v1141_v2 = vld [vmem:[%s11337_s14 + $0x1738] sm:$0xff] }
 0x3b7   : > { %v5702_v62 = vpop.f32.mrb[31].mxu1  ;;  %6003 = vmatprep.subr.bf16.mxu1 %v9756_v11  ;;  %v9804_v7 = vcombine.high %v1137_v1, %v1141_v2  ;;  %v1017_v9 = vld [vmem:[%s11337_s14 + $0x1358] sm:$0xff]  ;;  %v9803_v40 = vcombine.low %v1137_v1, %v1141_v2 }
 0x3b8   : > { %5963 = vmatpush1.bf16.msra.mxu0 %v9627_v55  ;;  %v1021_v10 = vld [vmem:[%s11337_s14 + $0x1378] sm:$0xff] }
 0x3b9   : > { %5964 = vmatprep.subr.bf16.mxu0 %v9636_v28  ;;  %v1145_v11 = vld [vmem:[%s11337_s14 + $0x1758] sm:$0xff]  ;;  %v9684_v25 = vcombine.high %v1017_v9, %v1021_v10  ;;  %v9683_v16 = vcombine.low %v1017_v9, %v1021_v10 }
 0x3ba   : > { %6004 = vmatpush1.bf16.msra.mxu1 %v9755_v53  ;;  %v1149_v12 = vld [vmem:[%s11337_s14 + $0x1778] sm:$0xff] }
 0x3bb   : > { %6005 = vmatprep.subr.bf16.mxu1 %v9764_v30  ;;  %v9812_v14 = vcombine.high %v1145_v11, %v1149_v12  ;;  %v1025_v17 = vld [vmem:[%s11337_s14 + $0x1398] sm:$0xff]  ;;  %v9811_v55 = vcombine.low %v1145_v11, %v1149_v12 }
 0x3bc   : > { %5965 = vmatpush1.bf16.msra.mxu0 %v9635_v27  ;;  %v1029_v15 = vld [vmem:[%s11337_s14 + $0x13b8] sm:$0xff] }
 0x3bd   : > { %5966 = vmatprep.subr.bf16.mxu0 %v9644_v29  ;;  %v1153_v21 = vld [vmem:[%s11337_s14 + $0x1798] sm:$0xff]  ;;  %v9692_v19 = vcombine.high %v1025_v17, %v1029_v15  ;;  %v9691_v54 = vcombine.low %v1025_v17, %v1029_v15 }
 0x3be   : > { %6006 = vmatpush1.bf16.msra.mxu1 %v9763_v39  ;;  %v1157_v43 = vld [vmem:[%s11337_s14 + $0x17b8] sm:$0xff] }
 0x3bf   : > { %6007 = vmatprep.subr.bf16.mxu1 %v9772_v46  ;;  %v9820_v22 = vcombine.high %v1153_v21, %v1157_v43  ;;  %v1033_v53 = vld [vmem:[%s11337_s14 + $0x13d8] sm:$0xff]  ;;  %v9819_v26 = vcombine.low %v1153_v21, %v1157_v43 }
 0x3c0   : > { %5967 = vmatpush1.bf16.msra.mxu0 %v9643_v37  ;;  %v1037_v28 = vld [vmem:[%s11337_s14 + $0x13f8] sm:$0xff] }
 0x3c1   : > { %5968 = vmatprep.subr.bf16.mxu0 %v9652_v41  ;;  %v1161_v62 = vld [vmem:[%s11337_s14 + $0x17d8] sm:$0xff]  ;;  %v9700_v42 = vcombine.high %v1033_v53, %v1037_v28  ;;  %v9699_v27 = vcombine.low %v1033_v53, %v1037_v28  ;;  %v10323_v53 = vld [vmem:[#allocation9 + $0x4] ss:$16 sps:$4 sm:$0xff] (!%p9829_p0)  }
 0x3c2   : > { %6008 = vmatpush1.bf16.msra.mxu1 %v9771_v36  ;;  %v1165_v30 = vld [vmem:[%s11337_s14 + $0x17f8] sm:$0xff] }
 0x3c3   : > { %6009 = vmatprep.subr.bf16.mxu1 %v9780_v38  ;;  %v9828_v34 = vcombine.high %v1161_v62, %v1165_v30  ;;  %v9827_v39 = vcombine.low %v1161_v62, %v1165_v30  ;;  %v395_v38 = vld [vmem:[#allocation2 + $0x28] sm:$0xff]  ;;  %v397_v15 = vld [vmem:[#allocation2 + $0x38] sm:$0xff]  ;;  %v10327_v62 = vld [vmem:[#allocation9] ss:$16 sps:$4 sm:$0xff] (!%p9829_p0)  }
 0x3c4   : > { %5969 = vmatpush1.bf16.msra.mxu0 %v9651_v58  ;;  %v10325_v28 = vld [vmem:[#allocation9 + $0xc] ss:$16 sps:$4 sm:$0xff] (!%p9829_p0)   ;;  %v10328_v30 = vld [vmem:[#allocation9 + $0x8] ss:$16 sps:$4 sm:$0xff] (!%p9829_p0)  }
 0x3c5   : > { %5970 = vmatprep.subr.bf16.mxu0 %v9660_v59 }
 0x3c6   : > { %6010 = vmatpush1.bf16.msra.mxu1 %v9779_v48 }
 0x3c7   : > { %6011 = vmatprep.subr.bf16.mxu1 %v9788_v50 }
 0x3c8   : > { %5971 = vmatpush1.bf16.msra.mxu0 %v9659_v51 }
 0x3c9   : > { %5972 = vmatprep.subr.bf16.mxu0 %v9668_v57 }
 0x3ca   : > { %6012 = vmatpush1.bf16.msra.mxu1 %v9787_v56 }
 0x3cb   : > { %6013 = vmatprep.subr.bf16.mxu1 %v9796_v61 }
 0x3cc   : > { %5973 = vmatpush1.bf16.msra.mxu0 %v9667_v3 }
 0x3cd   : > { %5974 = vmatprep.subr.bf16.mxu0 %v9676_v6 }
 0x3ce   : > { %6014 = vmatpush1.bf16.msra.mxu1 %v9795_v4 }
 0x3cf   : > { %6015 = vmatprep.subr.bf16.mxu1 %v9804_v7 }
 0x3d0   : > { %5975 = vmatpush1.bf16.msra.mxu0 %v9675_v13  ;;  %v396_v13 = vld [vmem:[#allocation2 + $0x30] sm:$0xff] }
 0x3d1   : > { %5976 = vmatprep.subr.bf16.mxu0 %v9684_v25 }
 0x3d2   : > { %6016 = vmatpush1.bf16.msra.mxu1 %v9803_v40 }
 0x3d3   : > { %6017 = vmatprep.subr.bf16.mxu1 %v9812_v14 }
 0x3d4   : > { %5977 = vmatpush1.bf16.msra.mxu0 %v9683_v16 }
 0x3d5   : > { %5978 = vmatprep.subr.bf16.mxu0 %v9692_v19 }
 0x3d6   : > { %6018 = vmatpush1.bf16.msra.mxu1 %v9811_v55 }
 0x3d7   : > { %6019 = vmatprep.subr.bf16.mxu1 %v9820_v22 }
 0x3d8   : > { %5979 = vmatpush1.bf16.msra.mxu0 %v9691_v54  ;;  %v10329_v54 = vld [vmem:[#allocation9 + $0x24] ss:$16 sps:$4 sm:$0xff] (!%p9829_p0)  }
 0x3d9   : > { %5980 = vmatprep.subr.bf16.mxu0 %v9700_v42  ;;  %v10333_v42 = vld [vmem:[#allocation9 + $0x20] ss:$16 sps:$4 sm:$0xff] (!%p9829_p0)  }
 0x3da   : > { %6020 = vmatpush1.bf16.msra.mxu1 %v9819_v26  ;;  %v10331_v26 = vld [vmem:[#allocation9 + $0x2c] ss:$16 sps:$4 sm:$0xff] (!%p9829_p0)  }
 0x3db   : > { %6021 = vmatprep.subr.bf16.mxu1 %v9828_v34  ;;  %v10334_v34 = vld [vmem:[#allocation9 + $0x28] ss:$16 sps:$4 sm:$0xff] (!%p9829_p0)  }
 0x3dc   : > { %5981 = vmatpush1.bf16.msra.mxu0 %v9699_v27  ;;  %v10335_v27 = vld [vmem:[#allocation9 + $0x44] ss:$16 sps:$4 sm:$0xff] (!%p9829_p0)  }
 0x3dd   : > { %8025 = vmatprep.subr.bf16.mxu0 (!%p9829_p0), %v10323_v53  ;;  %v10400_v53 = vld [vmem:[#allocation9 + $0x188] ss:$16 sps:$4 sm:$0xff] (!%p9829_p0)  }
 0x3de   : > { %6022 = vmatpush1.bf16.msra.mxu1 %v9827_v39  ;;  %v10337_v39 = vld [vmem:[#allocation9 + $0x4c] ss:$16 sps:$4 sm:$0xff] (!%p9829_p0)  }
 0x3df   : > { %5983 = vmatmul.mubr.bf16.vlgmr.msra.gmra.mrb[44].mxu0 %v11631_v5  ;;  %8189 = vmatprep.subr.bf16.mxu1 (!%p9829_p0), %v10325_v28 }
 0x3e0   : > { %8026 = vmatpush1.bf16.msra.mxu0 (!%p9829_p0), %v10327_v62 }
 0x3e1   : > { %6024 = vmatmul.mubr.bf16.vlgmr.msra.gmra.mrb[44].mxu1 %v11637_v8  ;;  %8027 = vmatprep.subr.bf16.mxu0 (!%p9829_p0), %v10329_v54  ;;  %v10401_v54 = vld [vmem:[#allocation9 + $0x1a4] ss:$16 sps:$4 sm:$0xff] (!%p9829_p0)  }
 0x3e2   : > { %8190 = vmatpush1.bf16.msra.mxu1 (!%p9829_p0), %v10328_v30 }
 0x3e3   : > { %8191 = vmatprep.subr.bf16.mxu1 (!%p9829_p0), %v10331_v26  ;;  %v10403_v26 = vld [vmem:[#allocation9 + $0x1ac] ss:$16 sps:$4 sm:$0xff] (!%p9829_p0)  }
 0x3e4   : > { %8028 = vmatpush1.bf16.msra.mxu0 (!%p9829_p0), %v10333_v42 }
 0x3e5   : > { %8029 = vmatprep.subr.bf16.mxu0 (!%p9829_p0), %v10335_v27 }
 0x3e6   : > { %8192 = vmatpush1.bf16.msra.mxu1 (!%p9829_p0), %v10334_v34 }
 0x3e7   : > { %8193 = vmatprep.subr.bf16.mxu1 (!%p9829_p0), %v10337_v39 }
 0x3f2   : > { %v5738_v29 = vpop.f32.mrb[32].mxu0 }
 0x3f3   : > { %v5739_v46 = vadd.f32 %v5738_v29, %v12241_v18  ;;  %v5740_v32 = vpop.f32.mrb[33].mxu0  ;;  %v10339_v29 = vld [vmem:[#allocation9 + $0x40] ss:$16 sps:$4 sm:$0xff] (!%p9829_p0)  }
 0x3f4   : > { %v5779_v31 = vpop.f32.mrb[32].mxu1  ;;  %v5741_v35 = vadd.f32 %v5740_v32, %v12243_v24  ;;  %v5742_v36 = vpop.f32.mrb[34].mxu0  ;;  %v10343_v32 = vld [vmem:[#allocation9 + $0x6c] ss:$16 sps:$4 sm:$0xff] (!%p9829_p0)   ;;  %8030 = vmatpush1.bf16.msra.mxu0 (!%p9829_p0), %v10339_v29  ;;  %v10405_v29 = vld [vmem:[#allocation9 + $0x1a0] ss:$16 sps:$4 sm:$0xff] (!%p9829_p0)  }
 0x3f5   : > { %v5781_v37 = vpop.f32.mrb[33].mxu1  ;;  %v5780_v41 = vadd.f32 %v5779_v31, %v5739_v46  ;;  %v5743_v45 = vpop.f32.mrb[35].mxu0  ;;  %v10340_v46 = vld [vmem:[#allocation9 + $0x48] ss:$16 sps:$4 sm:$0xff] (!%p9829_p0)   ;;  %v10341_v31 = vld [vmem:[#allocation9 + $0x64] ss:$16 sps:$4 sm:$0xff] (!%p9829_p0)  }
 0x3f6   : > { %v5783_v44 = vpop.f32.mrb[34].mxu1  ;;  %v5782_v52 = vadd.f32 %v5781_v37, %v5741_v35  ;;  %8194 = vmatpush1.bf16.msra.mxu1 (!%p9829_p0), %v10340_v46  ;;  %v10346_v35 = vld [vmem:[#allocation9 + $0x68] ss:$16 sps:$4 sm:$0xff] (!%p9829_p0)   ;;  %v10347_v37 = vld [vmem:[#allocation9 + $0x84] ss:$16 sps:$4 sm:$0xff] (!%p9829_p0)   ;;  %8031 = vmatprep.subr.bf16.mxu0 (!%p9829_p0), %v10341_v31 }
 0x3f7   : > { %v5784_v20 = vpop.f32.mrb[35].mxu1  ;;  %v6036_v58 = vadd.f32 %v5780_v41, %v394_v33  ;;  %v10345_v33 = vld [vmem:[#allocation9 + $0x60] ss:$16 sps:$4 sm:$0xff] (!%p9829_p0)   ;;  %8195 = vmatprep.subr.bf16.mxu1 (!%p9829_p0), %v10343_v32  ;;  %v10349_v36 = vld [vmem:[#allocation9 + $0x8c] ss:$16 sps:$4 sm:$0xff] (!%p9829_p0)  }
 0x3f8   : > { %v6037_v5 = vadd.f32 %v5782_v52, %v395_v38  ;;  %v10351_v41 = vld [vmem:[#allocation9 + $0x80] ss:$16 sps:$4 sm:$0xff] (!%p9829_p0)   ;;  %v10352_v38 = vld [vmem:[#allocation9 + $0x88] ss:$16 sps:$4 sm:$0xff] (!%p9829_p0)   ;;  %8032 = vmatpush1.bf16.msra.mxu0 (!%p9829_p0), %v10345_v33  ;;  %v10353_v44 = vld [vmem:[#allocation9 + $0xa4] ss:$16 sps:$4 sm:$0xff] (!%p9829_p0)  }
 0x3f9   : > { %6044 = vst [vmem:[#allocation2 + $0x20] sm:$0xff] %v6036_v58  ;;  %8033 = vmatprep.subr.bf16.mxu0 (!%p9829_p0), %v10347_v37  ;;  %v10355_v45 = vld [vmem:[#allocation9 + $0xac] ss:$16 sps:$4 sm:$0xff] (!%p9829_p0)   ;;  %v10357_v52 = vld [vmem:[#allocation9 + $0xa0] ss:$16 sps:$4 sm:$0xff] (!%p9829_p0)  }
 0x3fa   : > { %6045 = vst [vmem:[#allocation2 + $0x28] sm:$0xff] %v6037_v5  ;;  %8196 = vmatpush1.bf16.msra.mxu1 (!%p9829_p0), %v10346_v35  ;;  %v10358_v20 = vld [vmem:[#allocation9 + $0xa8] ss:$16 sps:$4 sm:$0xff] (!%p9829_p0)   ;;  %v10359_v58 = vld [vmem:[#allocation9 + $0xc4] ss:$16 sps:$4 sm:$0xff] (!%p9829_p0)  }
 0x3fb   : > { %8197 = vmatprep.subr.bf16.mxu1 (!%p9829_p0), %v10349_v36  ;;  %v10361_v5 = vld [vmem:[#allocation9 + $0xcc] ss:$16 sps:$4 sm:$0xff] (!%p9829_p0)   ;;  %v10406_v31 = vld [vmem:[#allocation9 + $0x1a8] ss:$16 sps:$4 sm:$0xff] (!%p9829_p0)   ;;  %v10407_v37 = vld [vmem:[#allocation9 + $0x1c4] ss:$16 sps:$4 sm:$0xff] (!%p9829_p0)  }
 0x3fc   : > { %8034 = vmatpush1.bf16.msra.mxu0 (!%p9829_p0), %v10351_v41  ;;  %v10409_v36 = vld [vmem:[#allocation9 + $0x1cc] ss:$16 sps:$4 sm:$0xff] (!%p9829_p0)  }
 0x3fd   : > { %8035 = vmatprep.subr.bf16.mxu0 (!%p9829_p0), %v10353_v44 }
 0x3fe   : > { %8198 = vmatpush1.bf16.msra.mxu1 (!%p9829_p0), %v10352_v38 }
 0x3ff   : > { %8199 = vmatprep.subr.bf16.mxu1 (!%p9829_p0), %v10355_v45 }
 0x400   : > { %8036 = vmatpush1.bf16.msra.mxu0 (!%p9829_p0), %v10357_v52  ;;  %v10411_v52 = vld [vmem:[#allocation9 + $0x1c0] ss:$16 sps:$4 sm:$0xff] (!%p9829_p0)  }
 0x401   : > { %8037 = vmatprep.subr.bf16.mxu0 (!%p9829_p0), %v10359_v58 }
 0x402   : > { %8200 = vmatpush1.bf16.msra.mxu1 (!%p9829_p0), %v10358_v20  ;;  %v10412_v20 = vld [vmem:[#allocation9 + $0x1c8] ss:$16 sps:$4 sm:$0xff] (!%p9829_p0)  }
 0x403   : > { %8201 = vmatprep.subr.bf16.mxu1 (!%p9829_p0), %v10361_v5  ;;  %v10413_v5 = vld [vmem:[#allocation9 + $0x1e4] ss:$16 sps:$4 sm:$0xff] (!%p9829_p0)  }
 0x432   : > { %v5820_v8 = vpop.f32.mrb[36].mxu0 }
 0x433   : > { %v5822_v18 = vpop.f32.mrb[37].mxu0 }
 0x434   : > { %v5861_v48 = vpop.f32.mrb[36].mxu1  ;;  %v5824_v47 = vpop.f32.mrb[38].mxu0 }
 0x435   : > { %v5862_v59 = vadd.f32 %v5861_v48, %v5820_v8  ;;  %v5863_v50 = vpop.f32.mrb[37].mxu1  ;;  %v5825_v23 = vpop.f32.mrb[39].mxu0  ;;  %v10363_v8 = vld [vmem:[#allocation9 + $0xc0] ss:$16 sps:$4 sm:$0xff] (!%p9829_p0)   ;;  %v10364_v48 = vld [vmem:[#allocation9 + $0xc8] ss:$16 sps:$4 sm:$0xff] (!%p9829_p0)  }
 0x436   : > { %v5864_v60 = vadd.f32 %v5863_v50, %v5822_v18  ;;  %v5865_v24 = vpop.f32.mrb[38].mxu1  ;;  %v10365_v18 = vld [vmem:[#allocation9 + $0xe4] ss:$16 sps:$4 sm:$0xff] (!%p9829_p0)   ;;  %v10369_v50 = vld [vmem:[#allocation9 + $0xe0] ss:$16 sps:$4 sm:$0xff] (!%p9829_p0)   ;;  %8038 = vmatpush1.bf16.msra.mxu0 (!%p9829_p0), %v10363_v8  ;;  %8202 = vmatpush1.bf16.msra.mxu1 (!%p9829_p0), %v10364_v48 }
 0x437   : > { %v5866_v49 = vpop.f32.mrb[39].mxu1  ;;  %v10370_v47 = vld [vmem:[#allocation9 + $0xe8] ss:$16 sps:$4 sm:$0xff] (!%p9829_p0)   ;;  %8039 = vmatprep.subr.bf16.mxu0 (!%p9829_p0), %v10365_v18  ;;  %v10373_v24 = vld [vmem:[#allocation9 + $0x10c] ss:$16 sps:$4 sm:$0xff] (!%p9829_p0)  }
 0x438   : > { %v10375_v23 = vld [vmem:[#allocation9 + $0x100] ss:$16 sps:$4 sm:$0xff] (!%p9829_p0)   ;;  %v10376_v49 = vld [vmem:[#allocation9 + $0x108] ss:$16 sps:$4 sm:$0xff] (!%p9829_p0)  }
 0x43a   : > { %8040 = vmatpush1.bf16.msra.mxu0 (!%p9829_p0), %v10369_v50 }
 0x472   : > { %v5902_v51 = vpop.f32.mrb[40].mxu0 }
 0x473   : > { %v5903_v56 = vadd.f32 %v5902_v51, %v5862_v59  ;;  %v5904_v61 = vpop.f32.mrb[41].mxu0  ;;  %v10367_v59 = vld [vmem:[#allocation9 + $0xec] ss:$16 sps:$4 sm:$0xff] (!%p9829_p0)   ;;  %v10377_v51 = vld [vmem:[#allocation9 + $0x124] ss:$16 sps:$4 sm:$0xff] (!%p9829_p0)  }
 0x474   : > { %v5943_v57 = vpop.f32.mrb[40].mxu1  ;;  %v5905_v63 = vadd.f32 %v5904_v61, %v5864_v60  ;;  %v5906_v1 = vpop.f32.mrb[42].mxu0  ;;  %v10371_v60 = vld [vmem:[#allocation9 + $0x104] ss:$16 sps:$4 sm:$0xff] (!%p9829_p0)   ;;  %8203 = vmatprep.subr.bf16.mxu1 (!%p9829_p0), %v10367_v59  ;;  %v10382_v61 = vld [vmem:[#allocation9 + $0x128] ss:$16 sps:$4 sm:$0xff] (!%p9829_p0)  }
 0x475   : > { %v5945_v0 = vpop.f32.mrb[41].mxu1  ;;  %v5944_v2 = vadd.f32 %v5943_v57, %v5903_v56  ;;  %v5907_v4 = vpop.f32.mrb[43].mxu0  ;;  %8204 = vmatpush1.bf16.msra.mxu1 (!%p9829_p0), %v10370_v47  ;;  %8041 = vmatprep.subr.bf16.mxu0 (!%p9829_p0), %v10371_v60  ;;  %v10379_v56 = vld [vmem:[#allocation9 + $0x12c] ss:$16 sps:$4 sm:$0xff] (!%p9829_p0)   ;;  %v10381_v57 = vld [vmem:[#allocation9 + $0x120] ss:$16 sps:$4 sm:$0xff] (!%p9829_p0)  }
 0x476   : > { %v5947_v3 = vpop.f32.mrb[42].mxu1  ;;  %v5946_v6 = vadd.f32 %v5945_v0, %v5905_v63  ;;  %8205 = vmatprep.subr.bf16.mxu1 (!%p9829_p0), %v10373_v24  ;;  %8042 = vmatpush1.bf16.msra.mxu0 (!%p9829_p0), %v10375_v23  ;;  %v10383_v63 = vld [vmem:[#allocation9 + $0x144] ss:$16 sps:$4 sm:$0xff] (!%p9829_p0)   ;;  %v10385_v0 = vld [vmem:[#allocation9 + $0x14c] ss:$16 sps:$4 sm:$0xff] (!%p9829_p0)  }
 0x477   : > { %v5948_v7 = vpop.f32.mrb[43].mxu1  ;;  %8043 = vmatprep.subr.bf16.mxu0 (!%p9829_p0), %v10377_v51  ;;  %v10387_v1 = vld [vmem:[#allocation9 + $0x140] ss:$16 sps:$4 sm:$0xff] (!%p9829_p0)   ;;  %v10389_v3 = vld [vmem:[#allocation9 + $0x164] ss:$16 sps:$4 sm:$0xff] (!%p9829_p0)  }
 0x478   : > { %v10391_v4 = vld [vmem:[#allocation9 + $0x16c] ss:$16 sps:$4 sm:$0xff] (!%p9829_p0)   ;;  %v10394_v7 = vld [vmem:[#allocation9 + $0x168] ss:$16 sps:$4 sm:$0xff] (!%p9829_p0)   ;;  %v10417_v23 = vld [vmem:[#allocation9 + $0x1e0] ss:$16 sps:$4 sm:$0xff] (!%p9829_p0)  }
 0x479   : > { %8206 = vmatpush1.bf16.msra.mxu1 (!%p9829_p0), %v10376_v49  ;;  %v10415_v59 = vld [vmem:[#allocation9 + $0x1ec] ss:$16 sps:$4 sm:$0xff] (!%p9829_p0)   ;;  %v10418_v49 = vld [vmem:[#allocation9 + $0x1e8] ss:$16 sps:$4 sm:$0xff] (!%p9829_p0)  }
 0x47a   : > { %8207 = vmatprep.subr.bf16.mxu1 (!%p9829_p0), %v10379_v56  ;;  %8044 = vmatpush1.bf16.msra.mxu0 (!%p9829_p0), %v10381_v57 }
 0x47b   : > { %8045 = vmatprep.subr.bf16.mxu0 (!%p9829_p0), %v10383_v63  ;;  %v10421_v63 = vld [vmem:[#allocation9 + $0x204] ss:$16 sps:$4 sm:$0xff] (!%p9829_p0)  }
 0x47d   : > { %8208 = vmatpush1.bf16.msra.mxu1 (!%p9829_p0), %v10382_v61 }
 0x47e   : > { %8209 = vmatprep.subr.bf16.mxu1 (!%p9829_p0), %v10385_v0  ;;  %8046 = vmatpush1.bf16.msra.mxu0 (!%p9829_p0), %v10387_v1  ;;  %v10424_v1 = vld [vmem:[#allocation9 + $0x20c] ss:$16 sps:$4 sm:$0xff] (!%p9829_p0)  }
 0x47f   : > { %8047 = vmatprep.subr.bf16.mxu0 (!%p9829_p0), %v10389_v3 }
 0x4b2   : > { %v5984_v9 = vpop.f32.mrb[44].mxu0 }
 0x4b3   : > { %v5985_v10 = vadd.f32 %v5984_v9, %v5944_v2  ;;  %v5986_v12 = vpop.f32.mrb[45].mxu0  ;;  %v10388_v2 = vld [vmem:[#allocation9 + $0x148] ss:$16 sps:$4 sm:$0xff] (!%p9829_p0)   ;;  %v12282_v9 = vld [vmem:[#allocation2] sm:$0xff] (!%p9829_p0) }
 0x4b4   : > { %v6025_v11 = vpop.f32.mrb[44].mxu1  ;;  %v5987_v40 = vadd.f32 %v5986_v12, %v5946_v6  ;;  %v5988_v14 = vpop.f32.mrb[46].mxu0  ;;  %6051 = sbr.rel (%p9829_p0) target bundleno = 1994 (0x7ca), region = 84  ;;  %v10393_v6 = vld [vmem:[#allocation9 + $0x160] ss:$16 sps:$4 sm:$0xff] (!%p9829_p0)   ;;  %v12288_v12 = vld [vmem:[#allocation2 + $0x18] sm:$0xff] (!%p9829_p0)  ;;  %8210 = vmatpush1.bf16.msra.mxu1 (!%p9829_p0), %v10388_v2 }
 0x4b5   : > { %v6027_v25 = vpop.f32.mrb[45].mxu1  ;;  %v6026_v17 = vadd.f32 %v6025_v11, %v5985_v10  ;;  %v5989_v43 = vpop.f32.mrb[47].mxu0  ;;  %v12284_v10 = vld [vmem:[#allocation2 + $0x8] sm:$0xff] (!%p9829_p0)  ;;  %v12286_v11 = vld [vmem:[#allocation2 + $0x10] sm:$0xff] (!%p9829_p0)  ;;  %v6080_v14 = vrot.slane (!%p9829_p0), %v12288_v12, 4  ;;  %8211 = vmatprep.subr.bf16.mxu1 (!%p9829_p0), %v10391_v4  ;;  %8048 = vmatpush1.bf16.msra.mxu0 (!%p9829_p0), %v10393_v6 }
 0x4b6   : > { %v6029_v21 = vpop.f32.mrb[46].mxu1  ;;  %v6028_v16 = vadd.f32 %v6027_v25, %v5987_v40  ;;  %v6068_v40 = vrot.slane (!%p9829_p0), %v12284_v10, 4  ;;  %v6074_v25 = vrot.slane (!%p9829_p0), %v12286_v11, 4 }
 0x4b7   : > { %v6030_v55 = vpop.f32.mrb[47].mxu1  ;;  %v6038_v19 = vadd.f32 %v6026_v17, %v396_v13  ;;  %v6062_v13 = vrot.slane (!%p9829_p0), %v12282_v9, 4  ;;  %v10395_v17 = vld [vmem:[#allocation9 + $0x184] ss:$16 sps:$4 sm:$0xff] (!%p9829_p0)  }
 0x4b8   : > { %v6039_v22 = vadd.f32 %v6028_v16, %v397_v15  ;;  %v10397_v15 = vld [vmem:[#allocation9 + $0x18c] ss:$16 sps:$4 sm:$0xff] (!%p9829_p0)   ;;  %v6069_v43 = vadd.f32 (!%p9829_p0), %v6068_v40, %v12284_v10  ;;  %v6075_v16 = vadd.f32 (!%p9829_p0), %v6074_v25, %v12286_v11  ;;  %v6081_v55 = vadd.f32 (!%p9829_p0), %v6080_v14, %v12288_v12  ;;  %8212 = vmatpush1.bf16.msra.mxu1 (!%p9829_p0), %v10394_v7 }
 0x4b9   : > { %6046 = vst [vmem:[#allocation2 + $0x30] sm:$0xff] %v6038_v19  ;;  %v6063_v21 = vadd.f32 (!%p9829_p0), %v6062_v13, %v12282_v9  ;;  %v10399_v19 = vld [vmem:[#allocation9 + $0x180] ss:$16 sps:$4 sm:$0xff] (!%p9829_p0)   ;;  %8049 = vmatprep.subr.bf16.mxu0 (!%p9829_p0), %v10395_v17  ;;  %8213 = vmatprep.subr.bf16.mxu1 (!%p9829_p0), %v10397_v15 }
 0x4ba   : > { %6047 = vst [vmem:[#allocation2 + $0x38] sm:$0xff] %v6039_v22  ;;  %v6070_v28 = vrot.slane (!%p9829_p0), %v6069_v43, 2  ;;  %v6076_v62 = vrot.slane (!%p9829_p0), %v6075_v16, 2  ;;  %v6082_v30 = vrot.slane (!%p9829_p0), %v6081_v55, 2  ;;  %8050 = vmatpush1.bf16.msra.mxu0 (!%p9829_p0), %v10399_v19 }
 0x4bb   : > { %v6064_v22 = vrot.slane %v6063_v21, 2  ;;  %8051 = vmatprep.subr.bf16.mxu0 %v10401_v54 }
 0x4bc   : > { %v6071_v34 = vadd.f32 %v6070_v28, %v6069_v43  ;;  %v6077_v27 = vadd.f32 %v6076_v62, %v6075_v16  ;;  %v6083_v39 = vadd.f32 %v6082_v30, %v6081_v55  ;;  %8214 = vmatpush1.bf16.msra.mxu1 %v10400_v53 }
 0x4bd   : > { %v6065_v42 = vadd.f32 %v6064_v22, %v6063_v21  ;;  %8215 = vmatprep.subr.bf16.mxu1 %v10403_v26 }
 0x4be   : > { %v6072_v32 = vrot.slane %v6071_v34, 1  ;;  %v6078_v33 = vrot.slane %v6077_v27, 1  ;;  %v6084_v35 = vrot.slane %v6083_v39, 1  ;;  %8052 = vmatpush1.bf16.msra.mxu0 %v10405_v29 }
 0x4bf   : > { %v6066_v46 = vrot.slane %v6065_v42, 1  ;;  %8053 = vmatprep.subr.bf16.mxu0 %v10407_v37  ;;  %v6220_v37 = vlaneseq }
 0x4c0   : > { %v6073_v38 = vadd.f32 %v6072_v32, %v6071_v34  ;;  %v6079_v44 = vadd.f32 %v6078_v33, %v6077_v27  ;;  %v6085_v45 = vadd.f32 %v6084_v35, %v6083_v39  ;;  %8216 = vmatpush1.bf16.msra.mxu1 %v10406_v31  ;;  %v11057_v33 = vmov 1983009808  }
 0x4c1   : > { %v6067_v41 = vadd.f32 %v6066_v46, %v6065_v42  ;;  %8217 = vmatprep.subr.bf16.mxu1 %v10409_v36  ;;  %v6218_v35 = vunpack.c.l.s4 %v11057_v33 }
 0x4c2   : > { %v12300_v8 = vmul.f32 0.125, %v6073_v38  ;;  %v12302_v48 = vmul.f32 0.125, %v6079_v44  ;;  %v12304_v18 = vmul.f32 0.125, %v6085_v45  ;;  %8054 = vmatpush1.bf16.msra.mxu0 %v10411_v52 }
 0x4c3   : > { %v12298_v58 = vmul.f32 0.125, %v6067_v41  ;;  %8055 = vmatprep.subr.bf16.mxu0 %v10413_v5  ;;  %v6219_v36 = vunpack.c.0.s8 %v6218_v35  ;;  %v6221_v41 = vshrl.u32 %v6220_v37, 7  ;;  %v10422_v35 = vld [vmem:[#allocation9 + $0x208] ss:$16 sps:$4 sm:$0xff]  }
 0x4c4   : > { %v6120_v47 = vsub.f32 %v12284_v10, %v12300_v8  ;;  %v6121_v60 = vsub.f32 %v12286_v11, %v12302_v48  ;;  %v6122_v24 = vsub.f32 %v12288_v12, %v12304_v18  ;;  %8218 = vmatpush1.bf16.msra.mxu1 %v10412_v20 }
 0x4c5   : > { %v6119_v50 = vsub.f32 %v12282_v9, %v12298_v58  ;;  %8219 = vmatprep.subr.bf16.mxu1 %v10415_v59  ;;  %v12314_v44 = vsub.s32 %v6219_v36, %v6221_v41  ;;  %v10427_v36 = vld [vmem:[#allocation9 + $0x224] ss:$16 sps:$4 sm:$0xff]  }
 0x4c6   : > { %v6128_v56 = vmul.f32 %v6120_v47, %v6120_v47  ;;  %v6129_v57 = vmul.f32 %v6121_v60, %v6121_v60  ;;  %v6130_v61 = vmul.f32 %v6122_v24, %v6122_v24  ;;  %8056 = vmatpush1.bf16.msra.mxu0 %v10417_v23  ;;  %v6060_v60 = vld [vmem:[#allocation8] sm:$0xff]  ;;  %v12318_v24 = vsub.s32 0, %v6221_v41 }
 0x4c7   : > { %v6127_v51 = vmul.f32 %v6119_v50, %v6119_v50  ;;  %8066 = vmatprep.subr.bf16.mxu0 %v10421_v63 }
 0x4c8   : > { %v6141_v2 = vrot.slane %v6128_v56, 4  ;;  %v6147_v3 = vrot.slane %v6129_v57, 4  ;;  %v6153_v4 = vrot.slane %v6130_v61, 4  ;;  %8220 = vmatpush1.bf16.msra.mxu1 %v10418_v49  ;;  %v12320_v49 = vsub.s32 2, %v6221_v41 }
 0x4c9   : > { %v6135_v0 = vrot.slane %v6127_v51, 4  ;;  %8230 = vmatprep.subr.bf16.mxu1 %v10424_v1 }
 0x4ca   : > { %v6142_v7 = vadd.f32 %v6141_v2, %v6128_v56  ;;  %v6148_v13 = vadd.f32 %v6147_v3, %v6129_v57  ;;  %v6154_v40 = vadd.f32 %v6153_v4, %v6130_v61  ;;  %v12324_v56 = vsub.s32 6, %v6221_v41 }
 0x4cb   : > { %v6136_v6 = vadd.f32 %v6135_v0, %v6127_v51  ;;  %v12322_v51 = vsub.s32 4, %v6221_v41 }
 0x4cc   : > { %v6143_v14 = vrot.slane %v6142_v7, 2  ;;  %v6149_v17 = vrot.slane %v6148_v13, 2  ;;  %v6155_v15 = vrot.slane %v6154_v40, 2 }
 0x4cd   : > { %v6137_v25 = vrot.slane %v6136_v6, 2 }
 0x4ce   : > { %v6144_v43 = vadd.f32 %v6143_v14, %v6142_v7  ;;  %v6150_v16 = vadd.f32 %v6149_v17, %v6148_v13  ;;  %v6156_v55 = vadd.f32 %v6155_v15, %v6154_v40 }
 0x4cf   : > { %v6138_v21 = vadd.f32 %v6137_v25, %v6136_v6 }
 0x4d0   : > { %v6145_v22 = vrot.slane %v6144_v43, 1  ;;  %v6151_v53 = vrot.slane %v6150_v16, 1  ;;  %v6157_v28 = vrot.slane %v6156_v55, 1 }
 0x4d1   : > { %v6139_v19 = vrot.slane %v6138_v21, 1 }
 0x4d2   : > { %v6146_v30 = vadd.f32 %v6145_v22, %v6144_v43  ;;  %v6152_v54 = vadd.f32 %v6151_v53, %v6150_v16  ;;  %v6158_v26 = vadd.f32 %v6157_v28, %v6156_v55  ;;  %v12343_v43 = vsub.s32 3, %v6221_v41 }
 0x4d3   : > { %v6140_v62 = vadd.f32 %v6139_v19, %v6138_v21  ;;  %v12345_v16 = vsub.s32 7, %v6221_v41  ;;  %v12347_v55 = vsub.s32 5, %v6221_v41 }
 0x4d4   : > { %v6184_v34 = vmul.f32 0.125, %v6146_v30  ;;  %v6185_v27 = vmul.f32 0.125, %v6152_v54  ;;  %v6186_v39 = vmul.f32 0.125, %v6158_v26 }
 0x4d5   : > { %v6183_v42 = vmul.f32 0.125, %v6140_v62 }
 0x4d6   : > { %v6192_v46 = vadd.f32 1e-05, %v6184_v34  ;;  %v6193_v31 = vadd.f32 1e-05, %v6185_v27  ;;  %v6194_v32 = vadd.f32 1e-05, %v6186_v39 }
 0x4d7   : > { %v6191_v29 = vadd.f32 1e-05, %v6183_v42 }
 0x4d9   : > { %10739 = vrsqrt.f32 %v6191_v29 }
 0x4da   : > { %10741 = vrsqrt.f32 %v6192_v46 }
 0x4db   : > { %10743 = vrsqrt.f32 %v6193_v31 }
 0x4dc   : > { %10745 = vrsqrt.f32 %v6194_v32  ;;  %v10419_v32 = vld [vmem:[#allocation9 + $0x200] ss:$16 sps:$4 sm:$0xff]  }
 0x4e3   : > { %v10740_v38 = vpop.eup %10739 }
 0x4e4   : > { %v10742_v45 = vpop.eup %10741 }
 0x4e5   : > { %v10744_v52 = vpop.eup %10743  ;;  %v6215_v20 = vcombine.low %v10740_v38, %v10742_v45  ;;  %v10425_v45 = vld [vmem:[#allocation9 + $0x220] ss:$16 sps:$4 sm:$0xff]  }
 0x4e6   : > { %v10746_v5 = vpop.eup %10745 }
 0x4e7   : > { %v6216_v59 = vcombine.low %v10744_v52, %v10746_v5  ;;  %v6223_v50 = vrot.slane %v6215_v20, %v12314_v44  ;;  %v10428_v52 = vld [vmem:[#allocation9 + $0x228] ss:$16 sps:$4 sm:$0xff]   ;;  %v10433_v20 = vld [vmem:[#allocation9 + $0x244] ss:$16 sps:$4 sm:$0xff]   ;;  %v10436_v5 = vld [vmem:[#allocation9 + $0x24c] ss:$16 sps:$4 sm:$0xff]  }
 0x4e9   : > { %v6230_v47 = vrot.slane %v6216_v59, %v12314_v44  ;;  %v10431_v59 = vld [vmem:[#allocation9 + $0x240] ss:$16 sps:$4 sm:$0xff]  }
 0x4eb   : > { %v6231_v23 = vcombine.low %v6223_v50, %v6230_v47  ;;  %v10434_v50 = vld [vmem:[#allocation9 + $0x248] ss:$16 sps:$4 sm:$0xff]   ;;  %v10439_v47 = vld [vmem:[#allocation9 + $0x264] ss:$16 sps:$4 sm:$0xff]  }
 0x4ed   : > { %v6251_v57 = vmul.f32 %v6231_v23, %v6060_v60  ;;  %v10437_v23 = vld [vmem:[#allocation9 + $0x260] ss:$16 sps:$4 sm:$0xff]  }
 0x4ef   : > { %v6258_v61 = vrot.slane %v6251_v57, %v12318_v24  ;;  %v6262_v63 = vrot.slane %v6251_v57, %v12320_v49  ;;  %v6266_v0 = vrot.slane %v6251_v57, %v12322_v51  ;;  %v6270_v1 = vrot.slane %v6251_v57, %v12324_v56  ;;  %v10440_v57 = vld [vmem:[#allocation9 + $0x268] ss:$16 sps:$4 sm:$0xff]  }
 0x4f1   : > { %v6295_v2 = vmul.f32 %v6258_v61, %v12298_v58  ;;  %v6296_v3 = vmul.f32 %v6262_v63, %v12300_v8  ;;  %v6297_v4 = vmul.f32 %v6266_v0, %v12302_v48  ;;  %v6298_v6 = vmul.f32 %v6270_v1, %v12304_v18 }
 0x4f2   : > { %v6362_v7 = vrot.slane %v6266_v0, %v12318_v24  ;;  %v6358_v21 = vrot.slane %v6262_v63, %v12318_v24  ;;  %v12339_v58 = vsub.s32 1, %v6221_v41  ;;  %v6354_v8 = vrot.slane %v6258_v61, %v12318_v24  ;;  %v10430_v41 = vld [vmem:[#allocation9 + $0x22c] ss:$16 sps:$4 sm:$0xff]   ;;  %v10445_v61 = vld [vmem:[#allocation9 + $0x284] ss:$16 sps:$4 sm:$0xff]  }
 0x4f3   : > { %v6311_v13 = vcombine.low %v6295_v2, %v6296_v3  ;;  %v6312_v40 = vcombine.low %v6297_v4, %v6298_v6  ;;  %v6366_v48 = vrot.slane %v6270_v1, %v12318_v24  ;;  %v12362_v63 = vld [vmem:[#allocation2 + $0x20] sm:$0xff]  ;;  %v12364_v0 = vld [vmem:[#allocation2 + $0x28] sm:$0xff]  ;;  %v12366_v2 = vld [vmem:[#allocation2 + $0x30] sm:$0xff] }
 0x4f4   : > { %v6385_v25 = vmul.f32 %v6362_v7, %v12286_v11  ;;  %v6384_v19 = vmul.f32 %v6358_v21, %v12284_v10  ;;  %v6383_v22 = vmul.f32 %v6354_v8, %v12282_v9  ;;  %v10448_v1 = vld [vmem:[#allocation9 + $0x28c] ss:$16 sps:$4 sm:$0xff]   ;;  %v6086_v4 = vrot.slane %v12362_v63, 4 }
 0x4f5   : > { %v6319_v14 = vrot.slane %v6311_v13, %v12314_v44  ;;  %v6326_v17 = vrot.slane %v6312_v40, %v12314_v44  ;;  %v6386_v53 = vmul.f32 %v6366_v48, %v12288_v12  ;;  %v12368_v3 = vld [vmem:[#allocation2 + $0x38] sm:$0xff]  ;;  %v6092_v6 = vrot.slane %v12364_v0, 4  ;;  %v10443_v40 = vld [vmem:[#allocation9 + $0x280] ss:$16 sps:$4 sm:$0xff]  }
 0x4f6   : > { %v6098_v7 = vrot.slane %v12366_v2, 4  ;;  %v6104_v13 = vrot.slane %v12368_v3, 4  ;;  %v10454_v48 = vld [vmem:[#allocation9 + $0x2ac] ss:$16 sps:$4 sm:$0xff]  }
 0x4f7   : > { %v6327_v15 = vcombine.low %v6319_v14, %v6326_v17  ;;  %v6093_v14 = vadd.f32 %v6092_v6, %v12364_v0  ;;  %v10446_v17 = vld [vmem:[#allocation9 + $0x288] ss:$16 sps:$4 sm:$0xff]  }
 0x4f8   : > { %v6099_v21 = vadd.f32 %v6098_v7, %v12366_v2  ;;  %v6105_v8 = vadd.f32 %v6104_v13, %v12368_v3  ;;  %v10467_v7 = vld [vmem:[#allocation9 + $0x300] ss:$16 sps:$4 sm:$0xff]  }
 0x4f9   : > { %v6345_v18 = vrot.slane %v6327_v15, 7  ;;  %v10451_v15 = vld [vmem:[#allocation9 + $0x2a4] ss:$16 sps:$4 sm:$0xff]  }
 0x4fb   : > { %v6349_v11 = vsub.f32 %v6060_v60, %v6345_v18  ;;  %v10442_v60 = vld [vmem:[#allocation9 + $0x26c] ss:$16 sps:$4 sm:$0xff]  }
 0x4fd   : > { %v6400_v28 = vrot.slane %v6349_v11, %v12343_v43  ;;  %v6396_v62 = vrot.slane %v6349_v11, %v12339_v58  ;;  %v6408_v30 = vrot.slane %v6349_v11, %v12345_v16  ;;  %v6404_v54 = vrot.slane %v6349_v11, %v12347_v55 }
 0x4fe   : > { %v6094_v11 = vrot.slane %v6093_v14, 2 }
 0x4ff   : > { %v6440_v26 = vrot.slane %v6400_v28, %v12339_v58  ;;  %v6436_v42 = vrot.slane %v6396_v62, %v12339_v58  ;;  %v6448_v34 = vrot.slane %v6408_v30, %v12339_v58  ;;  %v6444_v10 = vrot.slane %v6404_v54, %v12339_v58  ;;  %v10452_v30 = vld [vmem:[#allocation9 + $0x2a8] ss:$16 sps:$4 sm:$0xff]   ;;  %v10457_v54 = vld [vmem:[#allocation9 + $0x2c4] ss:$16 sps:$4 sm:$0xff]  }
 0x500   : > { %v6095_v62 = vadd.f32 %v6094_v11, %v6093_v14  ;;  %v10475_v14 = vld [vmem:[#allocation9 + $0x324] ss:$16 sps:$4 sm:$0xff]  }
 0x501   : > { %v6466_v27 = vadd.f32 %v6440_v26, %v6384_v19  ;;  %v6465_v9 = vadd.f32 %v6436_v42, %v6383_v22  ;;  %v6468_v39 = vadd.f32 %v6448_v34, %v6386_v53  ;;  %v12360_v12 = vadd.f32 %v6444_v10, %v6385_v25  ;;  %v10449_v53 = vld [vmem:[#allocation9 + $0x2a0] ss:$16 sps:$4 sm:$0xff]   ;;  %v10460_v34 = vld [vmem:[#allocation9 + $0x2cc] ss:$16 sps:$4 sm:$0xff]  }
 0x502   : > { %v6087_v25 = vadd.f32 %v6086_v4, %v12362_v63  ;;  %v6100_v19 = vrot.slane %v6099_v21, 2  ;;  %v6106_v22 = vrot.slane %v6105_v8, 2 }
 0x503   : > { %v6474_v29 = vmax.f32 %v6466_v27, 0.0  ;;  %v6473_v46 = vmax.f32 %v6465_v9, 0.0  ;;  %v6476_v31 = vmax.f32 %v6468_v39, 0.0  ;;  %v6096_v27 = vrot.slane %v6095_v62, 1 }
 0x504   : > { %v6088_v18 = vrot.slane %v6087_v25, 2  ;;  %v6101_v26 = vadd.f32 %v6100_v19, %v6099_v21  ;;  %v6107_v42 = vadd.f32 %v6106_v22, %v6105_v8  ;;  %v10478_v21 = vld [vmem:[#allocation9 + $0x32c] ss:$16 sps:$4 sm:$0xff]   ;;  %v10473_v19 = vld [vmem:[#allocation9 + $0x320] ss:$16 sps:$4 sm:$0xff]  }
 0x505   : > { %v6482_v33 = vpack.c.bf16 %v6474_v29, %v6474_v29  ;;  %v6481_v37 = vpack.c.bf16 %v6473_v46, %v6473_v46  ;;  %v6484_v38 = vpack.c.bf16 %v6476_v31, %v6476_v31  ;;  %v10455_v29 = vld [vmem:[#allocation9 + $0x2c0] ss:$16 sps:$4 sm:$0xff]   ;;  %v6097_v31 = vadd.f32 %v6096_v27, %v6095_v62  ;;  %v10476_v22 = vld [vmem:[#allocation9 + $0x328] ss:$16 sps:$4 sm:$0xff]   ;;  %v10481_v62 = vld [vmem:[#allocation9 + $0x344] ss:$16 sps:$4 sm:$0xff]  }
 0x506   : > { %v6089_v28 = vadd.f32 %v6088_v18, %v6087_v25  ;;  %v6102_v9 = vrot.slane %v6101_v26, 1  ;;  %v6108_v39 = vrot.slane %v6107_v42, 1  ;;  %v10470_v25 = vld [vmem:[#allocation9 + $0x308] ss:$16 sps:$4 sm:$0xff]  }
 0x507   : > { %8057 = vmatprep.mubr.bf16.mxu0 %v6482_v33  ;;  %8221 = vmatprep.mubr.bf16.mxu1 %v6482_v33  ;;  %v10463_v33 = vld [vmem:[#allocation9 + $0x2e4] ss:$16 sps:$4 sm:$0xff]  }
 0x508   : > { %8058 = vmatmul.mubr.bf16.vlgmr.msra.gmra.mrb[0].mxu0 %v6481_v37  ;;  %8222 = vmatmul.mubr.bf16.vlgmr.msra.gmra.mrb[0].mxu1 %v6481_v37  ;;  %v6090_v10 = vrot.slane %v6089_v28, 1  ;;  %v6109_v37 = vadd.f32 %v6108_v39, %v6107_v42 }
 0x509   : > { %8067 = vmatpush1.bf16.msra.mxu0 %v10419_v32  ;;  %8231 = vmatpush1.bf16.msra.mxu1 %v10422_v35  ;;  %v10458_v32 = vld [vmem:[#allocation9 + $0x2c8] ss:$16 sps:$4 sm:$0xff]   ;;  %v6103_v35 = vadd.f32 %v6102_v9, %v6101_v26  ;;  %v10484_v26 = vld [vmem:[#allocation9 + $0x34c] ss:$16 sps:$4 sm:$0xff]   ;;  %v10479_v9 = vld [vmem:[#allocation9 + $0x340] ss:$16 sps:$4 sm:$0xff]  }
 0x50a   : > { %8068 = vmatprep.subr.bf16.mxu0 %v10427_v36  ;;  %8232 = vmatprep.subr.bf16.mxu1 %v10430_v41  ;;  %v6091_v46 = vadd.f32 %v6090_v10, %v6089_v28  ;;  %v10466_v36 = vld [vmem:[#allocation9 + $0x2ec] ss:$16 sps:$4 sm:$0xff]  }
 0x50b   : > { %8098 = vmatprep.mubr.bf16.mxu0 %v6484_v38  ;;  %8262 = vmatprep.mubr.bf16.mxu1 %v6484_v38  ;;  %v12380_v38 = vmul.f32 0.125, %v6097_v31 }
 0x50c   : > { %v12378_v41 = vmul.f32 0.125, %v6091_v46  ;;  %v10482_v46 = vld [vmem:[#allocation9 + $0x348] ss:$16 sps:$4 sm:$0xff]  }
 0x50d   : > { %8069 = vmatpush1.bf16.msra.mxu0 %v10425_v45  ;;  %8233 = vmatpush1.bf16.msra.mxu1 %v10428_v52  ;;  %v12382_v45 = vmul.f32 0.125, %v6103_v35  ;;  %v12384_v52 = vmul.f32 0.125, %v6109_v37  ;;  %v10490_v35 = vld [vmem:[#allocation9 + $0x36c] ss:$16 sps:$4 sm:$0xff]  }
 0x50e   : > { %8070 = vmatprep.subr.bf16.mxu0 %v10433_v20  ;;  %8234 = vmatprep.subr.bf16.mxu1 %v10436_v5  ;;  %v6123_v20 = vsub.f32 %v12362_v63, %v12378_v41  ;;  %v6124_v5 = vsub.f32 %v12364_v0, %v12380_v38 }
 0x511   : > { %8071 = vmatpush1.bf16.msra.mxu0 %v10431_v59  ;;  %8235 = vmatpush1.bf16.msra.mxu1 %v10434_v50  ;;  %v10461_v59 = vld [vmem:[#allocation9 + $0x2e0] ss:$16 sps:$4 sm:$0xff]   ;;  %v10464_v50 = vld [vmem:[#allocation9 + $0x2e8] ss:$16 sps:$4 sm:$0xff]  }
 0x512   : > { %8072 = vmatprep.subr.bf16.mxu0 %v10439_v47  ;;  %8236 = vmatprep.subr.bf16.mxu1 %v10442_v60  ;;  %v6125_v47 = vsub.f32 %v12366_v2, %v12382_v45  ;;  %v6126_v60 = vsub.f32 %v12368_v3, %v12384_v52 }
 0x514   : > { %v6133_v4 = vmul.f32 %v6125_v47, %v6125_v47  ;;  %v6134_v6 = vmul.f32 %v6126_v60, %v6126_v60 }
 0x515   : > { %8073 = vmatpush1.bf16.msra.mxu0 %v10437_v23  ;;  %8237 = vmatpush1.bf16.msra.mxu1 %v10440_v57  ;;  %v10469_v23 = vld [vmem:[#allocation9 + $0x304] ss:$16 sps:$4 sm:$0xff]   ;;  %v10472_v57 = vld [vmem:[#allocation9 + $0x30c] ss:$16 sps:$4 sm:$0xff]  }
 0x516   : > { %8074 = vmatprep.subr.bf16.mxu0 %v10445_v61  ;;  %8238 = vmatprep.subr.bf16.mxu1 %v10448_v1  ;;  %v6131_v61 = vmul.f32 %v6123_v20, %v6123_v20  ;;  %v6132_v1 = vmul.f32 %v6124_v5, %v6124_v5  ;;  %v10485_v20 = vld [vmem:[#allocation9 + $0x360] ss:$16 sps:$4 sm:$0xff]  }
 0x518   : > { %v6159_v13 = vrot.slane %v6131_v61, 4 }
 0x519   : > { %8075 = vmatpush1.bf16.msra.mxu0 %v10443_v40  ;;  %8239 = vmatpush1.bf16.msra.mxu1 %v10446_v17  ;;  %v6165_v40 = vrot.slane %v6132_v1, 4  ;;  %v6171_v17 = vrot.slane %v6133_v4, 4 }
 0x51a   : > { %8076 = vmatprep.subr.bf16.mxu0 %v10451_v15  ;;  %8240 = vmatprep.subr.bf16.mxu1 %v10454_v48  ;;  %v6177_v15 = vrot.slane %v6134_v6, 4  ;;  %v6160_v8 = vadd.f32 %v6159_v13, %v6131_v61 }
 0x51b   : > { %v6166_v48 = vadd.f32 %v6165_v40, %v6132_v1  ;;  %v6172_v18 = vadd.f32 %v6171_v17, %v6133_v4  ;;  %v10496_v1 = vld [vmem:[#allocation9 + $0x38c] ss:$16 sps:$4 sm:$0xff]   ;;  %v10491_v40 = vld [vmem:[#allocation9 + $0x380] ss:$16 sps:$4 sm:$0xff]  }
 0x51c   : > { %v6178_v11 = vadd.f32 %v6177_v15, %v6134_v6  ;;  %v10502_v17 = vld [vmem:[#allocation9 + $0x3ac] ss:$16 sps:$4 sm:$0xff]   ;;  %v10497_v15 = vld [vmem:[#allocation9 + $0x3a0] ss:$16 sps:$4 sm:$0xff]  }
 0x51d   : > { %8077 = vmatpush1.bf16.msra.mxu0 %v10449_v53  ;;  %8241 = vmatpush1.bf16.msra.mxu1 %v10452_v30  ;;  %v6161_v53 = vrot.slane %v6160_v8, 2  ;;  %v6167_v28 = vrot.slane %v6166_v48, 2  ;;  %v6173_v30 = vrot.slane %v6172_v18, 2 }
 0x51e   : > { %8078 = vmatprep.subr.bf16.mxu0 %v10457_v54  ;;  %8242 = vmatprep.subr.bf16.mxu1 %v10460_v34  ;;  %v6179_v54 = vrot.slane %v6178_v11, 2 }
 0x51f   : > { %v6162_v42 = vadd.f32 %v6161_v53, %v6160_v8  ;;  %v6168_v34 = vadd.f32 %v6167_v28, %v6166_v48  ;;  %v6174_v10 = vadd.f32 %v6173_v30, %v6172_v18  ;;  %v10505_v8 = vld [vmem:[#allocation9 + $0x3c4] ss:$16 sps:$4 sm:$0xff]   ;;  %v10508_v48 = vld [vmem:[#allocation9 + $0x3cc] ss:$16 sps:$4 sm:$0xff]   ;;  %v10503_v18 = vld [vmem:[#allocation9 + $0x3c0] ss:$16 sps:$4 sm:$0xff]  }
 0x520   : > { %v6180_v27 = vadd.f32 %v6179_v54, %v6178_v11  ;;  %v10506_v11 = vld [vmem:[#allocation9 + $0x3c8] ss:$16 sps:$4 sm:$0xff]   ;;  %v10514_v53 = vld [vmem:[#allocation9 + $0x3ec] ss:$16 sps:$4 sm:$0xff]   ;;  %v6475_v28 = vmax.f32 %v12360_v12, 0.0 }
 0x521   : > { %8079 = vmatpush1.bf16.msra.mxu0 %v10455_v29  ;;  %8243 = vmatpush1.bf16.msra.mxu1 %v10458_v32  ;;  %v6163_v39 = vrot.slane %v6162_v42, 1  ;;  %v6169_v29 = vrot.slane %v6168_v34, 1  ;;  %v6175_v31 = vrot.slane %v6174_v10, 1  ;;  %v10523_v12 = vld [vmem:[#allocation9 + $0x424] ss:$16 sps:$4 sm:$0xff]  }
 0x522   : > { %8080 = vmatprep.subr.bf16.mxu0 %v10463_v33  ;;  %8244 = vmatprep.subr.bf16.mxu1 %v10466_v36  ;;  %v6181_v32 = vrot.slane %v6180_v27, 1  ;;  %v10487_v33 = vld [vmem:[#allocation9 + $0x364] ss:$16 sps:$4 sm:$0xff]  }
 0x523   : > { %v6164_v37 = vadd.f32 %v6163_v39, %v6162_v42  ;;  %v6170_v36 = vadd.f32 %v6169_v29, %v6168_v34  ;;  %v6176_v5 = vadd.f32 %v6175_v31, %v6174_v10  ;;  %v10509_v42 = vld [vmem:[#allocation9 + $0x3e0] ss:$16 sps:$4 sm:$0xff]   ;;  %v10512_v34 = vld [vmem:[#allocation9 + $0x3e8] ss:$16 sps:$4 sm:$0xff]   ;;  %v10517_v10 = vld [vmem:[#allocation9 + $0x404] ss:$16 sps:$4 sm:$0xff]  }
 0x524   : > { %v10515_v29 = vld [vmem:[#allocation9 + $0x400] ss:$16 sps:$4 sm:$0xff]   ;;  %v6061_v31 = vld [vmem:[#allocation8 + $0x8] sm:$0xff] }
 0x525   : > { %8081 = vmatpush1.bf16.msra.mxu0 %v10461_v59  ;;  %8245 = vmatpush1.bf16.msra.mxu1 %v10464_v50  ;;  %v6182_v59 = vadd.f32 %v6181_v32, %v6180_v27  ;;  %v10488_v50 = vld [vmem:[#allocation9 + $0x368] ss:$16 sps:$4 sm:$0xff]   ;;  %v6187_v47 = vmul.f32 0.125, %v6164_v37  ;;  %v6188_v60 = vmul.f32 0.125, %v6170_v36  ;;  %v10520_v27 = vld [vmem:[#allocation9 + $0x40c] ss:$16 sps:$4 sm:$0xff]   ;;  %v6483_v32 = vpack.c.bf16 %v6475_v28, %v6475_v28 }
 0x526   : > { %8082 = vmatprep.subr.bf16.mxu0 %v10469_v23  ;;  %8246 = vmatprep.subr.bf16.mxu1 %v10472_v57  ;;  %v10493_v23 = vld [vmem:[#allocation9 + $0x384] ss:$16 sps:$4 sm:$0xff]   ;;  %v6189_v57 = vmul.f32 0.125, %v6176_v5  ;;  %v10521_v36 = vld [vmem:[#allocation9 + $0x420] ss:$16 sps:$4 sm:$0xff]  }
 0x527   : > { %v6190_v61 = vmul.f32 0.125, %v6182_v59  ;;  %v6195_v4 = vadd.f32 1e-05, %v6187_v47  ;;  %v6196_v6 = vadd.f32 1e-05, %v6188_v60 }
 0x528   : > { %v10529_v5 = vld [vmem:[#allocation9 + $0x444] ss:$16 sps:$4 sm:$0xff]   ;;  %v10532_v59 = vld [vmem:[#allocation9 + $0x44c] ss:$16 sps:$4 sm:$0xff]  }
 0x529   : > { %8083 = vmatpush1.bf16.msra.mxu0 %v10467_v7  ;;  %8247 = vmatpush1.bf16.msra.mxu1 %v10470_v25  ;;  %v6197_v7 = vadd.f32 1e-05, %v6189_v57  ;;  %v6198_v13 = vadd.f32 1e-05, %v6190_v61  ;;  %v10494_v25 = vld [vmem:[#allocation9 + $0x388] ss:$16 sps:$4 sm:$0xff]   ;;  %10747 = vrsqrt.f32 %v6195_v4 }
 0x52a   : > { %8084 = vmatprep.subr.bf16.mxu0 %v10475_v14  ;;  %8248 = vmatprep.subr.bf16.mxu1 %v10478_v21  ;;  %v10499_v14 = vld [vmem:[#allocation9 + $0x3a4] ss:$16 sps:$4 sm:$0xff]   ;;  %10749 = vrsqrt.f32 %v6196_v6  ;;  %v10500_v21 = vld [vmem:[#allocation9 + $0x3a8] ss:$16 sps:$4 sm:$0xff]   ;;  %v10527_v57 = vld [vmem:[#allocation9 + $0x440] ss:$16 sps:$4 sm:$0xff]  }
 0x52b   : > { %10751 = vrsqrt.f32 %v6197_v7  ;;  %v10530_v61 = vld [vmem:[#allocation9 + $0x448] ss:$16 sps:$4 sm:$0xff]   ;;  %v10535_v4 = vld [vmem:[#allocation9 + $0x464] ss:$16 sps:$4 sm:$0xff]   ;;  %v10538_v6 = vld [vmem:[#allocation9 + $0x46c] ss:$16 sps:$4 sm:$0xff]  }
 0x52c   : > { %10753 = vrsqrt.f32 %v6198_v13  ;;  %v10547_v28 = vld [vmem:[#allocation9 + $0x4a4] ss:$16 sps:$4 sm:$0xff]  }
 0x52d   : > { %8085 = vmatpush1.bf16.msra.mxu0 %v10473_v19  ;;  %8249 = vmatpush1.bf16.msra.mxu1 %v10476_v22  ;;  %v10511_v19 = vld [vmem:[#allocation9 + $0x3e4] ss:$16 sps:$4 sm:$0xff]  }
 0x52e   : > { %8086 = vmatprep.subr.bf16.mxu0 %v10481_v62  ;;  %8250 = vmatprep.subr.bf16.mxu1 %v10484_v26 }
 0x531   : > { %8087 = vmatpush1.bf16.msra.mxu0 %v10479_v9  ;;  %8251 = vmatpush1.bf16.msra.mxu1 %v10482_v46  ;;  %v10518_v46 = vld [vmem:[#allocation9 + $0x408] ss:$16 sps:$4 sm:$0xff]  }
 0x532   : > { %8088 = vmatprep.subr.bf16.mxu0 %v10487_v33  ;;  %8252 = vmatprep.subr.bf16.mxu1 %v10490_v35  ;;  %v10526_v33 = vld [vmem:[#allocation9 + $0x42c] ss:$16 sps:$4 sm:$0xff]  }
 0x533   : > { %v10748_v22 = vpop.eup %10747 }
 0x534   : > { %v10750_v62 = vpop.eup %10749 }
 0x535   : > { %8089 = vmatpush1.bf16.msra.mxu0 %v10485_v20  ;;  %8253 = vmatpush1.bf16.msra.mxu1 %v10488_v50  ;;  %v10752_v30 = vpop.eup %10751  ;;  %v6232_v54 = vcombine.low %v10748_v22, %v10750_v62  ;;  %v10524_v20 = vld [vmem:[#allocation9 + $0x428] ss:$16 sps:$4 sm:$0xff]   ;;  %v10550_v62 = vld [vmem:[#allocation9 + $0x4ac] ss:$16 sps:$4 sm:$0xff]  }
 0x536   : > { %8090 = vmatprep.subr.bf16.mxu0 %v10493_v23  ;;  %8254 = vmatprep.subr.bf16.mxu1 %v10496_v1  ;;  %v10754_v26 = vpop.eup %10753 }
 0x537   : > { %v6233_v9 = vcombine.low %v10752_v30, %v10754_v26  ;;  %v6240_v39 = vrot.slane %v6232_v54, %v12314_v44  ;;  %v10548_v54 = vld [vmem:[#allocation9 + $0x4a8] ss:$16 sps:$4 sm:$0xff]  }
 0x539   : > { %8091 = vmatpush1.bf16.msra.mxu0 %v10491_v40  ;;  %8255 = vmatpush1.bf16.msra.mxu1 %v10494_v25  ;;  %v6247_v35 = vrot.slane %v6233_v9, %v12314_v44 }
 0x53a   : > { %8092 = vmatprep.subr.bf16.mxu0 %v10499_v14  ;;  %8256 = vmatprep.subr.bf16.mxu1 %v10502_v17 }
 0x53b   : > { %v6248_v37 = vcombine.low %v6240_v39, %v6247_v35  ;;  %v10557_v35 = vld [vmem:[#allocation9 + $0x4e0] ss:$16 sps:$4 sm:$0xff]  }
 0x53d   : > { %8093 = vmatpush1.bf16.msra.mxu0 %v10497_v15  ;;  %8257 = vmatpush1.bf16.msra.mxu1 %v10500_v21  ;;  %v6252_v50 = vmul.f32 %v6248_v37, %v6061_v31  ;;  %v10533_v15 = vld [vmem:[#allocation9 + $0x460] ss:$16 sps:$4 sm:$0xff]   ;;  %v10536_v21 = vld [vmem:[#allocation9 + $0x468] ss:$16 sps:$4 sm:$0xff]  }
 0x53e   : > { %8094 = vmatprep.subr.bf16.mxu0 %v10505_v8  ;;  %8258 = vmatprep.subr.bf16.mxu1 %v10508_v48  ;;  %v10541_v48 = vld [vmem:[#allocation9 + $0x484] ss:$16 sps:$4 sm:$0xff]   ;;  %v10560_v37 = vld [vmem:[#allocation9 + $0x4e8] ss:$16 sps:$4 sm:$0xff]  }
 0x53f   : > { %v12398_v47 = vrot.slane %v6252_v50, %v12318_v24  ;;  %v6278_v60 = vrot.slane %v6252_v50, %v12320_v49  ;;  %v6282_v23 = vrot.slane %v6252_v50, %v12322_v51  ;;  %v12403_v1 = vrot.slane %v6252_v50, %v12324_v56  ;;  %v10566_v50 = vld [vmem:[#allocation9 + $0x508] ss:$16 sps:$4 sm:$0xff]  }
 0x541   : > { %8095 = vmatpush1.bf16.msra.mxu0 %v10503_v18  ;;  %8259 = vmatpush1.bf16.msra.mxu1 %v10506_v11  ;;  %v6299_v7 = vmul.f32 %v12398_v47, %v12378_v41  ;;  %v6300_v13 = vmul.f32 %v6278_v60, %v12380_v38  ;;  %v6301_v40 = vmul.f32 %v6282_v23, %v12382_v45  ;;  %v10544_v18 = vld [vmem:[#allocation9 + $0x48c] ss:$16 sps:$4 sm:$0xff]   ;;  %v10539_v11 = vld [vmem:[#allocation9 + $0x480] ss:$16 sps:$4 sm:$0xff]  }
 0x542   : > { %8096 = vmatprep.subr.bf16.mxu0 %v10511_v19  ;;  %8260 = vmatprep.subr.bf16.mxu1 %v10514_v53  ;;  %v6302_v25 = vmul.f32 %v12403_v1, %v12384_v52  ;;  %v6378_v17 = vrot.slane %v6282_v23, %v12318_v24  ;;  %v10542_v19 = vld [vmem:[#allocation9 + $0x488] ss:$16 sps:$4 sm:$0xff]   ;;  %v6374_v53 = vrot.slane %v6278_v60, %v12318_v24  ;;  %v10571_v60 = vld [vmem:[#allocation9 + $0x524] ss:$16 sps:$4 sm:$0xff]   ;;  %v10574_v23 = vld [vmem:[#allocation9 + $0x52c] ss:$16 sps:$4 sm:$0xff]  }
 0x543   : > { %v6328_v14 = vcombine.low %v6299_v7, %v6300_v13  ;;  %v10575_v7 = vld [vmem:[#allocation9 + $0x540] ss:$16 sps:$4 sm:$0xff]   ;;  %v10578_v13 = vld [vmem:[#allocation9 + $0x548] ss:$16 sps:$4 sm:$0xff]  }
 0x544   : > { %v6329_v8 = vcombine.low %v6301_v40, %v6302_v25  ;;  %v6389_v38 = vmul.f32 %v6378_v17, %v12366_v2  ;;  %v10545_v2 = vld [vmem:[#allocation9 + $0x4a0] ss:$16 sps:$4 sm:$0xff]   ;;  %v6388_v26 = vmul.f32 %v6374_v53, %v12364_v0  ;;  %v10559_v0 = vld [vmem:[#allocation9 + $0x4e4] ss:$16 sps:$4 sm:$0xff]   ;;  %v10586_v25 = vld [vmem:[#allocation9 + $0x56c] ss:$16 sps:$4 sm:$0xff]  }
 0x545   : > { %8097 = vmatpush1.bf16.msra.mxu0 %v10509_v42  ;;  %8261 = vmatpush1.bf16.msra.mxu1 %v10512_v34  ;;  %v6336_v41 = vrot.slane %v6328_v14, %v12314_v44  ;;  %v10553_v34 = vld [vmem:[#allocation9 + $0x4c4] ss:$16 sps:$4 sm:$0xff]   ;;  %v10581_v14 = vld [vmem:[#allocation9 + $0x560] ss:$16 sps:$4 sm:$0xff]   ;;  %v10584_v17 = vld [vmem:[#allocation9 + $0x568] ss:$16 sps:$4 sm:$0xff]  }
 0x546   : > { %8107 = vmatprep.subr.bf16.mxu0 %v10517_v10  ;;  %8271 = vmatprep.subr.bf16.mxu1 %v10520_v27  ;;  %v6343_v45 = vrot.slane %v6329_v8, %v12314_v44  ;;  %v10556_v10 = vld [vmem:[#allocation9 + $0x4cc] ss:$16 sps:$4 sm:$0xff]   ;;  %v10583_v40 = vld [vmem:[#allocation9 + $0x564] ss:$16 sps:$4 sm:$0xff]   ;;  %v6370_v8 = vrot.slane %v12398_v47, %v12318_v24  ;;  %v10596_v53 = vld [vmem:[#allocation9 + $0x5a8] ss:$16 sps:$4 sm:$0xff]  }
 0x548   : > { %8099 = vmatmul.mubr.bf16.vlgmr.msra.gmra.mrb[0].mxu0 %v6483_v32  ;;  %8263 = vmatmul.mubr.bf16.vlgmr.msra.gmra.mrb[0].mxu1 %v6483_v32  ;;  %v6344_v52 = vcombine.low %v6336_v41, %v6343_v45  ;;  %v10562_v32 = vld [vmem:[#allocation9 + $0x4ec] ss:$16 sps:$4 sm:$0xff]   ;;  %v10590_v41 = vld [vmem:[#allocation9 + $0x588] ss:$16 sps:$4 sm:$0xff]  }
 0x549   : > { %8108 = vmatpush1.bf16.msra.mxu0 %v10515_v29  ;;  %8272 = vmatpush1.bf16.msra.mxu1 %v10518_v46  ;;  %v10551_v29 = vld [vmem:[#allocation9 + $0x4c0] ss:$16 sps:$4 sm:$0xff]   ;;  %v10554_v46 = vld [vmem:[#allocation9 + $0x4c8] ss:$16 sps:$4 sm:$0xff]   ;;  %v10598_v45 = vld [vmem:[#allocation9 + $0x5ac] ss:$16 sps:$4 sm:$0xff]  }
 0x54a   : > { %8109 = vmatprep.subr.bf16.mxu0 %v10523_v12  ;;  %8273 = vmatprep.subr.bf16.mxu1 %v10526_v33  ;;  %v6346_v22 = vrot.slane %v6344_v52, 7  ;;  %v6382_v52 = vrot.slane %v12403_v1, %v12318_v24 }
 0x54c   : > { %v12416_v30 = vsub.f32 %v6061_v31, %v6346_v22  ;;  %v10593_v22 = vld [vmem:[#allocation9 + $0x5a0] ss:$16 sps:$4 sm:$0xff]  }
 0x54d   : > { %8110 = vmatpush1.bf16.msra.mxu0 %v10521_v36  ;;  %8274 = vmatpush1.bf16.msra.mxu1 %v10524_v20  ;;  %v10565_v20 = vld [vmem:[#allocation9 + $0x504] ss:$16 sps:$4 sm:$0xff]  }
 0x54e   : > { %8111 = vmatprep.subr.bf16.mxu0 %v10529_v5  ;;  %8275 = vmatprep.subr.bf16.mxu1 %v10532_v59  ;;  %v6416_v42 = vrot.slane %v12416_v30, %v12343_v43  ;;  %v6420_v27 = vrot.slane %v12416_v30, %v12347_v55  ;;  %v10568_v5 = vld [vmem:[#allocation9 + $0x50c] ss:$16 sps:$4 sm:$0xff]   ;;  %v10563_v59 = vld [vmem:[#allocation9 + $0x500] ss:$16 sps:$4 sm:$0xff]  }
 0x550   : > { %v6456_v9 = vrot.slane %v6416_v42, %v12339_v58  ;;  %v6460_v39 = vrot.slane %v6420_v27, %v12339_v58  ;;  %v10610_v42 = vld [vmem:[#allocation9 + $0x5ec] ss:$16 sps:$4 sm:$0xff]   ;;  %v10605_v27 = vld [vmem:[#allocation9 + $0x5e0] ss:$16 sps:$4 sm:$0xff]  }
 0x551   : > { %8112 = vmatpush1.bf16.msra.mxu0 %v10527_v57  ;;  %8276 = vmatpush1.bf16.msra.mxu1 %v10530_v61  ;;  %v10569_v57 = vld [vmem:[#allocation9 + $0x520] ss:$16 sps:$4 sm:$0xff]   ;;  %v10572_v61 = vld [vmem:[#allocation9 + $0x528] ss:$16 sps:$4 sm:$0xff]  }
 0x552   : > { %8113 = vmatprep.subr.bf16.mxu0 %v10535_v4  ;;  %8277 = vmatprep.subr.bf16.mxu1 %v10538_v6  ;;  %v6470_v31 = vadd.f32 %v6456_v9, %v6388_v26  ;;  %v12425_v12 = vadd.f32 %v6460_v39, %v6389_v38  ;;  %v10577_v4 = vld [vmem:[#allocation9 + $0x544] ss:$16 sps:$4 sm:$0xff]   ;;  %v10580_v6 = vld [vmem:[#allocation9 + $0x54c] ss:$16 sps:$4 sm:$0xff]   ;;  %v10602_v26 = vld [vmem:[#allocation9 + $0x5c8] ss:$16 sps:$4 sm:$0xff]  }
 0x553   : > { %v10595_v38 = vld [vmem:[#allocation9 + $0x5a4] ss:$16 sps:$4 sm:$0xff]   ;;  %v10608_v9 = vld [vmem:[#allocation9 + $0x5e8] ss:$16 sps:$4 sm:$0xff]   ;;  %v10616_v39 = vld [vmem:[#allocation9 + $0x60c] ss:$16 sps:$4 sm:$0xff]  }
 0x554   : > { %v6478_v33 = vmax.f32 %v6470_v31, 0.0  ;;  %v10611_v31 = vld [vmem:[#allocation9 + $0x600] ss:$16 sps:$4 sm:$0xff]  }
 0x555   : > { %8114 = vmatpush1.bf16.msra.mxu0 %v10533_v15  ;;  %8278 = vmatpush1.bf16.msra.mxu1 %v10536_v21  ;;  %v10589_v15 = vld [vmem:[#allocation9 + $0x584] ss:$16 sps:$4 sm:$0xff]   ;;  %v10592_v21 = vld [vmem:[#allocation9 + $0x58c] ss:$16 sps:$4 sm:$0xff]  }
 0x556   : > { %8115 = vmatprep.subr.bf16.mxu0 %v10541_v48  ;;  %8279 = vmatprep.subr.bf16.mxu1 %v10544_v18  ;;  %v6486_v36 = vpack.c.bf16 %v6478_v33, %v6478_v33  ;;  %v6412_v48 = vrot.slane %v12416_v30, %v12339_v58  ;;  %v10587_v18 = vld [vmem:[#allocation9 + $0x580] ss:$16 sps:$4 sm:$0xff]   ;;  %v10622_v33 = vld [vmem:[#allocation9 + $0x62c] ss:$16 sps:$4 sm:$0xff]  }
 0x558   : > { %8139 = vmatprep.mubr.bf16.mxu0 %v6486_v36  ;;  %8303 = vmatprep.mubr.bf16.mxu1 %v6486_v36  ;;  %v6452_v47 = vrot.slane %v6412_v48, %v12339_v58  ;;  %v10620_v36 = vld [vmem:[#allocation9 + $0x628] ss:$16 sps:$4 sm:$0xff]  }
 0x559   : > { %8116 = vmatpush1.bf16.msra.mxu0 %v10539_v11  ;;  %8280 = vmatpush1.bf16.msra.mxu1 %v10542_v19  ;;  %v6424_v11 = vrot.slane %v12416_v30, %v12345_v16  ;;  %v6387_v19 = vmul.f32 %v6370_v8, %v12362_v63  ;;  %v10599_v30 = vld [vmem:[#allocation9 + $0x5c0] ss:$16 sps:$4 sm:$0xff]   ;;  %v10607_v63 = vld [vmem:[#allocation9 + $0x5e4] ss:$16 sps:$4 sm:$0xff]   ;;  %v10650_v48 = vld [vmem:[#allocation9 + $0x6c8] ss:$16 sps:$4 sm:$0xff]  }
 0x55a   : > { %8117 = vmatprep.subr.bf16.mxu0 %v10547_v28  ;;  %8281 = vmatprep.subr.bf16.mxu1 %v10550_v62  ;;  %v10601_v28 = vld [vmem:[#allocation9 + $0x5c4] ss:$16 sps:$4 sm:$0xff]   ;;  %v10604_v62 = vld [vmem:[#allocation9 + $0x5cc] ss:$16 sps:$4 sm:$0xff]   ;;  %v10647_v8 = vld [vmem:[#allocation9 + $0x6c0] ss:$16 sps:$4 sm:$0xff]  }
 0x55b   : > { %v6469_v1 = vadd.f32 %v6452_v47, %v6387_v19  ;;  %v10659_v19 = vld [vmem:[#allocation9 + $0x700] ss:$16 sps:$4 sm:$0xff]   ;;  %v10662_v47 = vld [vmem:[#allocation9 + $0x708] ss:$16 sps:$4 sm:$0xff]  }
 0x55d   : > { %8118 = vmatpush1.bf16.msra.mxu0 %v10545_v2  ;;  %8282 = vmatpush1.bf16.msra.mxu1 %v10548_v54  ;;  %v6390_v2 = vmul.f32 %v6382_v52, %v12368_v3  ;;  %v6464_v54 = vrot.slane %v6424_v11, %v12339_v58  ;;  %v10613_v3 = vld [vmem:[#allocation9 + $0x604] ss:$16 sps:$4 sm:$0xff]   ;;  %v10664_v11 = vld [vmem:[#allocation9 + $0x70c] ss:$16 sps:$4 sm:$0xff]  }
 0x55e   : > { %8119 = vmatprep.subr.bf16.mxu0 %v10553_v34  ;;  %8283 = vmatprep.subr.bf16.mxu1 %v10556_v10  ;;  %v6477_v10 = vmax.f32 %v6469_v1, 0.0  ;;  %v10661_v52 = vld [vmem:[#allocation9 + $0x704] ss:$16 sps:$4 sm:$0xff]   ;;  %v10671_v1 = vld [vmem:[#allocation9 + $0x740] ss:$16 sps:$4 sm:$0xff]  }
 0x55f   : > { %v6472_v34 = vadd.f32 %v6464_v54, %v6390_v2  ;;  %v10673_v2 = vld [vmem:[#allocation9 + $0x744] ss:$16 sps:$4 sm:$0xff]   ;;  %v10676_v54 = vld [vmem:[#allocation9 + $0x74c] ss:$16 sps:$4 sm:$0xff]  }
 0x561   : > { %8120 = vmatpush1.bf16.msra.mxu0 %v10551_v29  ;;  %8284 = vmatpush1.bf16.msra.mxu1 %v10554_v46  ;;  %v6480_v29 = vmax.f32 %v6472_v34, 0.0  ;;  %v6485_v46 = vpack.c.bf16 %v6477_v10, %v6477_v10  ;;  %v10680_v34 = vld [vmem:[#allocation9 + $0x768] ss:$16 sps:$4 sm:$0xff]   ;;  %v10685_v10 = vld [vmem:[#allocation9 + $0x784] ss:$16 sps:$4 sm:$0xff]  }
 0x562   : > { %8121 = vmatprep.subr.bf16.mxu0 %v10559_v0  ;;  %8285 = vmatprep.subr.bf16.mxu1 %v10562_v32  ;;  %v10614_v0 = vld [vmem:[#allocation9 + $0x608] ss:$16 sps:$4 sm:$0xff]   ;;  %v10619_v32 = vld [vmem:[#allocation9 + $0x624] ss:$16 sps:$4 sm:$0xff]  }
 0x565   : > { %8122 = vmatpush1.bf16.msra.mxu0 %v10557_v35  ;;  %8286 = vmatpush1.bf16.msra.mxu1 %v10560_v37  ;;  %v6488_v35 = vpack.c.bf16 %v6480_v29, %v6480_v29  ;;  %v10617_v37 = vld [vmem:[#allocation9 + $0x620] ss:$16 sps:$4 sm:$0xff]   ;;  %v10694_v29 = vld [vmem:[#allocation9 + $0x7ac] ss:$16 sps:$4 sm:$0xff]  }
 0x566   : > { %8123 = vmatprep.subr.bf16.mxu0 %v10565_v20  ;;  %8287 = vmatprep.subr.bf16.mxu1 %v10568_v5  ;;  %v10625_v20 = vld [vmem:[#allocation9 + $0x644] ss:$16 sps:$4 sm:$0xff]   ;;  %v10628_v5 = vld [vmem:[#allocation9 + $0x64c] ss:$16 sps:$4 sm:$0xff]  }
 0x569   : > { %8124 = vmatpush1.bf16.msra.mxu0 %v10563_v59  ;;  %8288 = vmatpush1.bf16.msra.mxu1 %v10566_v50  ;;  %v10623_v59 = vld [vmem:[#allocation9 + $0x640] ss:$16 sps:$4 sm:$0xff]   ;;  %v10626_v50 = vld [vmem:[#allocation9 + $0x648] ss:$16 sps:$4 sm:$0xff]  }
 0x56a   : > { %8125 = vmatprep.subr.bf16.mxu0 %v10571_v60  ;;  %8289 = vmatprep.subr.bf16.mxu1 %v10574_v23  ;;  %v10631_v60 = vld [vmem:[#allocation9 + $0x664] ss:$16 sps:$4 sm:$0xff]   ;;  %v10634_v23 = vld [vmem:[#allocation9 + $0x66c] ss:$16 sps:$4 sm:$0xff]  }
 0x56d   : > { %8126 = vmatpush1.bf16.msra.mxu0 %v10569_v57  ;;  %8290 = vmatpush1.bf16.msra.mxu1 %v10572_v61  ;;  %v10629_v57 = vld [vmem:[#allocation9 + $0x660] ss:$16 sps:$4 sm:$0xff]   ;;  %v10632_v61 = vld [vmem:[#allocation9 + $0x668] ss:$16 sps:$4 sm:$0xff]  }
 0x56e   : > { %8127 = vmatprep.subr.bf16.mxu0 %v10577_v4  ;;  %8291 = vmatprep.subr.bf16.mxu1 %v10580_v6  ;;  %v10637_v4 = vld [vmem:[#allocation9 + $0x684] ss:$16 sps:$4 sm:$0xff]   ;;  %v10640_v6 = vld [vmem:[#allocation9 + $0x68c] ss:$16 sps:$4 sm:$0xff]  }
 0x571   : > { %8128 = vmatpush1.bf16.msra.mxu0 %v10575_v7  ;;  %8292 = vmatpush1.bf16.msra.mxu1 %v10578_v13  ;;  %v10635_v7 = vld [vmem:[#allocation9 + $0x680] ss:$16 sps:$4 sm:$0xff]   ;;  %v10638_v13 = vld [vmem:[#allocation9 + $0x688] ss:$16 sps:$4 sm:$0xff]  }
 0x572   : > { %8129 = vmatprep.subr.bf16.mxu0 %v10583_v40  ;;  %8293 = vmatprep.subr.bf16.mxu1 %v10586_v25  ;;  %v10643_v40 = vld [vmem:[#allocation9 + $0x6a4] ss:$16 sps:$4 sm:$0xff]   ;;  %v10646_v25 = vld [vmem:[#allocation9 + $0x6ac] ss:$16 sps:$4 sm:$0xff]  }
 0x575   : > { %8130 = vmatpush1.bf16.msra.mxu0 %v10581_v14  ;;  %8294 = vmatpush1.bf16.msra.mxu1 %v10584_v17  ;;  %v10641_v14 = vld [vmem:[#allocation9 + $0x6a0] ss:$16 sps:$4 sm:$0xff]   ;;  %v10644_v17 = vld [vmem:[#allocation9 + $0x6a8] ss:$16 sps:$4 sm:$0xff]  }
 0x576   : > { %8131 = vmatprep.subr.bf16.mxu0 %v10589_v15  ;;  %8295 = vmatprep.subr.bf16.mxu1 %v10592_v21  ;;  %v10649_v15 = vld [vmem:[#allocation9 + $0x6c4] ss:$16 sps:$4 sm:$0xff]   ;;  %v10652_v21 = vld [vmem:[#allocation9 + $0x6cc] ss:$16 sps:$4 sm:$0xff]  }
 0x579   : > { %8132 = vmatpush1.bf16.msra.mxu0 %v10587_v18  ;;  %8296 = vmatpush1.bf16.msra.mxu1 %v10590_v41  ;;  %v10655_v18 = vld [vmem:[#allocation9 + $0x6e4] ss:$16 sps:$4 sm:$0xff]   ;;  %v10658_v41 = vld [vmem:[#allocation9 + $0x6ec] ss:$16 sps:$4 sm:$0xff]  }
 0x57a   : > { %8133 = vmatprep.subr.bf16.mxu0 %v10595_v38  ;;  %8297 = vmatprep.subr.bf16.mxu1 %v10598_v45  ;;  %v10653_v38 = vld [vmem:[#allocation9 + $0x6e0] ss:$16 sps:$4 sm:$0xff]   ;;  %v10656_v45 = vld [vmem:[#allocation9 + $0x6e8] ss:$16 sps:$4 sm:$0xff]  }
 0x57d   : > { %8134 = vmatpush1.bf16.msra.mxu0 %v10593_v22  ;;  %8298 = vmatpush1.bf16.msra.mxu1 %v10596_v53  ;;  %v10667_v22 = vld [vmem:[#allocation9 + $0x724] ss:$16 sps:$4 sm:$0xff]   ;;  %v10670_v53 = vld [vmem:[#allocation9 + $0x72c] ss:$16 sps:$4 sm:$0xff]  }
 0x57e   : > { %8135 = vmatprep.subr.bf16.mxu0 %v10601_v28  ;;  %8299 = vmatprep.subr.bf16.mxu1 %v10604_v62  ;;  %v10665_v28 = vld [vmem:[#allocation9 + $0x720] ss:$16 sps:$4 sm:$0xff]   ;;  %v10668_v62 = vld [vmem:[#allocation9 + $0x728] ss:$16 sps:$4 sm:$0xff]  }
 0x581   : > { %8136 = vmatpush1.bf16.msra.mxu0 %v10599_v30  ;;  %8300 = vmatpush1.bf16.msra.mxu1 %v10602_v26  ;;  %v10674_v30 = vld [vmem:[#allocation9 + $0x748] ss:$16 sps:$4 sm:$0xff]   ;;  %v10679_v26 = vld [vmem:[#allocation9 + $0x764] ss:$16 sps:$4 sm:$0xff]  }
 0x582   : > { %8137 = vmatprep.subr.bf16.mxu0 %v10607_v63  ;;  %8301 = vmatprep.subr.bf16.mxu1 %v10610_v42  ;;  %v10682_v63 = vld [vmem:[#allocation9 + $0x76c] ss:$16 sps:$4 sm:$0xff]   ;;  %v10677_v42 = vld [vmem:[#allocation9 + $0x760] ss:$16 sps:$4 sm:$0xff]  }
 0x585   : > { %8138 = vmatpush1.bf16.msra.mxu0 %v10605_v27  ;;  %8302 = vmatpush1.bf16.msra.mxu1 %v10608_v9  ;;  %v10688_v27 = vld [vmem:[#allocation9 + $0x78c] ss:$16 sps:$4 sm:$0xff]   ;;  %v10683_v9 = vld [vmem:[#allocation9 + $0x780] ss:$16 sps:$4 sm:$0xff]  }
 0x586   : > { %8148 = vmatprep.subr.bf16.mxu0 %v10613_v3  ;;  %8312 = vmatprep.subr.bf16.mxu1 %v10616_v39  ;;  %v10686_v3 = vld [vmem:[#allocation9 + $0x788] ss:$16 sps:$4 sm:$0xff]   ;;  %v10691_v39 = vld [vmem:[#allocation9 + $0x7a4] ss:$16 sps:$4 sm:$0xff]  }
 0x588   : > { %8140 = vmatmul.mubr.bf16.vlgmr.msra.gmra.mrb[0].mxu0 %v6485_v46  ;;  %8304 = vmatmul.mubr.bf16.vlgmr.msra.gmra.mrb[0].mxu1 %v6485_v46  ;;  %v10689_v46 = vld [vmem:[#allocation9 + $0x7a0] ss:$16 sps:$4 sm:$0xff]  }
 0x589   : > { %8149 = vmatpush1.bf16.msra.mxu0 %v10611_v31  ;;  %8313 = vmatpush1.bf16.msra.mxu1 %v10614_v0  ;;  %v10692_v31 = vld [vmem:[#allocation9 + $0x7a8] ss:$16 sps:$4 sm:$0xff]   ;;  %v10697_v0 = vld [vmem:[#allocation9 + $0x7c4] ss:$16 sps:$4 sm:$0xff]  }
 0x58a   : > { %8150 = vmatprep.subr.bf16.mxu0 %v10619_v32  ;;  %8314 = vmatprep.subr.bf16.mxu1 %v10622_v33  ;;  %v10700_v32 = vld [vmem:[#allocation9 + $0x7cc] ss:$16 sps:$4 sm:$0xff]   ;;  %v10695_v33 = vld [vmem:[#allocation9 + $0x7c0] ss:$16 sps:$4 sm:$0xff]  }
 0x58b   : > { %8180 = vmatprep.mubr.bf16.mxu0 %v6488_v35  ;;  %8344 = vmatprep.mubr.bf16.mxu1 %v6488_v35  ;;  %v10698_v35 = vld [vmem:[#allocation9 + $0x7c8] ss:$16 sps:$4 sm:$0xff]  }
 0x58d   : > { %8151 = vmatpush1.bf16.msra.mxu0 %v10617_v37  ;;  %8315 = vmatpush1.bf16.msra.mxu1 %v10620_v36  ;;  %v10703_v37 = vld [vmem:[#allocation9 + $0x7e4] ss:$16 sps:$4 sm:$0xff]   ;;  %v10706_v36 = vld [vmem:[#allocation9 + $0x7ec] ss:$16 sps:$4 sm:$0xff]  }
 0x58e   : > { %8152 = vmatprep.subr.bf16.mxu0 %v10625_v20  ;;  %8316 = vmatprep.subr.bf16.mxu1 %v10628_v5  ;;  %v6479_v20 = vmax.f32 %v12425_v12, 0.0  ;;  %v10701_v5 = vld [vmem:[#allocation9 + $0x7e0] ss:$16 sps:$4 sm:$0xff]  }
 0x58f   : > { %v10711_v12 = vld [vmem:[#allocation12 + $0x48] sm:$0xff]  }
 0x591   : > { %8153 = vmatpush1.bf16.msra.mxu0 %v10623_v59  ;;  %8317 = vmatpush1.bf16.msra.mxu1 %v10626_v50  ;;  %v10704_v59 = vld [vmem:[#allocation9 + $0x7e8] ss:$16 sps:$4 sm:$0xff]   ;;  %v6487_v50 = vpack.c.bf16 %v6479_v20, %v6479_v20 }
 0x592   : > { %8154 = vmatprep.subr.bf16.mxu0 %v10631_v60  ;;  %8318 = vmatprep.subr.bf16.mxu1 %v10634_v23  ;;  %v10707_v60 = vld [vmem:[#allocation12 + $0x40] sm:$0xff]  }
 0x593   : > { %v10708_v23 = vld [vmem:[#allocation12 + $0xc0] sm:$0xff]  }
 0x595   : > { %8155 = vmatpush1.bf16.msra.mxu0 %v10629_v57  ;;  %8319 = vmatpush1.bf16.msra.mxu1 %v10632_v61  ;;  %v10709_v57 = vld [vmem:[#allocation12] sm:$0xff]  }
 0x596   : > { %8156 = vmatprep.subr.bf16.mxu0 %v10637_v4  ;;  %8320 = vmatprep.subr.bf16.mxu1 %v10640_v6  ;;  %v10710_v61 = vld [vmem:[#allocation12 + $0x80] sm:$0xff]   ;;  %v10712_v4 = vld [vmem:[#allocation12 + $0xc8] sm:$0xff]  }
 0x597   : > { %v10713_v6 = vld [vmem:[#allocation12 + $0x8] sm:$0xff]  }
 0x599   : > { %8157 = vmatpush1.bf16.msra.mxu0 %v10635_v7  ;;  %8321 = vmatpush1.bf16.msra.mxu1 %v10638_v13  ;;  %v10714_v7 = vld [vmem:[#allocation12 + $0x88] sm:$0xff]   ;;  %v10715_v13 = vld [vmem:[#allocation12 + $0x50] sm:$0xff]  }
 0x59a   : > { %8158 = vmatprep.subr.bf16.mxu0 %v10643_v40  ;;  %8322 = vmatprep.subr.bf16.mxu1 %v10646_v25  ;;  %v10716_v40 = vld [vmem:[#allocation12 + $0xd0] sm:$0xff]  }
 0x59b   : > { %v10717_v25 = vld [vmem:[#allocation12 + $0x10] sm:$0xff]  }
 0x59d   : > { %8159 = vmatpush1.bf16.msra.mxu0 %v10641_v14  ;;  %8323 = vmatpush1.bf16.msra.mxu1 %v10644_v17  ;;  %v10718_v14 = vld [vmem:[#allocation12 + $0x90] sm:$0xff]   ;;  %v10719_v17 = vld [vmem:[#allocation12 + $0x58] sm:$0xff]  }
 0x59e   : > { %8160 = vmatprep.subr.bf16.mxu0 %v10649_v15  ;;  %8324 = vmatprep.subr.bf16.mxu1 %v10652_v21  ;;  %v10720_v15 = vld [vmem:[#allocation12 + $0xd8] sm:$0xff]  }
 0x59f   : > { %v10721_v21 = vld [vmem:[#allocation12 + $0x18] sm:$0xff]  }
 0x5a1   : > { %8161 = vmatpush1.bf16.msra.mxu0 %v10647_v8  ;;  %8325 = vmatpush1.bf16.msra.mxu1 %v10650_v48  ;;  %v10722_v8 = vld [vmem:[#allocation12 + $0x98] sm:$0xff]   ;;  %v10723_v48 = vld [vmem:[#allocation12 + $0x60] sm:$0xff]  }
 0x5a2   : > { %8162 = vmatprep.subr.bf16.mxu0 %v10655_v18  ;;  %8326 = vmatprep.subr.bf16.mxu1 %v10658_v41  ;;  %v10724_v18 = vld [vmem:[#allocation12 + $0xe0] sm:$0xff]  }
 0x5a3   : > { %v10725_v41 = vld [vmem:[#allocation12 + $0x20] sm:$0xff]  }
 0x5a5   : > { %8163 = vmatpush1.bf16.msra.mxu0 %v10653_v38  ;;  %8327 = vmatpush1.bf16.msra.mxu1 %v10656_v45  ;;  %v10726_v38 = vld [vmem:[#allocation12 + $0xa0] sm:$0xff]   ;;  %v10727_v45 = vld [vmem:[#allocation12 + $0x68] sm:$0xff]  }
 0x5a6   : > { %8164 = vmatprep.subr.bf16.mxu0 %v10661_v52  ;;  %8328 = vmatprep.subr.bf16.mxu1 %v10664_v11  ;;  %v10728_v52 = vld [vmem:[#allocation12 + $0xe8] sm:$0xff]  }
 0x5a7   : > { %v10729_v11 = vld [vmem:[#allocation12 + $0x28] sm:$0xff]  }
 0x5a9   : > { %8165 = vmatpush1.bf16.msra.mxu0 %v10659_v19  ;;  %8329 = vmatpush1.bf16.msra.mxu1 %v10662_v47  ;;  %v10730_v19 = vld [vmem:[#allocation12 + $0xa8] sm:$0xff]   ;;  %v10731_v47 = vld [vmem:[#allocation12 + $0x70] sm:$0xff]  }
 0x5aa   : > { %8166 = vmatprep.subr.bf16.mxu0 %v10667_v22  ;;  %8330 = vmatprep.subr.bf16.mxu1 %v10670_v53  ;;  %v10732_v22 = vld [vmem:[#allocation12 + $0xf0] sm:$0xff]  }
 0x5ab   : > { %v10733_v53 = vld [vmem:[#allocation12 + $0x30] sm:$0xff]  }
 0x5ad   : > { %8167 = vmatpush1.bf16.msra.mxu0 %v10665_v28  ;;  %8331 = vmatpush1.bf16.msra.mxu1 %v10668_v62  ;;  %v10734_v28 = vld [vmem:[#allocation12 + $0xb0] sm:$0xff]   ;;  %v10735_v62 = vld [vmem:[#allocation12 + $0x78] sm:$0xff]  }
 0x5ae   : > { %8168 = vmatprep.subr.bf16.mxu0 %v10673_v2  ;;  %8332 = vmatprep.subr.bf16.mxu1 %v10676_v54  ;;  %v10736_v2 = vld [vmem:[#allocation12 + $0xf8] sm:$0xff]  }
 0x5af   : > { %v10737_v54 = vld [vmem:[#allocation12 + $0x38] sm:$0xff]  }
 0x5b1   : > { %8169 = vmatpush1.bf16.msra.mxu0 %v10671_v1  ;;  %8333 = vmatpush1.bf16.msra.mxu1 %v10674_v30  ;;  %v10738_v1 = vld [vmem:[#allocation12 + $0xb8] sm:$0xff]  }
 0x5b2   : > { %8170 = vmatprep.subr.bf16.mxu0 %v10679_v26  ;;  %8334 = vmatprep.subr.bf16.mxu1 %v10682_v63 }
 0x5b5   : > { %8171 = vmatpush1.bf16.msra.mxu0 %v10677_v42  ;;  %8335 = vmatpush1.bf16.msra.mxu1 %v10680_v34 }
 0x5b6   : > { %8172 = vmatprep.subr.bf16.mxu0 %v10685_v10  ;;  %8336 = vmatprep.subr.bf16.mxu1 %v10688_v27 }
 0x5b9   : > { %8173 = vmatpush1.bf16.msra.mxu0 %v10683_v9  ;;  %8337 = vmatpush1.bf16.msra.mxu1 %v10686_v3 }
 0x5ba   : > { %8174 = vmatprep.subr.bf16.mxu0 %v10691_v39  ;;  %8338 = vmatprep.subr.bf16.mxu1 %v10694_v29 }
 0x5bd   : > { %8175 = vmatpush1.bf16.msra.mxu0 %v10689_v46  ;;  %8339 = vmatpush1.bf16.msra.mxu1 %v10692_v31 }
 0x5be   : > { %8176 = vmatprep.subr.bf16.mxu0 %v10697_v0  ;;  %8340 = vmatprep.subr.bf16.mxu1 %v10700_v32 }
 0x5c1   : > { %8177 = vmatpush1.bf16.msra.mxu0 %v10695_v33  ;;  %8341 = vmatpush1.bf16.msra.mxu1 %v10698_v35 }
 0x5c2   : > { %8178 = vmatprep.subr.bf16.mxu0 %v10703_v37  ;;  %8342 = vmatprep.subr.bf16.mxu1 %v10706_v36 }
 0x5c5   : > { %8179 = vmatpush1.bf16.msra.mxu0 %v10701_v5  ;;  %8343 = vmatpush1.bf16.msra.mxu1 %v10704_v59 }
 0x5c6   : > { %10126 = vmatprep.subr.bf16.mxu0 %v10707_v60  ;;  %10148 = vmatprep.subr.bf16.mxu1 %v10708_v23 }
 0x5c8   : > { %8181 = vmatmul.mubr.bf16.vlgmr.msra.gmra.mrb[0].mxu0 %v6487_v50  ;;  %8345 = vmatmul.mubr.bf16.vlgmr.msra.gmra.mrb[0].mxu1 %v6487_v50 }
 0x5c9   : > { %10127 = vmatpush3.bf16.msra.mxu0 %v10709_v57  ;;  %10149 = vmatpush3.bf16.msra.mxu1 %v10710_v61 }
 0x5ca   : > { %10128 = vmatprep.subr.bf16.mxu0 %v10711_v12  ;;  %10150 = vmatprep.subr.bf16.mxu1 %v10712_v4 }
 0x5cd   : > { %10129 = vmatpush3.bf16.msra.mxu0 %v10713_v6  ;;  %10151 = vmatpush3.bf16.msra.mxu1 %v10714_v7 }
 0x5ce   : > { %10130 = vmatprep.subr.bf16.mxu0 %v10715_v13  ;;  %10152 = vmatprep.subr.bf16.mxu1 %v10716_v40 }
 0x5d1   : > { %10131 = vmatpush3.bf16.msra.mxu0 %v10717_v25  ;;  %10153 = vmatpush3.bf16.msra.mxu1 %v10718_v14 }
 0x5d2   : > { %10132 = vmatprep.subr.bf16.mxu0 %v10719_v17  ;;  %10154 = vmatprep.subr.bf16.mxu1 %v10720_v15 }
 0x5d5   : > { %10133 = vmatpush3.bf16.msra.mxu0 %v10721_v21  ;;  %10155 = vmatpush3.bf16.msra.mxu1 %v10722_v8 }
 0x5d6   : > { %10134 = vmatprep.subr.bf16.mxu0 %v10723_v48  ;;  %10156 = vmatprep.subr.bf16.mxu1 %v10724_v18 }
 0x5d9   : > { %10135 = vmatpush3.bf16.msra.mxu0 %v10725_v41  ;;  %10157 = vmatpush3.bf16.msra.mxu1 %v10726_v38 }
 0x5da   : > { %10136 = vmatprep.subr.bf16.mxu0 %v10727_v45  ;;  %10158 = vmatprep.subr.bf16.mxu1 %v10728_v52 }
 0x5dd   : > { %10137 = vmatpush3.bf16.msra.mxu0 %v10729_v11  ;;  %10159 = vmatpush3.bf16.msra.mxu1 %v10730_v19 }
 0x5de   : > { %10138 = vmatprep.subr.bf16.mxu0 %v10731_v47  ;;  %10160 = vmatprep.subr.bf16.mxu1 %v10732_v22 }
 0x5e1   : > { %10139 = vmatpush3.bf16.msra.mxu0 %v10733_v53  ;;  %10161 = vmatpush3.bf16.msra.mxu1 %v10734_v28 }
 0x5e2   : > { %10140 = vmatprep.subr.bf16.mxu0 %v10735_v62  ;;  %10162 = vmatprep.subr.bf16.mxu1 %v10736_v2 }
 0x5e5   : > { %10141 = vmatpush3.bf16.msra.mxu0 %v10737_v54  ;;  %10163 = vmatpush3.bf16.msra.mxu1 %v10738_v1 }
 0x69b   : > { %v12440_v30 = vpop.f32.mrb[0].mxu0  ;;  %v12442_v26 = vpop.f32.mrb[0].mxu1 }
 0x69c   : > { %v8354_v63 = vrot.slane %v12440_v30, 4  ;;  %v8366_v42 = vrot.slane %v12442_v26, 4  ;;  %v12446_v34 = vpop.f32.mrb[1].mxu0  ;;  %v12448_v10 = vpop.f32.mrb[1].mxu1 }
 0x69d   : > { %v8360_v27 = vrot.slane %v12446_v34, 4  ;;  %v8372_v9 = vrot.slane %v12448_v10, 4  ;;  %v8186_v3 = vpop.f32.mrb[2].mxu0  ;;  %v8350_v39 = vpop.f32.mrb[2].mxu1 }
 0x69e   : > { %v8355_v29 = vadd.f32 %v8354_v63, %v12440_v30  ;;  %v8367_v46 = vadd.f32 %v8366_v42, %v12442_v26  ;;  %v8187_v31 = vpop.f32.mrb[3].mxu0  ;;  %v8351_v0 = vpop.f32.mrb[3].mxu1 }
 0x69f   : > { %v8361_v32 = vadd.f32 %v8360_v27, %v12446_v34  ;;  %v8373_v33 = vadd.f32 %v8372_v9, %v12448_v10 }
 0x6a0   : > { %v8356_v35 = vrot.slane %v8355_v29, 2  ;;  %v8368_v37 = vrot.slane %v8367_v46, 2 }
 0x6a1   : > { %v8362_v36 = vrot.slane %v8361_v32, 2  ;;  %v8374_v20 = vrot.slane %v8373_v33, 2 }
 0x6a2   : > { %v8357_v5 = vadd.f32 %v8356_v35, %v8355_v29  ;;  %v8369_v59 = vadd.f32 %v8368_v37, %v8367_v46 }
 0x6a3   : > { %v8363_v50 = vadd.f32 %v8362_v36, %v8361_v32  ;;  %v8375_v60 = vadd.f32 %v8374_v20, %v8373_v33 }
 0x6a4   : > { %v8358_v23 = vrot.slane %v8357_v5, 1  ;;  %v8370_v57 = vrot.slane %v8369_v59, 1 }
 0x6a5   : > { %v8364_v61 = vrot.slane %v8363_v50, 1  ;;  %v8376_v12 = vrot.slane %v8375_v60, 1 }
 0x6a6   : > { %v8359_v4 = vadd.f32 %v8358_v23, %v8357_v5  ;;  %v8371_v6 = vadd.f32 %v8370_v57, %v8369_v59 }
 0x6a7   : > { %v8365_v7 = vadd.f32 %v8364_v61, %v8363_v50  ;;  %v8377_v13 = vadd.f32 %v8376_v12, %v8375_v60 }
 0x6a8   : > { %v12456_v40 = vmul.f32 0.125, %v8359_v4  ;;  %v8380_v25 = vmul.f32 0.125, %v8371_v6 }
 0x6a9   : > { %v12458_v14 = vmul.f32 0.125, %v8365_v7  ;;  %v8381_v17 = vmul.f32 0.125, %v8377_v13 }
 0x6aa   : > { %v8382_v15 = vsub.f32 %v12440_v30, %v12456_v40  ;;  %v8384_v21 = vsub.f32 %v12442_v26, %v8380_v25 }
 0x6ab   : > { %v8383_v8 = vsub.f32 %v12446_v34, %v12458_v14  ;;  %v8385_v48 = vsub.f32 %v12448_v10, %v8381_v17 }
 0x6ac   : > { %v8386_v18 = vmul.f32 %v8382_v15, %v8382_v15  ;;  %v8388_v41 = vmul.f32 %v8384_v21, %v8384_v21  ;;  %v8353_v21 = vld [vmem:[#allocation11] sm:$0xff] }
 0x6ad   : > { %v8387_v38 = vmul.f32 %v8383_v8, %v8383_v8  ;;  %v8389_v45 = vmul.f32 %v8385_v48, %v8385_v48 }
 0x6ae   : > { %v8390_v52 = vrot.slane %v8386_v18, 4  ;;  %v8402_v11 = vrot.slane %v8388_v41, 4 }
 0x6af   : > { %v8396_v19 = vrot.slane %v8387_v38, 4  ;;  %v8408_v47 = vrot.slane %v8389_v45, 4 }
 0x6b0   : > { %v8391_v22 = vadd.f32 %v8390_v52, %v8386_v18  ;;  %v8403_v53 = vadd.f32 %v8402_v11, %v8388_v41 }
 0x6b1   : > { %v8397_v28 = vadd.f32 %v8396_v19, %v8387_v38  ;;  %v8409_v62 = vadd.f32 %v8408_v47, %v8389_v45 }
 0x6b2   : > { %v8392_v2 = vrot.slane %v8391_v22, 2  ;;  %v8404_v54 = vrot.slane %v8403_v53, 2 }
 0x6b3   : > { %v8398_v1 = vrot.slane %v8397_v28, 2  ;;  %v8410_v63 = vrot.slane %v8409_v62, 2 }
 0x6b4   : > { %v8393_v42 = vadd.f32 %v8392_v2, %v8391_v22  ;;  %v8405_v27 = vadd.f32 %v8404_v54, %v8403_v53 }
 0x6b5   : > { %v8399_v9 = vadd.f32 %v8398_v1, %v8397_v28  ;;  %v8411_v3 = vadd.f32 %v8410_v63, %v8409_v62 }
 0x6b6   : > { %v8394_v39 = vrot.slane %v8393_v42, 1  ;;  %v8406_v29 = vrot.slane %v8405_v27, 1 }
 0x6b7   : > { %v8400_v46 = vrot.slane %v8399_v9, 1  ;;  %v8412_v31 = vrot.slane %v8411_v3, 1 }
 0x6b8   : > { %v8395_v0 = vadd.f32 %v8394_v39, %v8393_v42  ;;  %v8407_v32 = vadd.f32 %v8406_v29, %v8405_v27 }
 0x6b9   : > { %v8401_v33 = vadd.f32 %v8400_v46, %v8399_v9  ;;  %v8413_v35 = vadd.f32 %v8412_v31, %v8411_v3 }
 0x6ba   : > { %v8414_v37 = vmul.f32 0.125, %v8395_v0  ;;  %v8416_v36 = vmul.f32 0.125, %v8407_v32 }
 0x6bb   : > { %v8415_v20 = vmul.f32 0.125, %v8401_v33  ;;  %v8417_v5 = vmul.f32 0.125, %v8413_v35 }
 0x6bc   : > { %v8418_v59 = vadd.f32 1e-05, %v8414_v37  ;;  %v8420_v50 = vadd.f32 1e-05, %v8416_v36  ;;  %v10086_v36 = vld [vmem:[#allocation14] ss:$0 sm:$0xff] }
 0x6bd   : > { %v8419_v60 = vadd.f32 1e-05, %v8415_v20  ;;  %v8421_v23 = vadd.f32 1e-05, %v8417_v5 }
 0x6be   : > { %10755 = vrsqrt.f32 %v8418_v59 }
 0x6bf   : > { %10757 = vrsqrt.f32 %v8420_v50 }
 0x6c0   : > { %10759 = vrsqrt.f32 %v8419_v60 }
 0x6c1   : > { %10761 = vrsqrt.f32 %v8421_v23 }
 0x6c8   : > { %v10756_v57 = vpop.eup %10755 }
 0x6c9   : > { %v10758_v61 = vpop.eup %10757 }
 0x6ca   : > { %v10760_v12 = vpop.eup %10759 }
 0x6cb   : > { %v10762_v4 = vpop.eup %10761  ;;  %v8430_v6 = vcombine.low %v10756_v57, %v10760_v12 }
 0x6cc   : > { %v8431_v7 = vcombine.low %v10758_v61, %v10762_v4 }
 0x6cd   : > { %v8438_v13 = vrot.slane %v8430_v6, %v12314_v44 }
 0x6ce   : > { %v8445_v15 = vrot.slane %v8431_v7, %v12314_v44 }
 0x6d0   : > { %v8446_v8 = vcombine.low %v8438_v13, %v8445_v15 }
 0x6d2   : > { %v8448_v48 = vmul.f32 %v8446_v8, %v8353_v21 }
 0x6d4   : > { %v8461_v18 = vrot.slane %v8448_v48, %v12322_v51  ;;  %v8465_v41 = vrot.slane %v8448_v48, %v12324_v56  ;;  %v8453_v38 = vrot.slane %v8448_v48, %v12318_v24  ;;  %v8457_v45 = vrot.slane %v8448_v48, %v12320_v49 }
 0x6d6   : > { %v8472_v52 = vmul.f32 %v8461_v18, %v8380_v25  ;;  %v8473_v11 = vmul.f32 %v8465_v41, %v8381_v17  ;;  %v8513_v19 = vrot.slane %v8465_v41, %v12318_v24  ;;  %v8470_v47 = vmul.f32 %v8453_v38, %v12456_v40 }
 0x6d7   : > { %v8471_v22 = vmul.f32 %v8457_v45, %v12458_v14  ;;  %v8505_v53 = vrot.slane %v8457_v45, %v12318_v24  ;;  %v8501_v28 = vrot.slane %v8453_v38, %v12318_v24  ;;  %v8509_v51 = vrot.slane %v8461_v18, %v12318_v24 }
 0x6d8   : > { %v8479_v62 = vcombine.low %v8472_v52, %v8473_v11  ;;  %v8517_v56 = vmul.f32 %v8513_v19, %v12448_v10 }
 0x6d9   : > { %v8478_v2 = vcombine.low %v8470_v47, %v8471_v22  ;;  %v8515_v49 = vmul.f32 %v8505_v53, %v12446_v34  ;;  %v8514_v25 = vmul.f32 %v8501_v28, %v12440_v30  ;;  %v8516_v17 = vmul.f32 %v8509_v51, %v12442_v26 }
 0x6da   : > { %v8493_v40 = vrot.slane %v8479_v62, %v12314_v44 }
 0x6db   : > { %v8486_v14 = vrot.slane %v8478_v2, %v12314_v44 }
 0x6dd   : > { %v8494_v54 = vcombine.low %v8486_v14, %v8493_v40 }
 0x6df   : > { %v8495_v1 = vrot.slane %v8494_v54, 7 }
 0x6e1   : > { %v8497_v63 = vsub.f32 %v8353_v21, %v8495_v1 }
 0x6e3   : > { %v8526_v42 = vrot.slane %v8497_v63, %v12343_v43  ;;  %v8534_v24 = vrot.slane %v8497_v63, %v12345_v16  ;;  %v8522_v10 = vrot.slane %v8497_v63, %v12339_v58  ;;  %v8530_v27 = vrot.slane %v8497_v63, %v12347_v55 }
 0x6e5   : > { %v8546_v34 = vrot.slane %v8526_v42, %v12339_v58  ;;  %v8554_v30 = vrot.slane %v8534_v24, %v12339_v58  ;;  %v8542_v26 = vrot.slane %v8522_v10, %v12339_v58  ;;  %v8550_v9 = vrot.slane %v8530_v27, %v12339_v58 }
 0x6e7   : > { %v8556_v44 = vadd.f32 %v8546_v34, %v8515_v49  ;;  %v8558_v3 = vadd.f32 %v8554_v30, %v8517_v56  ;;  %v8555_v39 = vadd.f32 %v8542_v26, %v8514_v25  ;;  %v8557_v29 = vadd.f32 %v8550_v9, %v8516_v17 }
 0x6e9   : > { %v8560_v46 = vmax.f32 %v8556_v44, 0.0  ;;  %v8562_v43 = vmax.f32 %v8558_v3, 0.0  ;;  %v8559_v31 = vmax.f32 %v8555_v39, 0.0  ;;  %v8561_v16 = vmax.f32 %v8557_v29, 0.0 }
 0x6eb   : > { %v8564_v0 = vpack.c.bf16 %v8560_v46, %v8560_v46  ;;  %v8566_v32 = vpack.c.bf16 %v8562_v43, %v8562_v43  ;;  %v8563_v33 = vpack.c.bf16 %v8559_v31, %v8559_v31  ;;  %v8565_v55 = vpack.c.bf16 %v8561_v16, %v8561_v16 }
 0x6ed   : > { %8862 = vmatprep.mubr.bf16.mxu0 %v8564_v0  ;;  %8902 = vmatprep.mubr.bf16.mxu1 %v8566_v32 }
 0x6ee   : > { %8863 = vmatmul.mubr.bf16.vlgmr.msra.gmra.mrb[4].mxu0 %v8563_v33  ;;  %8903 = vmatmul.mubr.bf16.vlgmr.msra.gmra.mrb[4].mxu1 %v8565_v55 }
 0x7c1   : > { %v10142_v35 = vpop.f32.mrb[4].mxu0  ;;  %v10164_v37 = vpop.f32.mrb[4].mxu1 }
 0x7c2   : > { %v10143_v58 = vpop.f32.mrb[5].mxu0  ;;  %v10165_v20 = vpop.f32.mrb[5].mxu1 }
 0x7c3   : > { %v10144_v5 = vadd.f32 %v10143_v58, %v10142_v35  ;;  %v10166_v59 = vadd.f32 %v10165_v20, %v10164_v37  ;;  %v10145_v50 = vpop.f32.mrb[6].mxu0  ;;  %v10167_v60 = vpop.f32.mrb[6].mxu1 }
 0x7c4   : > { %v10146_v23 = vpop.f32.mrb[7].mxu0  ;;  %v10168_v57 = vpop.f32.mrb[7].mxu1 }
 0x7c5   : > { %v8865_v61 = vadd.f32 %v10144_v5, %v10086_v36 }
 0x7c7   : > { %v8905_v12 = vadd.f32 %v10166_v59, %v8865_v61 }
 0x7c9   : > { %8910 = vst [vmem:[#allocation15] sm:$0xff] %v8905_v12 }
 0x7ca PF: > { %p10262_p5 = scmp.eq.s32.totalorder %s11120_s30, 1  ;;  %s11058_s22 = smov [#allocation15]  }
 0x7cb   : > { %s8918_s27 = sshll.u32 %s11058_s22, 4  ;;  %s8919_s27 = int_to_ptr.vmem [resolvable:$true] %s8918_s27 }
 0x7cc   : > { %s10961_s11 = scalar_lea.vmem %s8919_s27, 128  ;;  %p10968_p2 = scmp.lt.s32.totalorder %s8919_s27, %s8919_s27 }
 0x7cd   : > { %p10962_p8 = scmp.ne.s32.totalorder %s8919_s27, %s10961_s11  ;;  %p10969_p9 = scmp.lt.s32.totalorder %s10961_s11, %s10961_s11 }
 0x7cf   : > { %p10963_p7 = pnand %p10962_p8, %p10262_p5  ;;  %p10970_p6 = por %p10969_p9, %p10968_p2 }
 0x7d1   : > { %p10964_p13 = pneg %p10963_p7 }
 0x7d3   : > { %p10971_p3 = pnand %p10970_p6, %p10964_p13 }
 0x7d5   : > { %10974 = shalt.err (!%p10971_p3)
}
 0x7d6   : > { %s10975_s10 = scalar_lea.hbm %s12535_s7, 128 }
 0x7d7   : > { %p10976_p1 = scmp.ne.s32.totalorder %s12535_s7, %s10975_s10  ;;  %p10981_p12 = scmp.lt.u32.totalorder %s10975_s10, %s12535_s7 }
 0x7d9   : > { %p10977_p4 = pnand %p10976_p1, %p10262_p5 }
 0x7db   : > { %p10978_p10 = pneg %p10977_p4 }
 0x7dd   : > { %p10983_p11 = pnand %p10981_p12, %p10978_p10 }
 0x7df   : > { %10986 = shalt.err (!%p10983_p11)
}
 0x7e0   : > { %10223 = dma.vmem_to_hbm [thread:$0]  (%p10262_p5), %s8919_s27, 128, %s12535_s7, [#allocation5]  }
 0x7e1   : > { %11024 = dma.done.wait (%p10262_p5), [#allocation5], 128  }
 0x7e2   : > { %11026 = vsyncadd (%p10262_p5), [#allocation5], 4294967168 }
 0x7e3 PF: > { %p21_p0 = scmp.ge.s32.totalorder %s11267_s19, 4   ;;  %s12556_s24 = smov %s11033_s25 }
 0x7e4   : > { %s12557_s25 = smov %s11037_s26  ;;  %s12558_s26 = smov %s11279_s23 }
 0x7e5   : > { %s12559_s27 = smov %s11267_s19  ;;  %23 = sbr.rel (!%p21_p0) target bundleno = 9 (0x9), region = 119 }
 0x7ec   :  { %8931 = vsyncpa [#allocation4], 1 }
 0x7ed   :  { %8933 = vsyncpa [#allocation4 + $0x1], 1 }
 0x7ee   :  { %8934 = vsyncpa [#allocation7], 1 }
 0x7ef   :  { %8936 = vsyncpa [#allocation7 + $0x1], 1 }
 0x7f0   :  { %8937 = vsyncpa [#allocation10], 1 }
 0x7f1   :  { %8938 = vsyncpa [#allocation13], 1 }
 0x7f2   :  { %8939 = vsyncpa [#allocation5], 1 }
 0x7f3   :  { %8941 = vsyncpa [#allocation5 + $0x1], 1 }

</bundles_post_ra>
